<compile_context>
chip_gen: v6e
topology: v6e:2x2x1
jax: 0.10.0
libtpu: 0.0.40
codegen_flags: <defaults>
</compile_context>

<pallas_src>
import functools

import jax
import jax.numpy as jnp
from jax.experimental import pallas as pl
from jax.experimental.pallas import tpu as pltpu  # noqa: F401  (TPU backend)


def _round_up(x, m):
    return (x + m - 1) // m * m


# ----------------------------------------------------------------------------
# Fused Pallas kernel: whole MLP forward, everything resident in VMEM.
# refs = (x_ref, w0_ref, b0_ref, w1_ref, b1_ref, ..., o_ref)
# ----------------------------------------------------------------------------
def _mlp_fused_kernel(*refs, n_layers):
    x_ref = refs[0]
    o_ref = refs[-1]
    h = x_ref[...]                                    # bf16 [Mp, Kp0]
    for i in range(n_layers):                         # static Python loop
        w_ref = refs[1 + 2 * i]                       # bf16 [Kp_i, Np_i]
        b_ref = refs[2 + 2 * i]                       # f32  [1,   Np_i]
        y = jnp.dot(h, w_ref[...],
                    preferred_element_type=jnp.float32) + b_ref[...]
        if i < n_layers - 1:
            h = jnp.maximum(y, 0.0).astype(jnp.bfloat16)   # fused ReLU, bf16
        else:
            o_ref[...] = y                            # f32 logits (padded)


def mlp_forward_pallas(x_p, layers):
    """x_p: [Mp, Kp0] bf16; layers: list of (w_p bf16 [Kp,Np], b_p f32 [1,Np])."""
    Mp = x_p.shape[0]
    n_layers = len(layers)
    np_last = layers[-1][0].shape[1]
    args = [x_p]
    for w_p, b_p in layers:
        args.extend((w_p, b_p))
    kernel = functools.partial(_mlp_fused_kernel, n_layers=n_layers)
    # No grid: every operand is a single full-array VMEM block (total < 4 MiB).
    return pl.pallas_call(
        kernel,
        out_shape=jax.ShapeDtypeStruct((Mp, np_last), jnp.float32),
    )(*args)


# ----------------------------------------------------------------------------
# Parameter init (deterministic, PyTorch nn.Linear-style U(-1/sqrt(fan_in), .))
# Weights pre-padded to 128-aligned tiles and stored as bf16 at init time.
# ----------------------------------------------------------------------------
def init_mlp(key, input_dim=28 * 28, hidden_dims=(512, 512, 2000), output_dim=2):
    dims = [input_dim] + list(hidden_dims) + [output_dim]
    dims_p = [_round_up(d, 128) for d in dims]        # lane-aligned only
    layers = []
    keys = jax.random.split(key, len(dims) - 1)
    for i, k in enumerate(keys):
        kw, kb = jax.random.split(k)
        bound = 1.0 / float(dims[i]) ** 0.5
        w = jax.random.uniform(kw, (dims[i], dims[i + 1]), jnp.float32,
                               -bound, bound)
        b = jax.random.uniform(kb, (dims[i + 1],), jnp.float32, -bound, bound)
        w_p = jnp.zeros((dims_p[i], dims_p[i + 1]), jnp.bfloat16)
        w_p = w_p.at[:dims[i], :dims[i + 1]].set(w.astype(jnp.bfloat16))
        b_p = jnp.zeros((1, dims_p[i + 1]), jnp.float32)
        b_p = b_p.at[:, :dims[i + 1]].set(b.reshape(1, -1))
        layers.append((w_p, b_p))
    return layers, tuple(dims), tuple(dims_p)


# ----------------------------------------------------------------------------
# Forward (one jax.jit; single pallas_call inside)
# ----------------------------------------------------------------------------
def make_forward(dims, dims_p, probabilities=False, mode="softmax",
                 normalize=False):
    in_dim, out_dim = dims[0], dims[-1]
    kp0 = dims_p[0]

    @jax.jit
    def forward(layers, x):
        # x: [B, in_dim] f32 (flattened input, as in the PyTorch module)
        B = x.shape[0]
        Mp = _round_up(max(B, 8), 8)                   # sublane alignment
        h = jnp.zeros((Mp, kp0), jnp.bfloat16)
        h = h.at[:B, :in_dim].set(x.astype(jnp.bfloat16))
        out = mlp_forward_pallas(h, layers)            # f32 [Mp, Np_last]
        logits = out[:B, :out_dim]
        # Optional heads: plain jnp on a [B, out_dim] tensor.
        if probabilities:
            if mode == "softmax":
                logits = jax.nn.softmax(logits, axis=1)
            elif mode == "cauchy":
                c = 1.0 / (1.0 + logits ** 2)
                denom = jnp.maximum(jnp.sum(jnp.abs(c), axis=1, keepdims=True),
                                    1e-12)
                logits = c / denom
        if normalize:
            denom = jnp.maximum(
                jnp.sqrt(jnp.sum(logits * logits, axis=1, keepdims=True)),
                1e-12)
            logits = logits / denom
        return logits

    return forward


if __name__ == "__main__":
    key = jax.random.PRNGKey(0)
    kp, kx = jax.random.split(key)
    input_dim, hidden_dims, output_dim = 28 * 28, (512, 512, 2000), 2
    layers, dims, dims_p = init_mlp(kp, input_dim, hidden_dims, output_dim)
    # Default MLPMapper config: probabilities=False, normalize=False -> logits.
    forward = make_forward(dims, dims_p, probabilities=False,
                           mode="softmax", normalize=False)
    x = jax.random.normal(kx, (8, input_dim), jnp.float32)
    out = forward(layers, x)
    out = jax.block_until_ready(out)
    assert out.shape == (8, output_dim), out.shape
    assert bool(jnp.all(jnp.isfinite(out)))
    print("KERNEL_OK")
</pallas_src>

<mosaic_0001>
module attributes {stable_mosaic.version = 11 : i64} {
  func.func @_mlp_fused_kernel(%arg0: memref<8x896xbf16, #tpu.memory_space<vmem>>, %arg1: memref<896x512xbf16, #tpu.memory_space<vmem>>, %arg2: memref<1x512xf32, #tpu.memory_space<vmem>>, %arg3: memref<512x512xbf16, #tpu.memory_space<vmem>>, %arg4: memref<1x512xf32, #tpu.memory_space<vmem>>, %arg5: memref<512x2048xbf16, #tpu.memory_space<vmem>>, %arg6: memref<1x2048xf32, #tpu.memory_space<vmem>>, %arg7: memref<2048x128xbf16, #tpu.memory_space<vmem>>, %arg8: memref<1x128xf32, #tpu.memory_space<vmem>>, %arg9: memref<8x128xf32, #tpu.memory_space<vmem>>) attributes {dimension_semantics = [], scalar_prefetch = 0 : i64, scratch_operands = 0 : i64, tpu.core_type = #tpu.core_type<tc>} {
    %c0 = arith.constant 0 : index
    %c0_0 = arith.constant 0 : index
    %0 = vector.load %arg0[%c0, %c0_0] : memref<8x896xbf16, #tpu.memory_space<vmem>>, vector<8x896xbf16>
    %c0_1 = arith.constant 0 : index
    %c0_2 = arith.constant 0 : index
    %1 = vector.load %arg1[%c0_1, %c0_2] : memref<896x512xbf16, #tpu.memory_space<vmem>>, vector<896x512xbf16>
    %cst = arith.constant dense<0.000000e+00> : vector<8x512xf32>
    %2 = tpu.matmul %0, %1, %cst {dimension_numbers = #tpu.dot_dimension_numbers<[1], [0], [0], [1], [0, 0, 1, 1], [], []>} : vector<8x896xbf16>, vector<896x512xbf16>, vector<8x512xf32> -> vector<8x512xf32>
    %c0_3 = arith.constant 0 : index
    %c0_4 = arith.constant 0 : index
    %3 = vector.load %arg2[%c0_3, %c0_4] : memref<1x512xf32, #tpu.memory_space<vmem>>, vector<1x512xf32>
    %4 = vector.broadcast %3 : vector<1x512xf32> to vector<8x512xf32>
    %5 = arith.addf %2, %4 : vector<8x512xf32>
    %cst_5 = arith.constant 0.000000e+00 : f32
    %6 = vector.broadcast %cst_5 : f32 to vector<8x512xf32>
    %7 = arith.maximumf %5, %6 : vector<8x512xf32>
    %8 = arith.truncf %7 : vector<8x512xf32> to vector<8x512xbf16>
    %c0_6 = arith.constant 0 : index
    %c0_7 = arith.constant 0 : index
    %9 = vector.load %arg3[%c0_6, %c0_7] : memref<512x512xbf16, #tpu.memory_space<vmem>>, vector<512x512xbf16>
    %cst_8 = arith.constant dense<0.000000e+00> : vector<8x512xf32>
    %10 = tpu.matmul %8, %9, %cst_8 {dimension_numbers = #tpu.dot_dimension_numbers<[1], [0], [0], [1], [0, 0, 1, 1], [], []>} : vector<8x512xbf16>, vector<512x512xbf16>, vector<8x512xf32> -> vector<8x512xf32>
    %c0_9 = arith.constant 0 : index
    %c0_10 = arith.constant 0 : index
    %11 = vector.load %arg4[%c0_9, %c0_10] : memref<1x512xf32, #tpu.memory_space<vmem>>, vector<1x512xf32>
    %12 = vector.broadcast %11 : vector<1x512xf32> to vector<8x512xf32>
    %13 = arith.addf %10, %12 : vector<8x512xf32>
    %cst_11 = arith.constant 0.000000e+00 : f32
    %14 = vector.broadcast %cst_11 : f32 to vector<8x512xf32>
    %15 = arith.maximumf %13, %14 : vector<8x512xf32>
    %16 = arith.truncf %15 : vector<8x512xf32> to vector<8x512xbf16>
    %c0_12 = arith.constant 0 : index
    %c0_13 = arith.constant 0 : index
    %17 = vector.load %arg5[%c0_12, %c0_13] : memref<512x2048xbf16, #tpu.memory_space<vmem>>, vector<512x2048xbf16>
    %cst_14 = arith.constant dense<0.000000e+00> : vector<8x2048xf32>
    %18 = tpu.matmul %16, %17, %cst_14 {dimension_numbers = #tpu.dot_dimension_numbers<[1], [0], [0], [1], [0, 0, 1, 1], [], []>} : vector<8x512xbf16>, vector<512x2048xbf16>, vector<8x2048xf32> -> vector<8x2048xf32>
    %c0_15 = arith.constant 0 : index
    %c0_16 = arith.constant 0 : index
    %19 = vector.load %arg6[%c0_15, %c0_16] : memref<1x2048xf32, #tpu.memory_space<vmem>>, vector<1x2048xf32>
    %20 = vector.broadcast %19 : vector<1x2048xf32> to vector<8x2048xf32>
    %21 = arith.addf %18, %20 : vector<8x2048xf32>
    %cst_17 = arith.constant 0.000000e+00 : f32
    %22 = vector.broadcast %cst_17 : f32 to vector<8x2048xf32>
    %23 = arith.maximumf %21, %22 : vector<8x2048xf32>
    %24 = arith.truncf %23 : vector<8x2048xf32> to vector<8x2048xbf16>
    %c0_18 = arith.constant 0 : index
    %c0_19 = arith.constant 0 : index
    %25 = vector.load %arg7[%c0_18, %c0_19] : memref<2048x128xbf16, #tpu.memory_space<vmem>>, vector<2048x128xbf16>
    %cst_20 = arith.constant dense<0.000000e+00> : vector<8x128xf32>
    %26 = tpu.matmul %24, %25, %cst_20 {dimension_numbers = #tpu.dot_dimension_numbers<[1], [0], [0], [1], [0, 0, 1, 1], [], []>} : vector<8x2048xbf16>, vector<2048x128xbf16>, vector<8x128xf32> -> vector<8x128xf32>
    %c0_21 = arith.constant 0 : index
    %c0_22 = arith.constant 0 : index
    %27 = vector.load %arg8[%c0_21, %c0_22] : memref<1x128xf32, #tpu.memory_space<vmem>>, vector<1x128xf32>
    %28 = vector.broadcast %27 : vector<1x128xf32> to vector<8x128xf32>
    %29 = arith.addf %26, %28 : vector<8x128xf32>
    %c0_23 = arith.constant 0 : index
    %c0_24 = arith.constant 0 : index
    %30 = vector.load %arg9[%c0_23, %c0_24] : memref<8x128xf32, #tpu.memory_space<vmem>>, vector<8x128xf32>
    tpu.vector_store %arg9[%c0_23, %c0_24], %29 {strides = array<i32>} : memref<8x128xf32, #tpu.memory_space<vmem>>, vector<8x128xf32>,
    return
  }
}

</mosaic_0001>

<bundles_post_ra>
// kernel: forward.1
= control target key start
LH: loop header
LB: loop body
LE: loop exit
PB: predicated region body
PF: predicated region fallthrough
CT: control target
= control target key end

     0   :  { %14 = vsyncpa [#allocation3], 0  ;;  %s10444_s0 = inlined_call_operand.vmem [shape: bf16[8,896], index: 0, kind: input, shape index: {}]   ;;  %s10445_s1 = inlined_call_operand.hbm [shape: bf16[896,512], index: 1, kind: input, shape index: {}]   ;;  %s10446_s2 = inlined_call_operand.hbm [shape: f32[1,512], index: 2, kind: input, shape index: {}]   ;;  %s10447_s3 = inlined_call_operand.hbm [shape: bf16[512,512], index: 3, kind: input, shape index: {}]   ;;  %s10448_s4 = inlined_call_operand.hbm [shape: f32[1,512], index: 4, kind: input, shape index: {}]   ;;  %s10449_s5 = inlined_call_operand.hbm [shape: bf16[512,2048], index: 5, kind: input, shape index: {}]   ;;  %s10450_s6 = inlined_call_operand.hbm [shape: f32[1,2048], index: 6, kind: input, shape index: {}]   ;;  %s10451_s7 = inlined_call_operand.hbm [shape: bf16[2048,128], index: 7, kind: input, shape index: {}]   ;;  %s10452_s8 = inlined_call_operand.hbm [shape: f32[1,128], index: 8, kind: input, shape index: {}]   ;;  %s10453_s9 = inlined_call_operand.vmem [shape: f32[8,128], index: 9, kind: output, shape index: {}]  }
   0x1   :  { %15 = vsyncpa [#allocation5], 0 }
   0x2   :  { %16 = vsyncpa [#allocation8], 0 }
   0x3   :  { %17 = vsyncpa [#allocation11], 0 }
   0x4   :  { %18 = vsyncpa [#allocation14], 0  ;;  %s10057_s30 = smov [#allocation4]   ;;  %s10058_s11 = smov [#allocation7]  }
   0x5   :  { %s39_s10 = sshll.u32 %s10057_s30, 4  ;;  %s61_s12 = sshll.u32 %s10058_s11, 4  ;;  %s40_s10 = int_to_ptr.vmem [resolvable:$true] %s39_s10  ;;  %s62_s12 = int_to_ptr.vmem [resolvable:$true] %s61_s12 }
   0x6   :  { %s9895_s13 = scalar_lea.vmem %s40_s10, 64  ;;  %p9900_p1 = scmp.lt.s32.totalorder %s40_s10, %s40_s10 }
   0x7   :  { %p9896_p0 = scmp.ne.s32.totalorder %s40_s10, %s9895_s13  ;;  %p9901_p2 = scmp.lt.s32.totalorder %s9895_s13, %s9895_s13 }
   0x9   :  { %p9902_p3 = por %p9901_p2, %p9900_p1 }
   0xb   :  { %p9903_p4 = pnand %p9902_p3, %p9896_p0 }
   0xd   :  { %9906 = shalt.err (!%p9903_p4)
}
   0xe   :  { %42 = dma.hbm_to_vmem [thread:$0]  %s10446_s2, 64, %s40_s10, [#allocation5]  }
   0xf   :  { %s9915_s16 = scalar_lea.vmem %s62_s12, 64  ;;  %p9920_p6 = scmp.lt.s32.totalorder %s62_s12, %s62_s12 }
  0x10   :  { %p9916_p5 = scmp.ne.s32.totalorder %s62_s12, %s9915_s16  ;;  %p9921_p7 = scmp.lt.s32.totalorder %s9915_s16, %s9915_s16 }
  0x12   :  { %p9922_p8 = por %p9921_p7, %p9920_p6 }
  0x14   :  { %p9923_p9 = pnand %p9922_p8, %p9916_p5 }
  0x16   :  { %9926 = shalt.err (!%p9923_p9)
}
  0x17   :  { %64 = dma.hbm_to_vmem [thread:$0]  %s10448_s4, 64, %s62_s12, [#allocation8]  }
  0x18   :  { %s10059_s19 = smov [#allocation10]   ;;  %s10060_s21 = smov [#allocation2]  }
  0x19   :  { %s83_s20 = sshll.u32 %s10059_s19, 4  ;;  %s26_s22 = sshll.u32 %s10060_s21, 4  ;;  %s84_s20 = int_to_ptr.vmem [resolvable:$true] %s83_s20  ;;  %s27_s22 = int_to_ptr.vmem [resolvable:$true] %s26_s22 }
  0x1a   :  { %s9935_s23 = scalar_lea.vmem %s84_s20, 256  ;;  %p9940_p11 = scmp.lt.s32.totalorder %s84_s20, %s84_s20 }
  0x1b   :  { %p9936_p10 = scmp.ne.s32.totalorder %s84_s20, %s9935_s23  ;;  %p9941_p12 = scmp.lt.s32.totalorder %s9935_s23, %s9935_s23 }
  0x1d   :  { %p9942_p13 = por %p9941_p12, %p9940_p11 }
  0x1f   :  { %p9943_p0 = pnand %p9942_p13, %p9936_p10 }
  0x21   :  { %9946 = shalt.err (!%p9943_p0)
}
  0x22   :  { %86 = dma.hbm_to_vmem [thread:$0]  %s10450_s6, 256, %s84_s20, [#allocation11]  }
  0x23   :  { %s9955_s25 = scalar_lea.vmem %s27_s22, 28672  ;;  %p9960_p2 = scmp.lt.s32.totalorder %s27_s22, %s27_s22 }
  0x24   :  { %p9956_p1 = scmp.ne.s32.totalorder %s27_s22, %s9955_s25  ;;  %p9961_p3 = scmp.lt.s32.totalorder %s9955_s25, %s9955_s25 }
  0x26   :  { %p9962_p4 = por %p9961_p3, %p9960_p2 }
  0x28   :  { %p9963_p5 = pnand %p9962_p4, %p9956_p1 }
  0x2a   :  { %9966 = shalt.err (!%p9963_p5)
}
  0x2b   :  { %s10061_s4 = smov 256   ;;  %s10062_s26 = smov 16  }
  0x2c   :  { %32 = dma.hbm_to_vmem [thread:$0]  %s10445_s1, 28672, %s27_s22, [#allocation3], %s10061_s4, %s10061_s4, %s10062_s26  }
  0x2d   :  { %s10063_s29 = smov [#allocation6]   ;;  %s10064_s10 = smov [#allocation9]  }
  0x2e   :  { %s48_s30 = sshll.u32 %s10063_s29, 4  ;;  %s70_s11 = sshll.u32 %s10064_s10, 4  ;;  %s49_s30 = int_to_ptr.vmem [resolvable:$true] %s48_s30  ;;  %s71_s11 = int_to_ptr.vmem [resolvable:$true] %s70_s11 }
  0x2f   :  { %s9975_s6 = scalar_lea.vmem %s49_s30, 16384  ;;  %p9980_p7 = scmp.lt.s32.totalorder %s49_s30, %s49_s30 }
  0x30   :  { %p9976_p6 = scmp.ne.s32.totalorder %s49_s30, %s9975_s6  ;;  %p9981_p8 = scmp.lt.s32.totalorder %s9975_s6, %s9975_s6 }
  0x32   :  { %p9982_p9 = por %p9981_p8, %p9980_p7 }
  0x34   :  { %p9983_p10 = pnand %p9982_p9, %p9976_p6 }
  0x36   :  { %9986 = shalt.err (!%p9983_p10)
}
  0x37   :  { %54 = dma.hbm_to_vmem [thread:$0]  %s10447_s3, 16384, %s49_s30, [#allocation5], %s10061_s4, %s10061_s4, %s10062_s26  }
  0x38   :  { %s9995_s14 = scalar_lea.vmem %s71_s11, 65536  ;;  %p10000_p12 = scmp.lt.s32.totalorder %s71_s11, %s71_s11 }
  0x39   :  { %p9996_p11 = scmp.ne.s32.totalorder %s71_s11, %s9995_s14  ;;  %p10001_p13 = scmp.lt.s32.totalorder %s9995_s14, %s9995_s14 }
  0x3b   :  { %p10002_p0 = por %p10001_p13, %p10000_p12 }
  0x3d   :  { %p10003_p1 = pnand %p10002_p0, %p9996_p11 }
  0x3f   :  { %10006 = shalt.err (!%p10003_p1)
}
  0x40   :  { %s10065_s1 = smov 1024   ;;  %s10066_s15 = smov 64  }
  0x41   :  { %76 = dma.hbm_to_vmem [thread:$0]  %s10449_s5, 65536, %s71_s11, [#allocation8], %s10065_s1, %s10065_s1, %s10066_s15  }
  0x42   :  { %s10067_s18 = smov [#allocation12]   ;;  %s10068_s20 = smov [#allocation13]  }
  0x43   :  { %s92_s19 = sshll.u32 %s10067_s18, 4  ;;  %s105_s21 = sshll.u32 %s10068_s20, 4  ;;  %s93_s19 = int_to_ptr.vmem [resolvable:$true] %s92_s19  ;;  %s106_s21 = int_to_ptr.vmem [resolvable:$true] %s105_s21 }
  0x44   :  { %s10015_s22 = scalar_lea.vmem %s93_s19, 16384  ;;  %p10020_p3 = scmp.lt.s32.totalorder %s93_s19, %s93_s19 }
  0x45   :  { %p10016_p2 = scmp.ne.s32.totalorder %s93_s19, %s10015_s22  ;;  %p10021_p4 = scmp.lt.s32.totalorder %s10015_s22, %s10015_s22 }
  0x47   :  { %p10022_p5 = por %p10021_p4, %p10020_p3 }
  0x49   :  { %p10023_p6 = pnand %p10022_p5, %p10016_p2 }
  0x4b   :  { %10026 = shalt.err (!%p10023_p6)
}
  0x4c   :  { %s10069_s3 = smov 4   ;;  %s10035_s24 = scalar_lea.vmem %s106_s21, 16 }
  0x4d   :  { %98 = dma.hbm_to_vmem [thread:$0]  %s10451_s7, 16384, %s93_s19, [#allocation11], %s10066_s15, %s10066_s15, %s10069_s3  }
  0x4e   :  { %p10036_p7 = scmp.ne.s32.totalorder %s106_s21, %s10035_s24  ;;  %s10039_s5 = scalar_lea.vmem %s106_s21, 32 }
  0x4f   :  { %p10040_p8 = scmp.lt.s32.totalorder %s106_s21, %s106_s21  ;;  %p10041_p9 = scmp.lt.s32.totalorder %s10039_s5, %s10035_s24 }
  0x51   :  { %p10042_p10 = por %p10041_p9, %p10040_p8 }
  0x53   :  { %p10043_p11 = pnand %p10042_p10, %p10036_p7 }
  0x55   :  { %10046 = shalt.err (!%p10043_p11)
}
  0x56   :  { %108 = dma.hbm_to_vmem [thread:$0]  %s10452_s8, 16, %s106_s21, [#allocation14]  }
  0x57   :  { %10047 = dma.done.wait [#allocation3], 28672  }
  0x58   :  { %10048 = vsyncadd [#allocation3], 4294938624 }
  0x59   :  { %10049 = dma.done.wait [#allocation5], 16448  }
  0x5a   :  { %10050 = vsyncadd [#allocation5], 4294950848 }
  0x5b   :  { %10051 = dma.done.wait [#allocation8], 65600  }
  0x5c   :  { %10052 = vsyncadd [#allocation8], 4294901696 }
  0x5d   :  { %10053 = dma.done.wait [#allocation11], 16640  }
  0x5e   :  { %10054 = vsyncadd [#allocation11], 4294950656 }
  0x5f   :  { %10055 = dma.done.wait [#allocation14], 16  }
  0x60   :  { %10056 = vsyncadd [#allocation14], 4294967280  ;;  %v9222_v0 = vld [vmem:[#allocation2 + $0xe4] ss:$16 sps:$4 sm:$0xff]   ;;  %v9226_v2 = vld [vmem:[#allocation2 + $0xe0] ss:$16 sps:$4 sm:$0xff]  }
  0x61   :  { %v9224_v1 = vld [vmem:[#allocation2 + $0x2e4] ss:$16 sps:$4 sm:$0xff]   ;;  %1529 = vmatprep.subr.bf16.mxu0 %v9222_v0  ;;  %v9227_v3 = vld [vmem:[#allocation2 + $0x2e0] ss:$16 sps:$4 sm:$0xff]   ;;  %v135_v48 = vld [vmem:[%s10444_s0 + $0x8] sm:$0xff] }
  0x62   :  { %1570 = vmatprep.subr.bf16.mxu1 %v9224_v1  ;;  %v9228_v4 = vld [vmem:[#allocation2 + $0xc4] ss:$16 sps:$4 sm:$0xff]   ;;  %1530 = vmatpush1.bf16.msra.mxu0 %v9226_v2  ;;  %v9232_v6 = vld [vmem:[#allocation2 + $0xc0] ss:$16 sps:$4 sm:$0xff]   ;;  %v10153_v51 = vcombine.high %v135_v48, %v135_v48 }
  0x63   :  { %1571 = vmatpush1.bf16.msra.mxu1 %v9227_v3  ;;  %v9230_v5 = vld [vmem:[#allocation2 + $0x2c4] ss:$16 sps:$4 sm:$0xff]   ;;  %1531 = vmatprep.subr.bf16.mxu0 %v9228_v4  ;;  %v9233_v7 = vld [vmem:[#allocation2 + $0x2c0] ss:$16 sps:$4 sm:$0xff]  }
  0x64   :  { %1572 = vmatprep.subr.bf16.mxu1 %v9230_v5  ;;  %v9234_v8 = vld [vmem:[#allocation2 + $0xa4] ss:$16 sps:$4 sm:$0xff]   ;;  %v9238_v10 = vld [vmem:[#allocation2 + $0xa0] ss:$16 sps:$4 sm:$0xff]   ;;  %1602 = vmatprep.mubr.bf16.mxu1 %v10153_v51 }
  0x65   :  { %v9236_v9 = vld [vmem:[#allocation2 + $0x2a4] ss:$16 sps:$4 sm:$0xff]   ;;  %v9239_v11 = vld [vmem:[#allocation2 + $0x2a0] ss:$16 sps:$4 sm:$0xff]  }
  0x66   :  { %1532 = vmatpush1.bf16.msra.mxu0 %v9232_v6  ;;  %v9240_v12 = vld [vmem:[#allocation2 + $0x84] ss:$16 sps:$4 sm:$0xff]   ;;  %v9244_v14 = vld [vmem:[#allocation2 + $0x80] ss:$16 sps:$4 sm:$0xff]  }
  0x67   :  { %1573 = vmatpush1.bf16.msra.mxu1 %v9233_v7  ;;  %1533 = vmatprep.subr.bf16.mxu0 %v9234_v8  ;;  %v9242_v13 = vld [vmem:[#allocation2 + $0x284] ss:$16 sps:$4 sm:$0xff]   ;;  %v9245_v15 = vld [vmem:[#allocation2 + $0x280] ss:$16 sps:$4 sm:$0xff]   ;;  %v10159_v7 = vcombine.low %v135_v48, %v135_v48  ;;  %v9382_v48 = vld [vmem:[#allocation2 + $0xcc] ss:$16 sps:$4 sm:$0xff]  }
  0x68   :  { %1574 = vmatprep.subr.bf16.mxu1 %v9236_v9  ;;  %v9246_v16 = vld [vmem:[#allocation2 + $0x64] ss:$16 sps:$4 sm:$0xff]   ;;  %v9250_v18 = vld [vmem:[#allocation2 + $0x60] ss:$16 sps:$4 sm:$0xff]  }
  0x69   :  { %v9248_v17 = vld [vmem:[#allocation2 + $0x264] ss:$16 sps:$4 sm:$0xff]   ;;  %v9251_v19 = vld [vmem:[#allocation2 + $0x260] ss:$16 sps:$4 sm:$0xff]  }
  0x6a   :  { %1534 = vmatpush1.bf16.msra.mxu0 %v9238_v10  ;;  %v9252_v20 = vld [vmem:[#allocation2 + $0x44] ss:$16 sps:$4 sm:$0xff]   ;;  %v9256_v22 = vld [vmem:[#allocation2 + $0x40] ss:$16 sps:$4 sm:$0xff]  }
  0x6b   :  { %1575 = vmatpush1.bf16.msra.mxu1 %v9239_v11  ;;  %1535 = vmatprep.subr.bf16.mxu0 %v9240_v12  ;;  %v9254_v21 = vld [vmem:[#allocation2 + $0x244] ss:$16 sps:$4 sm:$0xff]   ;;  %v9257_v23 = vld [vmem:[#allocation2 + $0x240] ss:$16 sps:$4 sm:$0xff]  }
  0x6c   :  { %1576 = vmatprep.subr.bf16.mxu1 %v9242_v13  ;;  %v9258_v24 = vld [vmem:[#allocation2 + $0x24] ss:$16 sps:$4 sm:$0xff]   ;;  %v9262_v26 = vld [vmem:[#allocation2 + $0x20] ss:$16 sps:$4 sm:$0xff]  }
  0x6d   :  { %v9260_v25 = vld [vmem:[#allocation2 + $0x224] ss:$16 sps:$4 sm:$0xff]   ;;  %v9263_v27 = vld [vmem:[#allocation2 + $0x220] ss:$16 sps:$4 sm:$0xff]  }
  0x6e   :  { %1536 = vmatpush1.bf16.msra.mxu0 %v9244_v14  ;;  %v9264_v28 = vld [vmem:[#allocation2 + $0x4] ss:$16 sps:$4 sm:$0xff]   ;;  %v9268_v30 = vld [vmem:[#allocation2] ss:$16 sps:$4 sm:$0xff]  }
  0x6f   :  { %1577 = vmatpush1.bf16.msra.mxu1 %v9245_v15  ;;  %1537 = vmatprep.subr.bf16.mxu0 %v9246_v16  ;;  %v9266_v29 = vld [vmem:[#allocation2 + $0x204] ss:$16 sps:$4 sm:$0xff]   ;;  %v9269_v31 = vld [vmem:[#allocation2 + $0x200] ss:$16 sps:$4 sm:$0xff]   ;;  %v10070_v16 = vmov 0  }
  0x70   :  { %1578 = vmatprep.subr.bf16.mxu1 %v9248_v17  ;;  %v9270_v32 = vld [vmem:[#allocation2 + $0x1e4] ss:$16 sps:$4 sm:$0xff]   ;;  %v9274_v34 = vld [vmem:[#allocation2 + $0x1e0] ss:$16 sps:$4 sm:$0xff]  }
  0x71   :  { %v9272_v33 = vld [vmem:[#allocation2 + $0x3e4] ss:$16 sps:$4 sm:$0xff]   ;;  %v9275_v35 = vld [vmem:[#allocation2 + $0x3e0] ss:$16 sps:$4 sm:$0xff]  }
  0x72   :  { %1538 = vmatpush1.bf16.msra.mxu0 %v9250_v18  ;;  %v9276_v36 = vld [vmem:[#allocation2 + $0x1c4] ss:$16 sps:$4 sm:$0xff]   ;;  %v9280_v38 = vld [vmem:[#allocation2 + $0x1c0] ss:$16 sps:$4 sm:$0xff]  }
  0x73   :  { %1579 = vmatpush1.bf16.msra.mxu1 %v9251_v19  ;;  %1539 = vmatprep.subr.bf16.mxu0 %v9252_v20  ;;  %v9278_v37 = vld [vmem:[#allocation2 + $0x3c4] ss:$16 sps:$4 sm:$0xff]   ;;  %v9281_v39 = vld [vmem:[#allocation2 + $0x3c0] ss:$16 sps:$4 sm:$0xff]  }
  0x74   :  { %1580 = vmatprep.subr.bf16.mxu1 %v9254_v21  ;;  %v9282_v40 = vld [vmem:[#allocation2 + $0x1a4] ss:$16 sps:$4 sm:$0xff]   ;;  %v9286_v42 = vld [vmem:[#allocation2 + $0x1a0] ss:$16 sps:$4 sm:$0xff]  }
  0x75   :  { %v9284_v41 = vld [vmem:[#allocation2 + $0x3a4] ss:$16 sps:$4 sm:$0xff]   ;;  %v9287_v43 = vld [vmem:[#allocation2 + $0x3a0] ss:$16 sps:$4 sm:$0xff]  }
  0x76   :  { %1540 = vmatpush1.bf16.msra.mxu0 %v9256_v22  ;;  %v9288_v44 = vld [vmem:[#allocation2 + $0x184] ss:$16 sps:$4 sm:$0xff]   ;;  %v9292_v49 = vld [vmem:[#allocation2 + $0x180] ss:$16 sps:$4 sm:$0xff]  }
  0x77   :  { %1581 = vmatpush1.bf16.msra.mxu1 %v9257_v23  ;;  %1541 = vmatprep.subr.bf16.mxu0 %v9258_v24  ;;  %v9290_v45 = vld [vmem:[#allocation2 + $0x384] ss:$16 sps:$4 sm:$0xff]   ;;  %v9293_v50 = vld [vmem:[#allocation2 + $0x380] ss:$16 sps:$4 sm:$0xff]  }
  0x78   :  { %1582 = vmatprep.subr.bf16.mxu1 %v9260_v25  ;;  %v134_v46 = vld [vmem:[%s10444_s0] sm:$0xff] }
  0x79   :  { %v10148_v47 = vcombine.high %v134_v46, %v134_v46  ;;  %v9294_v52 = vld [vmem:[#allocation2 + $0x164] ss:$16 sps:$4 sm:$0xff]   ;;  %v9298_v54 = vld [vmem:[#allocation2 + $0x160] ss:$16 sps:$4 sm:$0xff]   ;;  %v10157_v6 = vcombine.low %v134_v46, %v134_v46 }
  0x7a   :  { %1542 = vmatpush1.bf16.msra.mxu0 %v9262_v26  ;;  %v9296_v53 = vld [vmem:[#allocation2 + $0x364] ss:$16 sps:$4 sm:$0xff]   ;;  %v9299_v55 = vld [vmem:[#allocation2 + $0x360] ss:$16 sps:$4 sm:$0xff]  }
  0x7b   :  { %1583 = vmatpush1.bf16.msra.mxu1 %v9263_v27  ;;  %1543 = vmatprep.subr.bf16.mxu0 %v9264_v28  ;;  %v9300_v56 = vld [vmem:[#allocation2 + $0x144] ss:$16 sps:$4 sm:$0xff]   ;;  %v9304_v58 = vld [vmem:[#allocation2 + $0x140] ss:$16 sps:$4 sm:$0xff]  }
  0x7c   :  { %1584 = vmatprep.subr.bf16.mxu1 %v9266_v29  ;;  %1561 = vmatprep.mubr.bf16.mxu0 %v10148_v47  ;;  %v9302_v57 = vld [vmem:[#allocation2 + $0x344] ss:$16 sps:$4 sm:$0xff]   ;;  %v9305_v59 = vld [vmem:[#allocation2 + $0x340] ss:$16 sps:$4 sm:$0xff]  }
  0x7d   :  { %v9306_v60 = vld [vmem:[#allocation2 + $0x124] ss:$16 sps:$4 sm:$0xff]   ;;  %v9310_v62 = vld [vmem:[#allocation2 + $0x120] ss:$16 sps:$4 sm:$0xff]  }
  0x7e   :  { %1544 = vmatpush1.bf16.msra.mxu0 %v9268_v30  ;;  %v9308_v61 = vld [vmem:[#allocation2 + $0x324] ss:$16 sps:$4 sm:$0xff]   ;;  %v9311_v63 = vld [vmem:[#allocation2 + $0x320] ss:$16 sps:$4 sm:$0xff]  }
  0x7f   :  { %1585 = vmatpush1.bf16.msra.mxu1 %v9269_v31  ;;  %1545 = vmatprep.subr.bf16.mxu0 %v9270_v32  ;;  %v9312_v0 = vld [vmem:[#allocation2 + $0x104] ss:$16 sps:$4 sm:$0xff]   ;;  %v9316_v2 = vld [vmem:[#allocation2 + $0x100] ss:$16 sps:$4 sm:$0xff]  }
  0x80   :  { %1586 = vmatprep.subr.bf16.mxu1 %v9272_v33  ;;  %v9314_v1 = vld [vmem:[#allocation2 + $0x304] ss:$16 sps:$4 sm:$0xff]   ;;  %v9317_v3 = vld [vmem:[#allocation2 + $0x300] ss:$16 sps:$4 sm:$0xff]  }
  0x81   :  { %v9324_v4 = vld [vmem:[#allocation2 + $0x4e4] ss:$16 sps:$4 sm:$0xff]   ;;  %v9322_v8 = vld [vmem:[#allocation2 + $0x4e0] ss:$16 sps:$4 sm:$0xff]  }
  0x82   :  { %1546 = vmatpush2.bf16.msra.mxu0 %v9274_v34  ;;  %v9327_v5 = vld [vmem:[#allocation2 + $0x6e4] ss:$16 sps:$4 sm:$0xff]   ;;  %v9325_v9 = vld [vmem:[#allocation2 + $0x6e0] ss:$16 sps:$4 sm:$0xff]  }
  0x83   :  { %1587 = vmatpush2.bf16.msra.mxu1 %v9275_v35  ;;  %1547 = vmatprep.subr.bf16.mxu0 %v9276_v36  ;;  %v9330_v10 = vld [vmem:[#allocation2 + $0x4c4] ss:$16 sps:$4 sm:$0xff]   ;;  %v9328_v12 = vld [vmem:[#allocation2 + $0x4c0] ss:$16 sps:$4 sm:$0xff]  }
  0x84   :  { %1588 = vmatprep.subr.bf16.mxu1 %v9278_v37  ;;  %v9333_v11 = vld [vmem:[#allocation2 + $0x6c4] ss:$16 sps:$4 sm:$0xff]   ;;  %v9331_v13 = vld [vmem:[#allocation2 + $0x6c0] ss:$16 sps:$4 sm:$0xff]  }
  0x85   :  { %v9336_v14 = vld [vmem:[#allocation2 + $0x4a4] ss:$16 sps:$4 sm:$0xff]   ;;  %v9334_v17 = vld [vmem:[#allocation2 + $0x4a0] ss:$16 sps:$4 sm:$0xff]  }
  0x86   :  { %1548 = vmatpush2.bf16.msra.mxu0 %v9280_v38  ;;  %v9339_v15 = vld [vmem:[#allocation2 + $0x6a4] ss:$16 sps:$4 sm:$0xff]   ;;  %v9337_v18 = vld [vmem:[#allocation2 + $0x6a0] ss:$16 sps:$4 sm:$0xff]  }
  0x87   :  { %1589 = vmatpush2.bf16.msra.mxu1 %v9281_v39  ;;  %1549 = vmatprep.subr.bf16.mxu0 %v9282_v40  ;;  %v9342_v19 = vld [vmem:[#allocation2 + $0x484] ss:$16 sps:$4 sm:$0xff]   ;;  %v9340_v21 = vld [vmem:[#allocation2 + $0x480] ss:$16 sps:$4 sm:$0xff]  }
  0x88   :  { %1590 = vmatprep.subr.bf16.mxu1 %v9284_v41  ;;  %v9345_v20 = vld [vmem:[#allocation2 + $0x684] ss:$16 sps:$4 sm:$0xff]   ;;  %v9343_v22 = vld [vmem:[#allocation2 + $0x680] ss:$16 sps:$4 sm:$0xff]  }
  0x89   :  { %v9348_v23 = vld [vmem:[#allocation2 + $0x464] ss:$16 sps:$4 sm:$0xff]   ;;  %v9346_v25 = vld [vmem:[#allocation2 + $0x460] ss:$16 sps:$4 sm:$0xff]  }
  0x8a   :  { %1550 = vmatpush2.bf16.msra.mxu0 %v9286_v42  ;;  %v9351_v24 = vld [vmem:[#allocation2 + $0x664] ss:$16 sps:$4 sm:$0xff]   ;;  %v9349_v26 = vld [vmem:[#allocation2 + $0x660] ss:$16 sps:$4 sm:$0xff]   ;;  %v9376_v42 = vld [vmem:[#allocation2 + $0xec] ss:$16 sps:$4 sm:$0xff]  }
  0x8b   :  { %1591 = vmatpush2.bf16.msra.mxu1 %v9287_v43  ;;  %1551 = vmatprep.subr.bf16.mxu0 %v9288_v44  ;;  %v9354_v27 = vld [vmem:[#allocation2 + $0x444] ss:$16 sps:$4 sm:$0xff]   ;;  %v9352_v29 = vld [vmem:[#allocation2 + $0x440] ss:$16 sps:$4 sm:$0xff]   ;;  %v9373_v44 = vld [vmem:[%s10444_s0 + $0x18] ss:$0 sps:$4 sm:$0xff]  }
  0x8c   :  { %1592 = vmatprep.subr.bf16.mxu1 %v9290_v45  ;;  %v9357_v28 = vld [vmem:[#allocation2 + $0x644] ss:$16 sps:$4 sm:$0xff]   ;;  %v9355_v30 = vld [vmem:[#allocation2 + $0x640] ss:$16 sps:$4 sm:$0xff]   ;;  %v9374_v45 = vld [vmem:[#allocation2 + $0xe8] ss:$16 sps:$4 sm:$0xff]  }
  0x8d   :  { %v9360_v31 = vld [vmem:[#allocation2 + $0x424] ss:$16 sps:$4 sm:$0xff]   ;;  %v9358_v34 = vld [vmem:[#allocation2 + $0x420] ss:$16 sps:$4 sm:$0xff]  }
  0x8e   :  { %1552 = vmatpush2.bf16.msra.mxu0 %v9292_v49  ;;  %v9363_v32 = vld [vmem:[#allocation2 + $0x624] ss:$16 sps:$4 sm:$0xff]   ;;  %v9361_v36 = vld [vmem:[#allocation2 + $0x620] ss:$16 sps:$4 sm:$0xff]  }
  0x8f   :  { %1593 = vmatpush2.bf16.msra.mxu1 %v9293_v50  ;;  %1553 = vmatprep.subr.bf16.mxu0 %v9294_v52  ;;  %v10167_v33 = vld [vmem:[%s10444_s0 + $0x10] sm:$0xff]  ;;  %v9380_v50 = vld [vmem:[#allocation2 + $0xc8] ss:$16 sps:$4 sm:$0xff]  }
  0x90   :  { %1594 = vmatprep.subr.bf16.mxu1 %v9296_v53  ;;  %v10171_v35 = vcombine.high %v10167_v33, %v10167_v33  ;;  %v9366_v37 = vld [vmem:[#allocation2 + $0x404] ss:$16 sps:$4 sm:$0xff]   ;;  %v9364_v39 = vld [vmem:[#allocation2 + $0x400] ss:$16 sps:$4 sm:$0xff]   ;;  %v9388_v53 = vld [vmem:[#allocation2 + $0xac] ss:$16 sps:$4 sm:$0xff]  }
  0x91   :  { %v9369_v38 = vld [vmem:[#allocation2 + $0x604] ss:$16 sps:$4 sm:$0xff]   ;;  %v9367_v40 = vld [vmem:[#allocation2 + $0x600] ss:$16 sps:$4 sm:$0xff]  }
  0x92   :  { %1554 = vmatpush2.bf16.msra.mxu0 %v9298_v54  ;;  %v9372_v41 = vld [vmem:[#allocation2 + $0x5e4] ss:$16 sps:$4 sm:$0xff]   ;;  %v9370_v43 = vld [vmem:[#allocation2 + $0x5e0] ss:$16 sps:$4 sm:$0xff]  }
  0x93   :  { %1595 = vmatpush2.bf16.msra.mxu1 %v9299_v55  ;;  %1555 = vmatprep.subr.bf16.mxu0 %v9300_v56  ;;  %v9379_v46 = vld [vmem:[#allocation2 + $0x5c4] ss:$16 sps:$4 sm:$0xff]   ;;  %v9377_v49 = vld [vmem:[#allocation2 + $0x5c0] ss:$16 sps:$4 sm:$0xff]   ;;  %v9386_v55 = vld [vmem:[#allocation2 + $0xa8] ss:$16 sps:$4 sm:$0xff]  }
  0x94   :  { %1596 = vmatprep.subr.bf16.mxu1 %v9302_v57  ;;  %v9385_v52 = vld [vmem:[#allocation2 + $0x5a4] ss:$16 sps:$4 sm:$0xff]   ;;  %v9383_v54 = vld [vmem:[#allocation2 + $0x5a0] ss:$16 sps:$4 sm:$0xff]   ;;  %v9394_v57 = vld [vmem:[#allocation2 + $0x8c] ss:$16 sps:$4 sm:$0xff]  }
  0x95   :  { %v9391_v56 = vld [vmem:[#allocation2 + $0x584] ss:$16 sps:$4 sm:$0xff]  }
  0x96   :  { %1556 = vmatpush2.bf16.msra.mxu0 %v9304_v58  ;;  %v9389_v58 = vld [vmem:[#allocation2 + $0x580] ss:$16 sps:$4 sm:$0xff]  }
  0x97   :  { %1597 = vmatpush2.bf16.msra.mxu1 %v9305_v59  ;;  %1557 = vmatprep.subr.bf16.mxu0 %v9306_v60  ;;  %v9392_v59 = vld [vmem:[#allocation2 + $0x88] ss:$16 sps:$4 sm:$0xff]   ;;  %v9397_v60 = vld [vmem:[#allocation2 + $0x564] ss:$16 sps:$4 sm:$0xff]  }
  0x98   :  { %1598 = vmatprep.subr.bf16.mxu1 %v9308_v61  ;;  %v9400_v61 = vld [vmem:[#allocation2 + $0x6c] ss:$16 sps:$4 sm:$0xff]  }
  0x9a   :  { %1558 = vmatpush2.bf16.msra.mxu0 %v9310_v62  ;;  %v9395_v62 = vld [vmem:[#allocation2 + $0x560] ss:$16 sps:$4 sm:$0xff]  }
  0x9b   :  { %1599 = vmatpush2.bf16.msra.mxu1 %v9311_v63  ;;  %1559 = vmatprep.subr.bf16.mxu0 %v9312_v0  ;;  %v9403_v63 = vld [vmem:[#allocation2 + $0x544] ss:$16 sps:$4 sm:$0xff]   ;;  %v9406_v0 = vld [vmem:[#allocation2 + $0x4c] ss:$16 sps:$4 sm:$0xff]  }
  0x9c   :  { %1600 = vmatprep.subr.bf16.mxu1 %v9314_v1  ;;  %v9401_v1 = vld [vmem:[#allocation2 + $0x540] ss:$16 sps:$4 sm:$0xff]  }
  0x9e   :  { %1560 = vmatpush2.bf16.msra.mxu0 %v9316_v2  ;;  %v9404_v2 = vld [vmem:[#allocation2 + $0x48] ss:$16 sps:$4 sm:$0xff]  }
  0x9f   :  { %1601 = vmatpush2.bf16.msra.mxu1 %v9317_v3  ;;  %1611 = vmatprep.subr.bf16.mxu0 %v9324_v4  ;;  %v9409_v3 = vld [vmem:[#allocation2 + $0x524] ss:$16 sps:$4 sm:$0xff]   ;;  %v9412_v4 = vld [vmem:[#allocation2 + $0x2c] ss:$16 sps:$4 sm:$0xff]  }
  0xa0   :  { %1652 = vmatprep.subr.bf16.mxu1 %v9327_v5  ;;  %v9407_v5 = vld [vmem:[#allocation2 + $0x520] ss:$16 sps:$4 sm:$0xff]  }
  0xa1   :  { %1562 = vmatmul.mubr.bf16.vlgmr.msra.gmra.mxu0 %v10157_v6 }
  0xa2   :  { %1603 = vmatmul.mubr.bf16.vlgmr.msra.gmra.mxu1 %v10159_v7  ;;  %1612 = vmatpush1.bf16.msra.mxu0 %v9322_v8  ;;  %v9410_v8 = vld [vmem:[#allocation2 + $0x28] ss:$16 sps:$4 sm:$0xff]  }
  0xa3   :  { %1653 = vmatpush1.bf16.msra.mxu1 %v9325_v9  ;;  %1613 = vmatprep.subr.bf16.mxu0 %v9330_v10  ;;  %v9415_v9 = vld [vmem:[#allocation2 + $0x504] ss:$16 sps:$4 sm:$0xff]   ;;  %v9418_v10 = vld [vmem:[#allocation2 + $0xc] ss:$16 sps:$4 sm:$0xff]  }
  0xa4   :  { %1654 = vmatprep.subr.bf16.mxu1 %v9333_v11  ;;  %1684 = vmatprep.mubr.bf16.mxu1 %v10070_v16  ;;  %v9413_v11 = vld [vmem:[#allocation2 + $0x500] ss:$16 sps:$4 sm:$0xff]  }
  0xa5   :  { %1643 = vmatprep.mubr.bf16.mxu0 %v10171_v35 }
  0xa6   :  { %1614 = vmatpush1.bf16.msra.mxu0 %v9328_v12  ;;  %v9416_v12 = vld [vmem:[#allocation2 + $0x8] ss:$16 sps:$4 sm:$0xff]  }
  0xa7   :  { %1655 = vmatpush1.bf16.msra.mxu1 %v9331_v13  ;;  %1615 = vmatprep.subr.bf16.mxu0 %v9336_v14  ;;  %v9423_v13 = vld [vmem:[#allocation2 + $0x1ec] ss:$16 sps:$4 sm:$0xff]  }
  0xa8   :  { %1656 = vmatprep.subr.bf16.mxu1 %v9339_v15  ;;  %v9426_v14 = vld [vmem:[#allocation2 + $0x2ec] ss:$16 sps:$4 sm:$0xff]   ;;  %v10180_v15 = vcombine.low %v10167_v33, %v10167_v33  ;;  %v9445_v33 = vld [vmem:[#allocation2 + $0x168] ss:$16 sps:$4 sm:$0xff]  }
  0xaa   :  { %1616 = vmatpush1.bf16.msra.mxu0 %v9334_v17  ;;  %v9421_v17 = vld [vmem:[#allocation2 + $0x1e8] ss:$16 sps:$4 sm:$0xff]  }
  0xab   :  { %1657 = vmatpush1.bf16.msra.mxu1 %v9337_v18  ;;  %1617 = vmatprep.subr.bf16.mxu0 %v9342_v19  ;;  %v9424_v18 = vld [vmem:[#allocation2 + $0x2e8] ss:$16 sps:$4 sm:$0xff]   ;;  %v9429_v19 = vld [vmem:[#allocation2 + $0x1cc] ss:$16 sps:$4 sm:$0xff]  }
  0xac   :  { %1658 = vmatprep.subr.bf16.mxu1 %v9345_v20  ;;  %v9432_v20 = vld [vmem:[#allocation2 + $0x2cc] ss:$16 sps:$4 sm:$0xff]  }
  0xae   :  { %1618 = vmatpush1.bf16.msra.mxu0 %v9340_v21  ;;  %v9427_v21 = vld [vmem:[#allocation2 + $0x1c8] ss:$16 sps:$4 sm:$0xff]  }
  0xaf   :  { %1659 = vmatpush1.bf16.msra.mxu1 %v9343_v22  ;;  %1619 = vmatprep.subr.bf16.mxu0 %v9348_v23  ;;  %v9430_v22 = vld [vmem:[#allocation2 + $0x2c8] ss:$16 sps:$4 sm:$0xff]   ;;  %v9435_v23 = vld [vmem:[#allocation2 + $0x1ac] ss:$16 sps:$4 sm:$0xff]  }
  0xb0   :  { %1660 = vmatprep.subr.bf16.mxu1 %v9351_v24  ;;  %v9438_v24 = vld [vmem:[#allocation2 + $0x2ac] ss:$16 sps:$4 sm:$0xff]  }
  0xb2   :  { %1620 = vmatpush1.bf16.msra.mxu0 %v9346_v25  ;;  %v9433_v25 = vld [vmem:[#allocation2 + $0x1a8] ss:$16 sps:$4 sm:$0xff]  }
  0xb3   :  { %1661 = vmatpush1.bf16.msra.mxu1 %v9349_v26  ;;  %1621 = vmatprep.subr.bf16.mxu0 %v9354_v27  ;;  %v9436_v26 = vld [vmem:[#allocation2 + $0x2a8] ss:$16 sps:$4 sm:$0xff]   ;;  %v9441_v27 = vld [vmem:[#allocation2 + $0x18c] ss:$16 sps:$4 sm:$0xff]  }
  0xb4   :  { %1662 = vmatprep.subr.bf16.mxu1 %v9357_v28  ;;  %v9444_v28 = vld [vmem:[#allocation2 + $0x28c] ss:$16 sps:$4 sm:$0xff]  }
  0xb6   :  { %1622 = vmatpush1.bf16.msra.mxu0 %v9352_v29  ;;  %v9439_v29 = vld [vmem:[#allocation2 + $0x188] ss:$16 sps:$4 sm:$0xff]  }
  0xb7   :  { %1663 = vmatpush1.bf16.msra.mxu1 %v9355_v30  ;;  %1623 = vmatprep.subr.bf16.mxu0 %v9360_v31  ;;  %v9442_v30 = vld [vmem:[#allocation2 + $0x288] ss:$16 sps:$4 sm:$0xff]   ;;  %v9447_v31 = vld [vmem:[#allocation2 + $0x16c] ss:$16 sps:$4 sm:$0xff]  }
  0xb8   :  { %1664 = vmatprep.subr.bf16.mxu1 %v9363_v32  ;;  %v9450_v32 = vld [vmem:[#allocation2 + $0x26c] ss:$16 sps:$4 sm:$0xff]  }
  0xba   :  { %1624 = vmatpush1.bf16.msra.mxu0 %v9358_v34  ;;  %v9453_v34 = vld [vmem:[#allocation2 + $0x14c] ss:$16 sps:$4 sm:$0xff]  }
  0xbb   :  { %1665 = vmatpush1.bf16.msra.mxu1 %v9361_v36  ;;  %1625 = vmatprep.subr.bf16.mxu0 %v9366_v37  ;;  %v9456_v36 = vld [vmem:[#allocation2 + $0x24c] ss:$16 sps:$4 sm:$0xff]   ;;  %v9451_v37 = vld [vmem:[#allocation2 + $0x148] ss:$16 sps:$4 sm:$0xff]  }
  0xbc   :  { %1666 = vmatprep.subr.bf16.mxu1 %v9369_v38  ;;  %v9454_v38 = vld [vmem:[#allocation2 + $0x248] ss:$16 sps:$4 sm:$0xff]  }
  0xbe   :  { %1626 = vmatpush1.bf16.msra.mxu0 %v9364_v39  ;;  %v9459_v39 = vld [vmem:[#allocation2 + $0x12c] ss:$16 sps:$4 sm:$0xff]  }
  0xbf   :  { %1667 = vmatpush1.bf16.msra.mxu1 %v9367_v40  ;;  %1627 = vmatprep.subr.bf16.mxu0 %v9372_v41  ;;  %v9462_v40 = vld [vmem:[#allocation2 + $0x22c] ss:$16 sps:$4 sm:$0xff]   ;;  %v9457_v41 = vld [vmem:[#allocation2 + $0x128] ss:$16 sps:$4 sm:$0xff]  }
  0xc0   :  { %1693 = vmatprep.subr.bf16.mxu1 %v9376_v42  ;;  %v9460_v42 = vld [vmem:[#allocation2 + $0x228] ss:$16 sps:$4 sm:$0xff]  }
  0xc2   :  { %1685 = vmatmul.mubr.bf16.vlgmr.msra.gmra.mxu1 %v9373_v44  ;;  %1628 = vmatpush2.bf16.msra.mxu0 %v9370_v43  ;;  %v9465_v43 = vld [vmem:[#allocation2 + $0x10c] ss:$16 sps:$4 sm:$0xff]  }
  0xc3   :  { %1694 = vmatpush1.bf16.msra.mxu1 %v9374_v45  ;;  %1629 = vmatprep.subr.bf16.mxu0 %v9379_v46  ;;  %v9468_v44 = vld [vmem:[#allocation2 + $0x20c] ss:$16 sps:$4 sm:$0xff]   ;;  %v9463_v45 = vld [vmem:[#allocation2 + $0x108] ss:$16 sps:$4 sm:$0xff]  }
  0xc4   :  { %1695 = vmatprep.subr.bf16.mxu1 %v9382_v48  ;;  %1725 = vmatprep.mubr.bf16.mxu1 %v10148_v47  ;;  %v9398_v47 = vld [vmem:[#allocation2 + $0x68] ss:$16 sps:$4 sm:$0xff]   ;;  %v9471_v48 = vld [vmem:[#allocation2 + $0x3ec] ss:$16 sps:$4 sm:$0xff]  }
  0xc5   :  { %v9466_v46 = vld [vmem:[#allocation2 + $0x208] ss:$16 sps:$4 sm:$0xff]  }
  0xc6   :  { %1630 = vmatpush2.bf16.msra.mxu0 %v9377_v49  ;;  %v9474_v49 = vld [vmem:[#allocation2 + $0x4ec] ss:$16 sps:$4 sm:$0xff]  }
  0xc7   :  { %1696 = vmatpush1.bf16.msra.mxu1 %v9380_v50  ;;  %1631 = vmatprep.subr.bf16.mxu0 %v9385_v52  ;;  %v9469_v50 = vld [vmem:[#allocation2 + $0x3e8] ss:$16 sps:$4 sm:$0xff]  }
  0xc8   :  { %1697 = vmatprep.subr.bf16.mxu1 %v9388_v53  ;;  %v9472_v52 = vld [vmem:[#allocation2 + $0x4e8] ss:$16 sps:$4 sm:$0xff]   ;;  %v9477_v53 = vld [vmem:[#allocation2 + $0x3cc] ss:$16 sps:$4 sm:$0xff]  }
  0xca   :  { %1632 = vmatpush2.bf16.msra.mxu0 %v9383_v54  ;;  %v9480_v54 = vld [vmem:[#allocation2 + $0x4cc] ss:$16 sps:$4 sm:$0xff]  }
  0xcb   :  { %1698 = vmatpush1.bf16.msra.mxu1 %v9386_v55  ;;  %1633 = vmatprep.subr.bf16.mxu0 %v9391_v56  ;;  %v9475_v55 = vld [vmem:[#allocation2 + $0x3c8] ss:$16 sps:$4 sm:$0xff]  }
  0xcc   :  { %1699 = vmatprep.subr.bf16.mxu1 %v9394_v57  ;;  %v9478_v56 = vld [vmem:[#allocation2 + $0x4c8] ss:$16 sps:$4 sm:$0xff]   ;;  %v9483_v57 = vld [vmem:[#allocation2 + $0x3ac] ss:$16 sps:$4 sm:$0xff]  }
  0xce   :  { %1634 = vmatpush2.bf16.msra.mxu0 %v9389_v58  ;;  %v9486_v58 = vld [vmem:[#allocation2 + $0x4ac] ss:$16 sps:$4 sm:$0xff]  }
  0xcf   :  { %1700 = vmatpush1.bf16.msra.mxu1 %v9392_v59  ;;  %1635 = vmatprep.subr.bf16.mxu0 %v9397_v60  ;;  %v9481_v59 = vld [vmem:[#allocation2 + $0x3a8] ss:$16 sps:$4 sm:$0xff]  }
  0xd0   :  { %1701 = vmatprep.subr.bf16.mxu1 %v9400_v61  ;;  %v9484_v60 = vld [vmem:[#allocation2 + $0x4a8] ss:$16 sps:$4 sm:$0xff]   ;;  %v9489_v61 = vld [vmem:[#allocation2 + $0x38c] ss:$16 sps:$4 sm:$0xff]  }
  0xd2   :  { %1636 = vmatpush2.bf16.msra.mxu0 %v9395_v62  ;;  %v9492_v62 = vld [vmem:[#allocation2 + $0x48c] ss:$16 sps:$4 sm:$0xff]  }
  0xd3   :  { %1702 = vmatpush1.bf16.msra.mxu1 %v9398_v47  ;;  %1637 = vmatprep.subr.bf16.mxu0 %v9403_v63  ;;  %v9487_v47 = vld [vmem:[#allocation2 + $0x388] ss:$16 sps:$4 sm:$0xff]   ;;  %v9495_v63 = vld [vmem:[#allocation2 + $0x36c] ss:$16 sps:$4 sm:$0xff]  }
  0xd4   :  { %1703 = vmatprep.subr.bf16.mxu1 %v9406_v0  ;;  %v9498_v0 = vld [vmem:[#allocation2 + $0x46c] ss:$16 sps:$4 sm:$0xff]  }
  0xd6   :  { %1638 = vmatpush2.bf16.msra.mxu0 %v9401_v1  ;;  %v9493_v1 = vld [vmem:[#allocation2 + $0x368] ss:$16 sps:$4 sm:$0xff]  }
  0xd7   :  { %1704 = vmatpush1.bf16.msra.mxu1 %v9404_v2  ;;  %1639 = vmatprep.subr.bf16.mxu0 %v9409_v3  ;;  %v9496_v2 = vld [vmem:[#allocation2 + $0x468] ss:$16 sps:$4 sm:$0xff]   ;;  %v9501_v3 = vld [vmem:[#allocation2 + $0x34c] ss:$16 sps:$4 sm:$0xff]  }
  0xd8   :  { %1705 = vmatprep.subr.bf16.mxu1 %v9412_v4  ;;  %v9504_v4 = vld [vmem:[#allocation2 + $0x44c] ss:$16 sps:$4 sm:$0xff]  }
  0xda   :  { %1640 = vmatpush2.bf16.msra.mxu0 %v9407_v5  ;;  %v9502_v5 = vld [vmem:[#allocation2 + $0x448] ss:$16 sps:$4 sm:$0xff]  }
  0xdb   :  { %1706 = vmatpush1.bf16.msra.mxu1 %v9410_v8  ;;  %1641 = vmatprep.subr.bf16.mxu0 %v9415_v9  ;;  %v9507_v8 = vld [vmem:[#allocation2 + $0x32c] ss:$16 sps:$4 sm:$0xff]  }
  0xdc   :  { %1707 = vmatprep.subr.bf16.mxu1 %v9418_v10  ;;  %v9510_v9 = vld [vmem:[#allocation2 + $0x42c] ss:$16 sps:$4 sm:$0xff]   ;;  %v9505_v10 = vld [vmem:[#allocation2 + $0x328] ss:$16 sps:$4 sm:$0xff]  }
  0xde   :  { %1642 = vmatpush2.bf16.msra.mxu0 %v9413_v11  ;;  %v9508_v11 = vld [vmem:[#allocation2 + $0x428] ss:$16 sps:$4 sm:$0xff]  }
  0xdf   :  { %1708 = vmatpush1.bf16.msra.mxu1 %v9416_v12  ;;  %1734 = vmatprep.subr.bf16.mxu0 %v9426_v14  ;;  %v9513_v12 = vld [vmem:[#allocation2 + $0x30c] ss:$16 sps:$4 sm:$0xff]   ;;  %v9511_v14 = vld [vmem:[#allocation2 + $0x308] ss:$16 sps:$4 sm:$0xff]  }
  0xe0   :  { %1709 = vmatprep.subr.bf16.mxu1 %v9423_v13  ;;  %v9516_v13 = vld [vmem:[#allocation2 + $0x40c] ss:$16 sps:$4 sm:$0xff]  }
  0xe1   :  { %1644 = vmatmul.mubr.bf16.vlgmr.msra.gmra.mxu0 %v10180_v15 }
  0xe2   :  { %1735 = vmatpush1.bf16.msra.mxu0 %v9424_v18  ;;  %1766 = vmatprep.mubr.bf16.mxu0 %v10153_v51  ;;  %v9448_v51 = vld [vmem:[#allocation2 + $0x268] ss:$16 sps:$4 sm:$0xff]   ;;  %v9519_v18 = vld [vmem:[#allocation2 + $0x5ec] ss:$16 sps:$4 sm:$0xff]  }
  0xe3   :  { %1710 = vmatpush2.bf16.msra.mxu1 %v9421_v17  ;;  %1736 = vmatprep.subr.bf16.mxu0 %v9432_v20  ;;  %v9514_v17 = vld [vmem:[#allocation2 + $0x408] ss:$16 sps:$4 sm:$0xff]  }
  0xe4   :  { %1711 = vmatprep.subr.bf16.mxu1 %v9429_v19  ;;  %v9522_v19 = vld [vmem:[#allocation2 + $0x6ec] ss:$16 sps:$4 sm:$0xff]   ;;  %v9517_v20 = vld [vmem:[#allocation2 + $0x5e8] ss:$16 sps:$4 sm:$0xff]  }
  0xe6   :  { %1737 = vmatpush1.bf16.msra.mxu0 %v9430_v22  ;;  %v9525_v22 = vld [vmem:[#allocation2 + $0x5cc] ss:$16 sps:$4 sm:$0xff]  }
  0xe7   :  { %1712 = vmatpush2.bf16.msra.mxu1 %v9427_v21  ;;  %1738 = vmatprep.subr.bf16.mxu0 %v9438_v24  ;;  %v9520_v21 = vld [vmem:[#allocation2 + $0x6e8] ss:$16 sps:$4 sm:$0xff]  }
  0xe8   :  { %1713 = vmatprep.subr.bf16.mxu1 %v9435_v23  ;;  %v9528_v23 = vld [vmem:[#allocation2 + $0x6cc] ss:$16 sps:$4 sm:$0xff]   ;;  %v9523_v24 = vld [vmem:[#allocation2 + $0x5c8] ss:$16 sps:$4 sm:$0xff]  }
  0xea   :  { %1739 = vmatpush1.bf16.msra.mxu0 %v9436_v26  ;;  %v9531_v26 = vld [vmem:[#allocation2 + $0x5ac] ss:$16 sps:$4 sm:$0xff]  }
  0xeb   :  { %1714 = vmatpush2.bf16.msra.mxu1 %v9433_v25  ;;  %1740 = vmatprep.subr.bf16.mxu0 %v9444_v28  ;;  %v9526_v25 = vld [vmem:[#allocation2 + $0x6c8] ss:$16 sps:$4 sm:$0xff]  }
  0xec   :  { %1715 = vmatprep.subr.bf16.mxu1 %v9441_v27  ;;  %v9534_v27 = vld [vmem:[#allocation2 + $0x6ac] ss:$16 sps:$4 sm:$0xff]   ;;  %v9529_v28 = vld [vmem:[#allocation2 + $0x5a8] ss:$16 sps:$4 sm:$0xff]  }
  0xee   :  { %1741 = vmatpush1.bf16.msra.mxu0 %v9442_v30  ;;  %v9537_v30 = vld [vmem:[#allocation2 + $0x58c] ss:$16 sps:$4 sm:$0xff]  }
  0xef   :  { %1716 = vmatpush2.bf16.msra.mxu1 %v9439_v29  ;;  %1742 = vmatprep.subr.bf16.mxu0 %v9450_v32  ;;  %v9532_v29 = vld [vmem:[#allocation2 + $0x6a8] ss:$16 sps:$4 sm:$0xff]  }
  0xf0   :  { %1717 = vmatprep.subr.bf16.mxu1 %v9447_v31  ;;  %v9540_v31 = vld [vmem:[#allocation2 + $0x68c] ss:$16 sps:$4 sm:$0xff]   ;;  %v9535_v32 = vld [vmem:[#allocation2 + $0x588] ss:$16 sps:$4 sm:$0xff]  }
  0xf2   :  { %1743 = vmatpush1.bf16.msra.mxu0 %v9448_v51  ;;  %v9546_v51 = vld [vmem:[#allocation2 + $0x66c] ss:$16 sps:$4 sm:$0xff]  }
  0xf3   :  { %1718 = vmatpush2.bf16.msra.mxu1 %v9445_v33  ;;  %1744 = vmatprep.subr.bf16.mxu0 %v9456_v36  ;;  %v9538_v33 = vld [vmem:[#allocation2 + $0x688] ss:$16 sps:$4 sm:$0xff]  }
  0xf4   :  { %1719 = vmatprep.subr.bf16.mxu1 %v9453_v34  ;;  %v9541_v34 = vld [vmem:[#allocation2 + $0x568] ss:$16 sps:$4 sm:$0xff]  }
  0xf5   :  { %v9544_v36 = vld [vmem:[#allocation2 + $0x668] ss:$16 sps:$4 sm:$0xff]  }
  0xf6   :  { %1745 = vmatpush1.bf16.msra.mxu0 %v9454_v38  ;;  %v9547_v38 = vld [vmem:[#allocation2 + $0x548] ss:$16 sps:$4 sm:$0xff]  }
  0xf7   :  { %1720 = vmatpush2.bf16.msra.mxu1 %v9451_v37  ;;  %1746 = vmatprep.subr.bf16.mxu0 %v9462_v40  ;;  %v9549_v37 = vld [vmem:[#allocation2 + $0x54c] ss:$16 sps:$4 sm:$0xff]  }
  0xf8   :  { %1721 = vmatprep.subr.bf16.mxu1 %v9459_v39  ;;  %v9550_v39 = vld [vmem:[#allocation2 + $0x648] ss:$16 sps:$4 sm:$0xff]   ;;  %v9555_v40 = vld [vmem:[#allocation2 + $0x52c] ss:$16 sps:$4 sm:$0xff]  }
  0xfa   :  { %1747 = vmatpush1.bf16.msra.mxu0 %v9460_v42  ;;  %v9553_v42 = vld [vmem:[#allocation2 + $0x528] ss:$16 sps:$4 sm:$0xff]  }
  0xfb   :  { %1722 = vmatpush2.bf16.msra.mxu1 %v9457_v41  ;;  %1748 = vmatprep.subr.bf16.mxu0 %v9468_v44  ;;  %v9558_v41 = vld [vmem:[#allocation2 + $0x62c] ss:$16 sps:$4 sm:$0xff]  }
  0xfc   :  { %1723 = vmatprep.subr.bf16.mxu1 %v9465_v43  ;;  %v9556_v43 = vld [vmem:[#allocation2 + $0x628] ss:$16 sps:$4 sm:$0xff]   ;;  %v9561_v44 = vld [vmem:[#allocation2 + $0x50c] ss:$16 sps:$4 sm:$0xff]  }
  0xfe   :  { %1749 = vmatpush1.bf16.msra.mxu0 %v9466_v46  ;;  %v9559_v46 = vld [vmem:[#allocation2 + $0x508] ss:$16 sps:$4 sm:$0xff]  }
  0xff   :  { %1724 = vmatpush2.bf16.msra.mxu1 %v9463_v45  ;;  %1750 = vmatprep.subr.bf16.mxu0 %v9471_v48  ;;  %v9564_v45 = vld [vmem:[#allocation2 + $0x60c] ss:$16 sps:$4 sm:$0xff]   ;;  %v9562_v48 = vld [vmem:[#allocation2 + $0x608] ss:$16 sps:$4 sm:$0xff]  }
 0x100   :  { %1775 = vmatprep.subr.bf16.mxu1 %v9474_v49  ;;  %v9567_v49 = vld [vmem:[#allocation6 + $0xe4] ss:$16 sps:$4 sm:$0xff]  }
 0x102   :  { %1726 = vmatmul.mubr.bf16.vlgmr.msra.gmra.mxu1 %v10157_v6  ;;  %1751 = vmatpush2.bf16.msra.mxu0 %v9469_v50  ;;  %v9490_v6 = vld [vmem:[#allocation2 + $0x488] ss:$16 sps:$4 sm:$0xff]   ;;  %v9565_v50 = vld [vmem:[#allocation6 + $0xe0] ss:$16 sps:$4 sm:$0xff]  }
 0x103   :  { %1776 = vmatpush1.bf16.msra.mxu1 %v9472_v52  ;;  %1752 = vmatprep.subr.bf16.mxu0 %v9477_v53  ;;  %v9570_v52 = vld [vmem:[#allocation6 + $0xc4] ss:$16 sps:$4 sm:$0xff]  }
 0x104   :  { %1777 = vmatprep.subr.bf16.mxu1 %v9480_v54  ;;  %1807 = vmatprep.mubr.bf16.mxu1 %v10171_v35  ;;  %v9499_v35 = vld [vmem:[#allocation2 + $0x348] ss:$16 sps:$4 sm:$0xff]   ;;  %v9568_v54 = vld [vmem:[#allocation6 + $0xc0] ss:$16 sps:$4 sm:$0xff]  }
 0x105   :  { %v9885_v53 = vld [vmem:[%s10444_s0 + $0x18] ss:$0 sps:$4 sm:$0xff]  }
 0x106   :  { %1753 = vmatpush2.bf16.msra.mxu0 %v9475_v55  ;;  %v9573_v55 = vld [vmem:[#allocation6 + $0xa4] ss:$16 sps:$4 sm:$0xff]  }
 0x107   :  { %1778 = vmatpush1.bf16.msra.mxu1 %v9478_v56  ;;  %1754 = vmatprep.subr.bf16.mxu0 %v9483_v57  ;;  %v9571_v56 = vld [vmem:[#allocation6 + $0xa0] ss:$16 sps:$4 sm:$0xff]   ;;  %v9576_v57 = vld [vmem:[#allocation6 + $0x84] ss:$16 sps:$4 sm:$0xff]  }
 0x108   :  { %1779 = vmatprep.subr.bf16.mxu1 %v9486_v58  ;;  %v9574_v58 = vld [vmem:[#allocation6 + $0x80] ss:$16 sps:$4 sm:$0xff]  }
 0x10a   :  { %1755 = vmatpush2.bf16.msra.mxu0 %v9481_v59  ;;  %v9637_v59 = vld [vmem:[#allocation6 + $0x2e0] ss:$16 sps:$4 sm:$0xff]  }
 0x10b   :  { %1780 = vmatpush1.bf16.msra.mxu1 %v9484_v60  ;;  %1756 = vmatprep.subr.bf16.mxu0 %v9489_v61  ;;  %v9639_v60 = vld [vmem:[#allocation6 + $0x2e4] ss:$16 sps:$4 sm:$0xff]  }
 0x10c   :  { %1781 = vmatprep.subr.bf16.mxu1 %v9492_v62  ;;  %v9579_v61 = vld [vmem:[#allocation6 + $0x64] ss:$16 sps:$4 sm:$0xff]   ;;  %v9643_v62 = vld [vmem:[#allocation6 + $0x2c0] ss:$16 sps:$4 sm:$0xff]  }
 0x10e   :  { %1757 = vmatpush2.bf16.msra.mxu0 %v9487_v47  ;;  %v9645_v47 = vld [vmem:[#allocation6 + $0x2c4] ss:$16 sps:$4 sm:$0xff]  }
 0x10f   :  { %1782 = vmatpush1.bf16.msra.mxu1 %v9490_v6  ;;  %1758 = vmatprep.subr.bf16.mxu0 %v9495_v63  ;;  %v9582_v6 = vld [vmem:[#allocation6 + $0x44] ss:$16 sps:$4 sm:$0xff]   ;;  %v9580_v63 = vld [vmem:[#allocation6 + $0x40] ss:$16 sps:$4 sm:$0xff]  }
 0x110   :  { %1783 = vmatprep.subr.bf16.mxu1 %v9498_v0  ;;  %v9649_v0 = vld [vmem:[#allocation6 + $0x2a0] ss:$16 sps:$4 sm:$0xff]  }
 0x112   :  { %1759 = vmatpush2.bf16.msra.mxu0 %v9493_v1  ;;  %v9651_v1 = vld [vmem:[#allocation6 + $0x2a4] ss:$16 sps:$4 sm:$0xff]  }
 0x113   :  { %1784 = vmatpush1.bf16.msra.mxu1 %v9496_v2  ;;  %1760 = vmatprep.subr.bf16.mxu0 %v9501_v3  ;;  %v9585_v2 = vld [vmem:[#allocation6 + $0x24] ss:$16 sps:$4 sm:$0xff]   ;;  %v9583_v3 = vld [vmem:[#allocation6 + $0x20] ss:$16 sps:$4 sm:$0xff]  }
 0x114   :  { %1785 = vmatprep.subr.bf16.mxu1 %v9504_v4  ;;  %v9655_v4 = vld [vmem:[#allocation6 + $0x280] ss:$16 sps:$4 sm:$0xff]  }
 0x116   :  { %1761 = vmatpush2.bf16.msra.mxu0 %v9499_v35  ;;  %v9657_v35 = vld [vmem:[#allocation6 + $0x284] ss:$16 sps:$4 sm:$0xff]  }
 0x117   :  { %1786 = vmatpush1.bf16.msra.mxu1 %v9502_v5  ;;  %1762 = vmatprep.subr.bf16.mxu0 %v9507_v8  ;;  %v9588_v5 = vld [vmem:[#allocation6 + $0x4] ss:$16 sps:$4 sm:$0xff]   ;;  %v9586_v8 = vld [vmem:[#allocation6] ss:$16 sps:$4 sm:$0xff]  }
 0x118   :  { %1787 = vmatprep.subr.bf16.mxu1 %v9510_v9  ;;  %v9661_v9 = vld [vmem:[#allocation6 + $0x260] ss:$16 sps:$4 sm:$0xff]  }
 0x11a   :  { %1763 = vmatpush2.bf16.msra.mxu0 %v9505_v10  ;;  %v9663_v10 = vld [vmem:[#allocation6 + $0x264] ss:$16 sps:$4 sm:$0xff]  }
 0x11b   :  { %1788 = vmatpush1.bf16.msra.mxu1 %v9508_v11  ;;  %1764 = vmatprep.subr.bf16.mxu0 %v9513_v12  ;;  %v9591_v11 = vld [vmem:[#allocation6 + $0x1e4] ss:$16 sps:$4 sm:$0xff]   ;;  %v9589_v12 = vld [vmem:[#allocation6 + $0x1e0] ss:$16 sps:$4 sm:$0xff]  }
 0x11c   :  { %1789 = vmatprep.subr.bf16.mxu1 %v9516_v13  ;;  %v9667_v13 = vld [vmem:[#allocation6 + $0x240] ss:$16 sps:$4 sm:$0xff]  }
 0x11e   :  { %1765 = vmatpush2.bf16.msra.mxu0 %v9511_v14  ;;  %v9669_v14 = vld [vmem:[#allocation6 + $0x244] ss:$16 sps:$4 sm:$0xff]  }
 0x11f   :  { %1790 = vmatpush1.bf16.msra.mxu1 %v9514_v17  ;;  %1816 = vmatprep.subr.bf16.mxu0 %v9522_v19  ;;  %v9594_v17 = vld [vmem:[#allocation6 + $0x1c4] ss:$16 sps:$4 sm:$0xff]  }
 0x120   :  { %1791 = vmatprep.subr.bf16.mxu1 %v9519_v18  ;;  %v9592_v18 = vld [vmem:[#allocation6 + $0x1c0] ss:$16 sps:$4 sm:$0xff]  }
 0x121   :  { %1767 = vmatmul.mubr.bf16.vlgmr.msra.gmra.mxu0 %v10159_v7  ;;  %v9543_v7 = vld [vmem:[#allocation2 + $0x56c] ss:$16 sps:$4 sm:$0xff]  }
 0x122   :  { %1817 = vmatpush1.bf16.msra.mxu0 %v9520_v21  ;;  %1848 = vmatprep.mubr.bf16.mxu0 %v10070_v16  ;;  %v9552_v16 = vld [vmem:[#allocation2 + $0x64c] ss:$16 sps:$4 sm:$0xff]  }
 0x123   :  { %1792 = vmatpush2.bf16.msra.mxu1 %v9517_v20  ;;  %1818 = vmatprep.subr.bf16.mxu0 %v9528_v23  ;;  %v9597_v23 = vld [vmem:[#allocation6 + $0x1a4] ss:$16 sps:$4 sm:$0xff]  }
 0x124   :  { %1793 = vmatprep.subr.bf16.mxu1 %v9525_v22 }
 0x126   :  { %1819 = vmatpush1.bf16.msra.mxu0 %v9526_v25  ;;  %v9595_v25 = vld [vmem:[#allocation6 + $0x1a0] ss:$16 sps:$4 sm:$0xff]  }
 0x127   :  { %1794 = vmatpush2.bf16.msra.mxu1 %v9523_v24  ;;  %1820 = vmatprep.subr.bf16.mxu0 %v9534_v27  ;;  %v9675_v24 = vld [vmem:[#allocation6 + $0x224] ss:$16 sps:$4 sm:$0xff]  }
 0x128   :  { %1795 = vmatprep.subr.bf16.mxu1 %v9531_v26  ;;  %v9673_v26 = vld [vmem:[#allocation6 + $0x220] ss:$16 sps:$4 sm:$0xff]  }
 0x12a   :  { %1821 = vmatpush1.bf16.msra.mxu0 %v9532_v29 }
 0x12b   :  { %1796 = vmatpush2.bf16.msra.mxu1 %v9529_v28  ;;  %1822 = vmatprep.subr.bf16.mxu0 %v9540_v31  ;;  %v9600_v31 = vld [vmem:[#allocation6 + $0x184] ss:$16 sps:$4 sm:$0xff]  }
 0x12c   :  { %1797 = vmatprep.subr.bf16.mxu1 %v9537_v30 }
 0x12e   :  { %1823 = vmatpush1.bf16.msra.mxu0 %v9538_v33  ;;  %v9681_v33 = vld [vmem:[#allocation6 + $0x204] ss:$16 sps:$4 sm:$0xff]  }
 0x12f   :  { %1798 = vmatpush2.bf16.msra.mxu1 %v9535_v32  ;;  %1824 = vmatprep.subr.bf16.mxu0 %v9546_v51  ;;  %v9679_v32 = vld [vmem:[#allocation6 + $0x200] ss:$16 sps:$4 sm:$0xff]   ;;  %v9603_v51 = vld [vmem:[#allocation6 + $0x164] ss:$16 sps:$4 sm:$0xff]  }
 0x130   :  { %1799 = vmatprep.subr.bf16.mxu1 %v9543_v7  ;;  %v9598_v7 = vld [vmem:[#allocation6 + $0x180] ss:$16 sps:$4 sm:$0xff]  }
 0x132   :  { %1825 = vmatpush1.bf16.msra.mxu0 %v9544_v36  ;;  %v9687_v36 = vld [vmem:[#allocation6 + $0x3e4] ss:$16 sps:$4 sm:$0xff]  }
 0x133   :  { %1800 = vmatpush2.bf16.msra.mxu1 %v9541_v34  ;;  %1826 = vmatprep.subr.bf16.mxu0 %v9552_v16  ;;  %v9685_v34 = vld [vmem:[#allocation6 + $0x3e0] ss:$16 sps:$4 sm:$0xff]  }
 0x134   :  { %1801 = vmatprep.subr.bf16.mxu1 %v9549_v37  ;;  %v9690_v37 = vld [vmem:[#allocation6 + $0x3c4] ss:$16 sps:$4 sm:$0xff]   ;;  %v9601_v16 = vld [vmem:[#allocation6 + $0x160] ss:$16 sps:$4 sm:$0xff]  }
 0x136   :  { %1827 = vmatpush1.bf16.msra.mxu0 %v9550_v39  ;;  %v9606_v39 = vld [vmem:[#allocation6 + $0x144] ss:$16 sps:$4 sm:$0xff]  }
 0x137   :  { %1802 = vmatpush2.bf16.msra.mxu1 %v9547_v38  ;;  %1828 = vmatprep.subr.bf16.mxu0 %v9558_v41  ;;  %v9688_v38 = vld [vmem:[#allocation6 + $0x3c0] ss:$16 sps:$4 sm:$0xff]  }
 0x138   :  { %1803 = vmatprep.subr.bf16.mxu1 %v9555_v40  ;;  %v9693_v40 = vld [vmem:[#allocation6 + $0x3a4] ss:$16 sps:$4 sm:$0xff]   ;;  %v9604_v41 = vld [vmem:[#allocation6 + $0x140] ss:$16 sps:$4 sm:$0xff]  }
 0x13a   :  { %1829 = vmatpush1.bf16.msra.mxu0 %v9556_v43  ;;  %v9609_v43 = vld [vmem:[#allocation6 + $0x124] ss:$16 sps:$4 sm:$0xff]  }
 0x13b   :  { %1804 = vmatpush2.bf16.msra.mxu1 %v9553_v42  ;;  %1830 = vmatprep.subr.bf16.mxu0 %v9564_v45  ;;  %v9691_v42 = vld [vmem:[#allocation6 + $0x3a0] ss:$16 sps:$4 sm:$0xff]  }
 0x13c   :  { %1805 = vmatprep.subr.bf16.mxu1 %v9561_v44  ;;  %v9696_v44 = vld [vmem:[#allocation6 + $0x384] ss:$16 sps:$4 sm:$0xff]   ;;  %v9607_v45 = vld [vmem:[#allocation6 + $0x120] ss:$16 sps:$4 sm:$0xff]  }
 0x13e   :  { %1831 = vmatpush1.bf16.msra.mxu0 %v9562_v48  ;;  %v9612_v48 = vld [vmem:[#allocation6 + $0x104] ss:$16 sps:$4 sm:$0xff]  }
 0x13f   :  { %1806 = vmatpush2.bf16.msra.mxu1 %v9559_v46  ;;  %2655 = vmatprep.subr.bf16.mxu0 %v9567_v49  ;;  %v9694_v46 = vld [vmem:[#allocation6 + $0x380] ss:$16 sps:$4 sm:$0xff]   ;;  %v9699_v49 = vld [vmem:[#allocation6 + $0x364] ss:$16 sps:$4 sm:$0xff]  }
 0x140   :  { %2696 = vmatprep.subr.bf16.mxu1 %v9639_v60 }
 0x141   :  { %1849 = vmatmul.mubr.bf16.vlgmr.msra.gmra.mxu0 %v9885_v53  ;;  %v9615_v53 = vld [vmem:[#allocation6 + $0xec] ss:$16 sps:$4 sm:$0xff]  }
 0x142   :  { %1808 = vmatmul.mubr.bf16.vlgmr.msra.gmra.mxu1 %v10180_v15  ;;  %2656 = vmatpush1.bf16.msra.mxu0 %v9565_v50  ;;  %v9577_v15 = vld [vmem:[#allocation6 + $0x60] ss:$16 sps:$4 sm:$0xff]  }
 0x143   :  { %2657 = vmatprep.subr.bf16.mxu0 %v9570_v52  ;;  %2697 = vmatpush1.bf16.msra.mxu1 %v9637_v59  ;;  %v9610_v50 = vld [vmem:[#allocation6 + $0x100] ss:$16 sps:$4 sm:$0xff]  }
 0x144   :  { %2698 = vmatprep.subr.bf16.mxu1 %v9645_v47  ;;  %v9697_v52 = vld [vmem:[#allocation6 + $0x360] ss:$16 sps:$4 sm:$0xff]   ;;  %v364_v47 = vlaneseq }
 0x145   :  { %v9703_v59 = vld [vmem:[#allocation6 + $0x320] ss:$16 sps:$4 sm:$0xff]  }
 0x146   :  { %2658 = vmatpush1.bf16.msra.mxu0 %v9568_v54  ;;  %v9702_v54 = vld [vmem:[#allocation6 + $0x344] ss:$16 sps:$4 sm:$0xff]  }
 0x147   :  { %2659 = vmatprep.subr.bf16.mxu0 %v9573_v55  ;;  %2699 = vmatpush1.bf16.msra.mxu1 %v9643_v62  ;;  %v9700_v55 = vld [vmem:[#allocation6 + $0x340] ss:$16 sps:$4 sm:$0xff]  }
 0x148   :  { %2700 = vmatprep.subr.bf16.mxu1 %v9651_v1  ;;  %v9706_v62 = vld [vmem:[#allocation6 + $0x300] ss:$16 sps:$4 sm:$0xff]   ;;  %v10205_v1 = vld [vmem:[#allocation4] sm:$0xf] }
 0x14a   :  { %2660 = vmatpush1.bf16.msra.mxu0 %v9571_v56 }
 0x14b   :  { %2661 = vmatprep.subr.bf16.mxu0 %v9576_v57  ;;  %2701 = vmatpush1.bf16.msra.mxu1 %v9649_v0 }
 0x14c   :  { %2702 = vmatprep.subr.bf16.mxu1 %v9657_v35 }
 0x14e   :  { %2662 = vmatpush1.bf16.msra.mxu0 %v9574_v58  ;;  %v9705_v58 = vld [vmem:[#allocation6 + $0x324] ss:$16 sps:$4 sm:$0xff]  }
 0x14f   :  { %2663 = vmatprep.subr.bf16.mxu0 %v9579_v61  ;;  %2703 = vmatpush1.bf16.msra.mxu1 %v9655_v4 }
 0x150   :  { %2704 = vmatprep.subr.bf16.mxu1 %v9663_v10 }
 0x152   :  { %2664 = vmatpush1.bf16.msra.mxu0 %v9577_v15  ;;  %v9708_v15 = vld [vmem:[#allocation6 + $0x304] ss:$16 sps:$4 sm:$0xff]  }
 0x153   :  { %2665 = vmatprep.subr.bf16.mxu0 %v9582_v6  ;;  %2705 = vmatpush1.bf16.msra.mxu1 %v9661_v9  ;;  %v9711_v6 = vld [vmem:[#allocation6 + $0x2ec] ss:$16 sps:$4 sm:$0xff]  }
 0x154   :  { %2706 = vmatprep.subr.bf16.mxu1 %v9669_v14 }
 0x156   :  { %2666 = vmatpush1.bf16.msra.mxu0 %v9580_v63  ;;  %v10200_v63 = vshrl.u32 %v364_v47, 7  ;;  %v2947_v47 = vld [vmem:[#allocation9 + $0x3c0] sm:$0xff] }
 0x157   :  { %2667 = vmatprep.subr.bf16.mxu0 %v9585_v2  ;;  %2707 = vmatpush1.bf16.msra.mxu1 %v9667_v13 }
 0x158   :  { %2708 = vmatprep.subr.bf16.mxu1 %v9675_v24  ;;  %v10203_v0 = vsub.s32 0, %v10200_v63  ;;  %v10208_v2 = vsub.s32 1, %v10200_v63 }
 0x15a   :  { %2668 = vmatpush1.bf16.msra.mxu0 %v9583_v3  ;;  %v367_v3 = vrot.slane %v10205_v1, %v10203_v0  ;;  %v371_v4 = vrot.slane %v10205_v1, %v10208_v2 }
 0x15b   :  { %2669 = vmatprep.subr.bf16.mxu0 %v9588_v5  ;;  %2709 = vmatpush1.bf16.msra.mxu1 %v9673_v26 }
 0x15c   :  { %2710 = vmatprep.subr.bf16.mxu1 %v9681_v33  ;;  %v9630_v33 = vld [vmem:[#allocation6 + $0x4c] ss:$16 sps:$4 sm:$0xff]  }
 0x15e   :  { %2670 = vmatpush1.bf16.msra.mxu0 %v9586_v8 }
 0x15f   :  { %2671 = vmatprep.subr.bf16.mxu0 %v9591_v11  ;;  %2711 = vmatpush1.bf16.msra.mxu1 %v9679_v32  ;;  %v9625_v32 = vld [vmem:[#allocation6 + $0x68] ss:$16 sps:$4 sm:$0xff]  }
 0x160   :  { %2712 = vmatprep.subr.bf16.mxu1 %v9687_v36  ;;  %v9631_v36 = vld [vmem:[#allocation6 + $0x28] ss:$16 sps:$4 sm:$0xff]  }
 0x161   :  { %v10192_v19 = vpop.f32.mrf.mxu0 }
 0x162   :  { %v10194_v20 = vpop.f32.mrf.mxu1  ;;  %2672 = vmatpush2.bf16.msra.mxu0 %v9589_v12  ;;  %v1564_v35 = vadd.f32 %v10192_v19, %v367_v3  ;;  %v9618_v19 = vld [vmem:[#allocation6 + $0xcc] ss:$16 sps:$4 sm:$0xff]  }
 0x163   :  { %v10196_v21 = vpop.f32.mrf.mxu0  ;;  %2673 = vmatprep.subr.bf16.mxu0 %v9594_v17  ;;  %2713 = vmatpush2.bf16.msra.mxu1 %v9685_v34 }
 0x164   :  { %v10198_v22 = vpop.f32.mrf.mxu1  ;;  %2714 = vmatprep.subr.bf16.mxu1 %v9690_v37  ;;  %v1566_v5 = vadd.f32 %v10196_v21, %v371_v4  ;;  %v1605_v8 = vadd.f32 %v10194_v20, %v1564_v35  ;;  %v9616_v20 = vld [vmem:[#allocation6 + $0xc8] ss:$16 sps:$4 sm:$0xff]   ;;  %v9621_v21 = vld [vmem:[#allocation6 + $0xac] ss:$16 sps:$4 sm:$0xff]  }
 0x165   :  { %v1567_v27 = vpop.f32.mrf.mxu0  ;;  %v2931_v35 = vld [vmem:[#allocation9 + $0x340] sm:$0xff] }
 0x166   :  { %v1608_v28 = vpop.f32.mrf.mxu1  ;;  %2674 = vmatpush2.bf16.msra.mxu0 %v9592_v18  ;;  %v1607_v10 = vadd.f32 %v10198_v22, %v1566_v5  ;;  %v9613_v27 = vld [vmem:[#allocation6 + $0xe8] ss:$16 sps:$4 sm:$0xff]  }
 0x167   :  { %v1568_v29 = vpop.f32.mrf.mxu0  ;;  %2675 = vmatprep.subr.bf16.mxu0 %v9597_v23  ;;  %2715 = vmatpush2.bf16.msra.mxu1 %v9688_v38  ;;  %v9619_v22 = vld [vmem:[#allocation6 + $0xa8] ss:$16 sps:$4 sm:$0xff]  }
 0x168   :  { %v1609_v30 = vpop.f32.mrf.mxu1  ;;  %2716 = vmatprep.subr.bf16.mxu1 %v9693_v40  ;;  %v9624_v29 = vld [vmem:[#allocation6 + $0x8c] ss:$16 sps:$4 sm:$0xff]  }
 0x169   :  { %v9622_v30 = vld [vmem:[#allocation6 + $0x88] ss:$16 sps:$4 sm:$0xff]  }
 0x16a   :  { %2676 = vmatpush2.bf16.msra.mxu0 %v9595_v25 }
 0x16b   :  { %2677 = vmatprep.subr.bf16.mxu0 %v9600_v31  ;;  %2717 = vmatpush2.bf16.msra.mxu1 %v9691_v42  ;;  %v9627_v31 = vld [vmem:[#allocation6 + $0x6c] ss:$16 sps:$4 sm:$0xff]   ;;  %v9640_v42 = vld [vmem:[#allocation6 + $0x1e8] ss:$16 sps:$4 sm:$0xff]  }
 0x16c   :  { %2718 = vmatprep.subr.bf16.mxu1 %v9696_v44  ;;  %v9646_v44 = vld [vmem:[#allocation6 + $0x1c8] ss:$16 sps:$4 sm:$0xff]  }
 0x16e   :  { %2678 = vmatpush2.bf16.msra.mxu0 %v9598_v7  ;;  %v9628_v7 = vld [vmem:[#allocation6 + $0x48] ss:$16 sps:$4 sm:$0xff]  }
 0x16f   :  { %2679 = vmatprep.subr.bf16.mxu0 %v9603_v51  ;;  %2719 = vmatpush2.bf16.msra.mxu1 %v9694_v46  ;;  %v9633_v51 = vld [vmem:[#allocation6 + $0x2c] ss:$16 sps:$4 sm:$0xff]   ;;  %v9652_v46 = vld [vmem:[#allocation6 + $0x1a8] ss:$16 sps:$4 sm:$0xff]  }
 0x170   :  { %2720 = vmatprep.subr.bf16.mxu1 %v9699_v49  ;;  %v9658_v49 = vld [vmem:[#allocation6 + $0x188] ss:$16 sps:$4 sm:$0xff]  }
 0x172   :  { %2680 = vmatpush2.bf16.msra.mxu0 %v9601_v16  ;;  %v9636_v16 = vld [vmem:[#allocation6 + $0xc] ss:$16 sps:$4 sm:$0xff]  }
 0x173   :  { %2681 = vmatprep.subr.bf16.mxu0 %v9606_v39  ;;  %2721 = vmatpush2.bf16.msra.mxu1 %v9697_v52  ;;  %v9634_v39 = vld [vmem:[#allocation6 + $0x8] ss:$16 sps:$4 sm:$0xff]  }
 0x174   :  { %2722 = vmatprep.subr.bf16.mxu1 %v9702_v54  ;;  %v9664_v52 = vld [vmem:[#allocation6 + $0x168] ss:$16 sps:$4 sm:$0xff]  }
 0x175   :  { %v9670_v54 = vld [vmem:[#allocation6 + $0x148] ss:$16 sps:$4 sm:$0xff]  }
 0x176   :  { %2682 = vmatpush2.bf16.msra.mxu0 %v9604_v41  ;;  %v9642_v41 = vld [vmem:[#allocation6 + $0x1ec] ss:$16 sps:$4 sm:$0xff]  }
 0x177   :  { %2683 = vmatprep.subr.bf16.mxu0 %v9609_v43  ;;  %2723 = vmatpush2.bf16.msra.mxu1 %v9700_v55  ;;  %v9648_v43 = vld [vmem:[#allocation6 + $0x1cc] ss:$16 sps:$4 sm:$0xff]  }
 0x178   :  { %2724 = vmatprep.subr.bf16.mxu1 %v9705_v58  ;;  %v9678_v55 = vld [vmem:[#allocation6 + $0x12c] ss:$16 sps:$4 sm:$0xff]  }
 0x17a   :  { %2684 = vmatpush2.bf16.msra.mxu0 %v9607_v45  ;;  %v9654_v45 = vld [vmem:[#allocation6 + $0x1ac] ss:$16 sps:$4 sm:$0xff]  }
 0x17b   :  { %2685 = vmatprep.subr.bf16.mxu0 %v9612_v48  ;;  %2725 = vmatpush2.bf16.msra.mxu1 %v9703_v59  ;;  %v9660_v48 = vld [vmem:[#allocation6 + $0x18c] ss:$16 sps:$4 sm:$0xff]  }
 0x17c   :  { %2726 = vmatprep.subr.bf16.mxu1 %v9708_v15  ;;  %v9684_v59 = vld [vmem:[#allocation6 + $0x10c] ss:$16 sps:$4 sm:$0xff]  }
 0x17e   :  { %2686 = vmatpush2.bf16.msra.mxu0 %v9610_v50  ;;  %v9666_v50 = vld [vmem:[#allocation6 + $0x16c] ss:$16 sps:$4 sm:$0xff]  }
 0x17f   :  { %2737 = vmatprep.subr.bf16.mxu0 %v9615_v53  ;;  %2727 = vmatpush2.bf16.msra.mxu1 %v9706_v62  ;;  %v9672_v53 = vld [vmem:[#allocation6 + $0x14c] ss:$16 sps:$4 sm:$0xff]   ;;  %v2939_v62 = vld [vmem:[#allocation9 + $0x380] sm:$0xff] }
 0x180   :  { %2778 = vmatprep.subr.bf16.mxu1 %v9711_v6  ;;  %v2923_v6 = vld [vmem:[#allocation9 + $0x300] sm:$0xff]  ;;  %v8503_v3 = vcombine.low %v2939_v62, %v2947_v47  ;;  %v8504_v4 = vcombine.high %v2939_v62, %v2947_v47  ;;  %v9732_v62 = vld [vmem:[#allocation6 + $0x20c] ss:$16 sps:$4 sm:$0xff]  }
 0x181   :  { %v8488_v5 = vcombine.high %v2923_v6, %v2931_v35  ;;  %v9730_v47 = vld [vmem:[#allocation6 + $0x208] ss:$16 sps:$4 sm:$0xff]  }
 0x182   :  { %v1686_v56 = vpop.f32.mrf.mxu1 }
 0x184   :  { %v1688_v57 = vpop.f32.mrf.mxu1 }
 0x186   :  { %v1690_v60 = vpop.f32.mrf.mxu1 }
 0x188   :  { %v1691_v61 = vpop.f32.mrf.mxu1 }
 0x189   :  { %v9682_v61 = vld [vmem:[#allocation6 + $0x108] ss:$16 sps:$4 sm:$0xff]  }
 0x1a1   :  { %v1645_v9 = vpop.f32.mrf.mxu0 }
 0x1a2   :  { %v1646_v11 = vadd.f32 %v1645_v9, %v1605_v8  ;;  %v2907_v8 = vld [vmem:[#allocation9 + $0x280] sm:$0xff] }
 0x1a3   :  { %v1647_v12 = vpop.f32.mrf.mxu0  ;;  %v2915_v9 = vld [vmem:[#allocation9 + $0x2c0] sm:$0xff] }
 0x1a4   :  { %v1687_v13 = vadd.f32 %v1686_v56, %v1646_v11  ;;  %v1648_v14 = vadd.f32 %v1647_v12, %v1607_v10  ;;  %v10227_v10 = vsub.s32 2, %v10200_v63  ;;  %v8487_v11 = vcombine.low %v2923_v6, %v2931_v35  ;;  %v9735_v6 = vld [vmem:[#allocation6 + $0x3ec] ss:$16 sps:$4 sm:$0xff]   ;;  %v2843_v35 = vld [vmem:[#allocation9 + $0x80] sm:$0xff] }
 0x1a5   :  { %v1649_v17 = vpop.f32.mrf.mxu0  ;;  %v10230_v12 = vsub.s32 3, %v10200_v63 }
 0x1a6   :  { %v1689_v18 = vadd.f32 %v1688_v57, %v1648_v14  ;;  %v1857_v23 = vmax.f32 %v1687_v13, 0.0  ;;  %v9676_v57 = vld [vmem:[#allocation6 + $0x128] ss:$16 sps:$4 sm:$0xff]   ;;  %v8472_v13 = vcombine.high %v2907_v8, %v2915_v9 }
 0x1a7   :  { %v1650_v24 = vpop.f32.mrf.mxu0  ;;  %v2891_v14 = vld [vmem:[#allocation9 + $0x200] sm:$0xff] }
 0x1a8   :  { %v1858_v25 = vmax.f32 %v1689_v18, 0.0  ;;  %v10218_v28 = vpack.c.bf16 %v1857_v23, %v1857_v23  ;;  %v2899_v17 = vld [vmem:[#allocation9 + $0x240] sm:$0xff]  ;;  %v375_v18 = vrot.slane %v10205_v1, %v10227_v10  ;;  %v8471_v23 = vcombine.low %v2907_v8, %v2915_v9 }
 0x1a9   :  { %v379_v24 = vrot.slane %v10205_v1, %v10230_v12  ;;  %v9736_v9 = vld [vmem:[#allocation6 + $0x3c8] ss:$16 sps:$4 sm:$0xff]  }
 0x1aa   :  { %v1862_v26 = vpack.c.bf16 %v1858_v25, %v1858_v25  ;;  %v8456_v25 = vcombine.high %v2891_v14, %v2899_v17 }
 0x1ac   :  { %2687 = vmatprep.mubr.bf16.mxu0 %v1862_v26 }
 0x1ad   :  { %2688 = vmatmul.mubr.bf16.vlgmr.msra.gmra.mxu0 %v10218_v28 }
 0x1ae   :  { %2738 = vmatpush1.bf16.msra.mxu0 %v9613_v27  ;;  %2769 = vmatprep.mubr.bf16.mxu0 %v1862_v26  ;;  %v2875_v26 = vld [vmem:[#allocation9 + $0x180] sm:$0xff] }
 0x1af   :  { %2739 = vmatprep.subr.bf16.mxu0 %v9618_v19  ;;  %v2883_v27 = vld [vmem:[#allocation9 + $0x1c0] sm:$0xff]  ;;  %v8455_v19 = vcombine.low %v2891_v14, %v2899_v17 }
 0x1b0   :  { %v2827_v14 = vld [vmem:[#allocation9] sm:$0xff] }
 0x1b1   :  { %v2835_v17 = vld [vmem:[#allocation9 + $0x40] sm:$0xff] }
 0x1b2   :  { %2740 = vmatpush1.bf16.msra.mxu0 %v9616_v20 }
 0x1b3   :  { %2741 = vmatprep.subr.bf16.mxu0 %v9621_v21 }
 0x1b6   :  { %2742 = vmatpush1.bf16.msra.mxu0 %v9619_v22  ;;  %v8440_v22 = vcombine.high %v2875_v26, %v2883_v27 }
 0x1b7   :  { %2743 = vmatprep.subr.bf16.mxu0 %v9624_v29 }
 0x1ba   :  { %2744 = vmatpush1.bf16.msra.mxu0 %v9622_v30 }
 0x1bb   :  { %2745 = vmatprep.subr.bf16.mxu0 %v9627_v31  ;;  %v2859_v31 = vld [vmem:[#allocation9 + $0x100] sm:$0xff] }
 0x1be   :  { %2746 = vmatpush1.bf16.msra.mxu0 %v9625_v32  ;;  %v2867_v32 = vld [vmem:[#allocation9 + $0x140] sm:$0xff] }
 0x1bf   :  { %2747 = vmatprep.subr.bf16.mxu0 %v9630_v33 }
 0x1c2   :  { %v10221_v34 = vpop.f32.mrf.mxu1  ;;  %2748 = vmatpush1.bf16.msra.mxu0 %v9628_v7 }
 0x1c3   :  { %2749 = vmatprep.subr.bf16.mxu0 %v9633_v51 }
 0x1c4   :  { %v10223_v37 = vpop.f32.mrf.mxu1 }
 0x1c5   :  { %v1730_v20 = vadd.f32 %v10223_v37, %v379_v24  ;;  %v9744_v24 = vld [vmem:[#allocation6 + $0x38c] ss:$16 sps:$4 sm:$0xff]  }
 0x1c6   :  { %v1731_v38 = vpop.f32.mrf.mxu1  ;;  %2750 = vmatpush1.bf16.msra.mxu0 %v9631_v36  ;;  %v8439_v36 = vcombine.low %v2875_v26, %v2883_v27  ;;  %v3067_v26 = vld [vmem:[#allocation9 + $0x780] sm:$0xff] }
 0x1c7   :  { %2751 = vmatprep.subr.bf16.mxu0 %v9636_v16  ;;  %v3075_v27 = vld [vmem:[#allocation9 + $0x7c0] sm:$0xff] }
 0x1c8   :  { %v1732_v40 = vpop.f32.mrf.mxu1 }
 0x1ca   :  { %2752 = vmatpush1.bf16.msra.mxu0 %v9634_v39 }
 0x1cb   :  { %2753 = vmatprep.subr.bf16.mxu0 %v9642_v41 }
 0x1ce   :  { %2754 = vmatpush2.bf16.msra.mxu0 %v9640_v42 }
 0x1cf   :  { %2755 = vmatprep.subr.bf16.mxu0 %v9648_v43 }
 0x1d2   :  { %2756 = vmatpush2.bf16.msra.mxu0 %v9646_v44  ;;  %v8423_v44 = vcombine.low %v2859_v31, %v2867_v32 }
 0x1d3   :  { %2757 = vmatprep.subr.bf16.mxu0 %v9654_v45 }
 0x1d6   :  { %2758 = vmatpush2.bf16.msra.mxu0 %v9652_v46 }
 0x1d7   :  { %2759 = vmatprep.subr.bf16.mxu0 %v9660_v48  ;;  %v9709_v48 = vld [vmem:[#allocation6 + $0x2e8] ss:$16 sps:$4 sm:$0xff]  }
 0x1da   :  { %2760 = vmatpush2.bf16.msra.mxu0 %v9658_v49 }
 0x1db   :  { %2761 = vmatprep.subr.bf16.mxu0 %v9666_v50  ;;  %v9714_v50 = vld [vmem:[#allocation6 + $0x2cc] ss:$16 sps:$4 sm:$0xff]  }
 0x1de   :  { %2762 = vmatpush2.bf16.msra.mxu0 %v9664_v52  ;;  %v9712_v52 = vld [vmem:[#allocation6 + $0x2c8] ss:$16 sps:$4 sm:$0xff]  }
 0x1df   :  { %2763 = vmatprep.subr.bf16.mxu0 %v9672_v53  ;;  %v9717_v53 = vld [vmem:[#allocation6 + $0x2ac] ss:$16 sps:$4 sm:$0xff]  }
 0x1e1   :  { %v1768_v56 = vpop.f32.mrf.mxu0 }
 0x1e2   :  { %2764 = vmatpush2.bf16.msra.mxu0 %v9670_v54  ;;  %v9715_v54 = vld [vmem:[#allocation6 + $0x2a8] ss:$16 sps:$4 sm:$0xff]  }
 0x1e3   :  { %v1770_v58 = vpop.f32.mrf.mxu0  ;;  %2765 = vmatprep.subr.bf16.mxu0 %v9678_v55  ;;  %v9720_v55 = vld [vmem:[#allocation6 + $0x28c] ss:$16 sps:$4 sm:$0xff]  }
 0x1e4   :  { %v1771_v33 = vadd.f32 %v1770_v58, %v1730_v20  ;;  %v9721_v58 = vld [vmem:[#allocation6 + $0x268] ss:$16 sps:$4 sm:$0xff]   ;;  %v8632_v20 = vcombine.high %v3067_v26, %v3075_v27 }
 0x1e5   :  { %v1772_v60 = vpop.f32.mrf.mxu0 }
 0x1e6   :  { %2766 = vmatpush2.bf16.msra.mxu0 %v9676_v57  ;;  %v9723_v57 = vld [vmem:[#allocation6 + $0x26c] ss:$16 sps:$4 sm:$0xff]   ;;  %v9724_v60 = vld [vmem:[#allocation6 + $0x248] ss:$16 sps:$4 sm:$0xff]  }
 0x1e7   :  { %v1773_v15 = vpop.f32.mrf.mxu0  ;;  %2767 = vmatprep.subr.bf16.mxu0 %v9684_v59  ;;  %v9726_v59 = vld [vmem:[#allocation6 + $0x24c] ss:$16 sps:$4 sm:$0xff]  }
 0x1e8   :  { %v9727_v15 = vld [vmem:[#allocation6 + $0x228] ss:$16 sps:$4 sm:$0xff]  }
 0x1ea   :  { %2768 = vmatpush2.bf16.msra.mxu0 %v9682_v61  ;;  %v9729_v61 = vld [vmem:[#allocation6 + $0x22c] ss:$16 sps:$4 sm:$0xff]  }
 0x1eb   :  { %5983 = vmatprep.subr.bf16.mxu0 %v8504_v4  ;;  %v9738_v4 = vld [vmem:[#allocation6 + $0x3cc] ss:$16 sps:$4 sm:$0xff]  }
 0x1ed   :  { %2770 = vmatmul.mubr.bf16.vlgmr.msra.gmra.mxu0 %v10218_v28  ;;  %v1728_v28 = vadd.f32 %v10221_v34, %v375_v18  ;;  %v8424_v34 = vcombine.high %v2859_v31, %v2867_v32  ;;  %v8392_v18 = vcombine.high %v2827_v14, %v2835_v17  ;;  %v3043_v31 = vld [vmem:[#allocation9 + $0x6c0] sm:$0xff]  ;;  %v9747_v32 = vld [vmem:[#allocation6 + $0x36c] ss:$16 sps:$4 sm:$0xff]  }
 0x1ee   :  { %5984 = vmatpush1.bf16.msra.mxu0 %v8503_v3  ;;  %v9733_v3 = vld [vmem:[#allocation6 + $0x3e8] ss:$16 sps:$4 sm:$0xff]  }
 0x1ef   :  { %5985 = vmatprep.subr.bf16.mxu0 %v8488_v5  ;;  %v1769_v21 = vadd.f32 %v1768_v56, %v1728_v28  ;;  %v9718_v56 = vld [vmem:[#allocation6 + $0x288] ss:$16 sps:$4 sm:$0xff]  }
 0x1f0   :  { %v2851_v5 = vld [vmem:[#allocation9 + $0xc0] sm:$0xff] }
 0x1f1   :  { %v8408_v8 = vcombine.high %v2843_v35, %v2851_v5  ;;  %v3051_v28 = vld [vmem:[#allocation9 + $0x700] sm:$0xff] }
 0x1f2   :  { %5986 = vmatpush1.bf16.msra.mxu0 %v8487_v11  ;;  %v8407_v11 = vcombine.low %v2843_v35, %v2851_v5  ;;  %v10244_v35 = vld [vmem:[#allocation9 + $0x3c8] sm:$0xff] }
 0x1f3   :  { %5987 = vmatprep.subr.bf16.mxu0 %v8472_v13  ;;  %v9741_v13 = vld [vmem:[#allocation6 + $0x3ac] ss:$16 sps:$4 sm:$0xff]  }
 0x1f6   :  { %5988 = vmatpush1.bf16.msra.mxu0 %v8471_v23  ;;  %v9739_v23 = vld [vmem:[#allocation6 + $0x3a8] ss:$16 sps:$4 sm:$0xff]  }
 0x1f7   :  { %5989 = vmatprep.subr.bf16.mxu0 %v8456_v25  ;;  %v8391_v25 = vcombine.low %v2827_v14, %v2835_v17  ;;  %v3163_v14 = vld [vmem:[#allocation9 + $0xa80] sm:$0xff] }
 0x1f8   :  { %v3171_v17 = vld [vmem:[#allocation9 + $0xac0] sm:$0xff] }
 0x1fa   :  { %5990 = vmatpush1.bf16.msra.mxu0 %v8455_v19  ;;  %v8631_v19 = vcombine.low %v3067_v26, %v3075_v27 }
 0x1fb   :  { %5991 = vmatprep.subr.bf16.mxu0 %v8440_v22 }
 0x1fe   :  { %5992 = vmatpush1.bf16.msra.mxu0 %v8439_v36  ;;  %v3027_v36 = vld [vmem:[#allocation9 + $0x640] sm:$0xff] }
 0x1ff   :  { %5993 = vmatprep.subr.bf16.mxu0 %v8424_v34 }
 0x201   :  { %v1850_v30 = vpop.f32.mrf.mxu0 }
 0x202   :  { %v1809_v29 = vpop.f32.mrf.mxu1  ;;  %5994 = vmatpush1.bf16.msra.mxu0 %v8423_v44  ;;  %v9751_v44 = vld [vmem:[#allocation6 + $0x328] ss:$16 sps:$4 sm:$0xff]  }
 0x203   :  { %v1810_v7 = vadd.f32 %v1809_v29, %v1769_v21  ;;  %v1852_v51 = vpop.f32.mrf.mxu0  ;;  %5995 = vmatprep.subr.bf16.mxu0 %v8408_v8  ;;  %v3059_v21 = vld [vmem:[#allocation9 + $0x740] sm:$0xff] }
 0x204   :  { %v1811_v1 = vpop.f32.mrf.mxu1  ;;  %v8616_v22 = vcombine.high %v3051_v28, %v3059_v21  ;;  %v9742_v29 = vld [vmem:[#allocation6 + $0x388] ss:$16 sps:$4 sm:$0xff]  }
 0x205   :  { %v1851_v16 = vadd.f32 %v1850_v30, %v1810_v7  ;;  %v1812_v38 = vadd.f32 %v1811_v1, %v1771_v33  ;;  %v1854_v40 = vpop.f32.mrf.mxu0  ;;  %v3035_v30 = vld [vmem:[#allocation9 + $0x680] sm:$0xff]  ;;  %v8615_v33 = vcombine.low %v3051_v28, %v3059_v21 }
 0x206   :  { %v1813_v39 = vpop.f32.mrf.mxu1  ;;  %5996 = vmatpush1.bf16.msra.mxu0 %v8407_v11  ;;  %v8600_v7 = vcombine.high %v3035_v30, %v3043_v31  ;;  %v9745_v1 = vld [vmem:[#allocation6 + $0x368] ss:$16 sps:$4 sm:$0xff]  }
 0x207   :  { %v1853_v37 = vadd.f32 %v1852_v51, %v1812_v38  ;;  %v1859_v41 = vmax.f32 %v1851_v16, 0.0  ;;  %v1855_v43 = vpop.f32.mrf.mxu0  ;;  %5997 = vmatprep.subr.bf16.mxu0 %v8392_v18  ;;  %v3019_v51 = vld [vmem:[#allocation9 + $0x600] sm:$0xff]  ;;  %v9750_v16 = vld [vmem:[#allocation6 + $0x34c] ss:$16 sps:$4 sm:$0xff]   ;;  %v8599_v38 = vcombine.low %v3035_v30, %v3043_v31  ;;  %v8727_v18 = vcombine.low %v3163_v14, %v3171_v17 }
 0x208   :  { %v1814_v42 = vpop.f32.mrf.mxu1  ;;  %v8584_v34 = vcombine.high %v3019_v51, %v3027_v36  ;;  %v9748_v39 = vld [vmem:[#allocation6 + $0x348] ss:$16 sps:$4 sm:$0xff]  }
 0x209   :  { %v1860_v45 = vmax.f32 %v1853_v37, 0.0  ;;  %v10238_v49 = vpack.c.bf16 %v1859_v41, %v1859_v41  ;;  %v3003_v40 = vld [vmem:[#allocation9 + $0x580] sm:$0xff]  ;;  %v9753_v41 = vld [vmem:[#allocation6 + $0x32c] ss:$16 sps:$4 sm:$0xff]   ;;  %v8583_v42 = vcombine.low %v3019_v51, %v3027_v36 }
 0x20a   :  { %5998 = vmatpush1.bf16.msra.mxu0 %v8391_v25  ;;  %v3011_v37 = vld [vmem:[#allocation9 + $0x5c0] sm:$0xff] }
 0x20b   :  { %v1864_v46 = vpack.c.bf16 %v1860_v45, %v1860_v45  ;;  %5999 = vmatprep.subr.bf16.mxu0 %v8632_v20  ;;  %v8568_v43 = vcombine.high %v3003_v40, %v3011_v37  ;;  %v2987_v45 = vld [vmem:[#allocation9 + $0x500] sm:$0xff] }
 0x20c   :  { %v3179_v8 = vld [vmem:[#allocation9 + $0xb00] sm:$0xff] }
 0x20d   :  { %2728 = vmatprep.mubr.bf16.mxu1 %v1864_v46  ;;  %v3155_v25 = vld [vmem:[#allocation9 + $0xa40] sm:$0xff] }
 0x20e   :  { %2729 = vmatmul.mubr.bf16.vlgmr.msra.gmra.mxu1 %v10238_v49  ;;  %6000 = vmatpush2.bf16.msra.mxu0 %v8631_v19  ;;  %v3131_v28 = vld [vmem:[#allocation9 + $0x980] sm:$0xff] }
 0x20f   :  { %2779 = vmatpush1.bf16.msra.mxu1 %v9709_v48  ;;  %2810 = vmatprep.mubr.bf16.mxu1 %v1864_v46  ;;  %v2995_v46 = vld [vmem:[#allocation9 + $0x540] sm:$0xff]  ;;  %v9756_v48 = vld [vmem:[#allocation6 + $0x30c] ss:$16 sps:$4 sm:$0xff]  }
 0x210   :  { %2780 = vmatprep.subr.bf16.mxu1 %v9714_v50  ;;  %6001 = vmatprep.subr.bf16.mxu0 %v8616_v22  ;;  %v8567_v50 = vcombine.low %v3003_v40, %v3011_v37  ;;  %v3139_v19 = vld [vmem:[#allocation9 + $0x9c0] sm:$0xff] }
 0x211   :  { %v8695_v20 = vcombine.low %v3131_v28, %v3139_v19  ;;  %v8696_v21 = vcombine.high %v3131_v28, %v3139_v19  ;;  %v3115_v22 = vld [vmem:[#allocation9 + $0x900] sm:$0xff] }
 0x212   :  { %6002 = vmatpush2.bf16.msra.mxu0 %v8615_v33  ;;  %v3107_v33 = vld [vmem:[#allocation9 + $0x8c0] sm:$0xff] }
 0x213   :  { %2781 = vmatpush1.bf16.msra.mxu1 %v9712_v52  ;;  %6003 = vmatprep.subr.bf16.mxu0 %v8600_v7  ;;  %v8552_v52 = vcombine.high %v2987_v45, %v2995_v46 }
 0x214   :  { %2782 = vmatprep.subr.bf16.mxu1 %v9717_v53  ;;  %v9754_v53 = vld [vmem:[#allocation6 + $0x308] ss:$16 sps:$4 sm:$0xff]  }
 0x216   :  { %6004 = vmatpush2.bf16.msra.mxu0 %v8599_v38  ;;  %v3091_v38 = vld [vmem:[#allocation9 + $0x840] sm:$0xff] }
 0x217   :  { %2783 = vmatpush1.bf16.msra.mxu1 %v9715_v54  ;;  %6005 = vmatprep.subr.bf16.mxu0 %v8584_v34  ;;  %v8551_v54 = vcombine.low %v2987_v45, %v2995_v46  ;;  %v3307_v45 = vld [vmem:[#allocation9 + $0xf00] sm:$0xff] }
 0x218   :  { %2784 = vmatprep.subr.bf16.mxu1 %v9720_v55  ;;  %v2971_v55 = vld [vmem:[#allocation9 + $0x480] sm:$0xff] }
 0x219   :  { %v3315_v46 = vld [vmem:[#allocation9 + $0xf40] sm:$0xff] }
 0x21a   :  { %6006 = vmatpush2.bf16.msra.mxu0 %v8583_v42  ;;  %v3331_v42 = vld [vmem:[#allocation9 + $0xfc0] sm:$0xff] }
 0x21b   :  { %2785 = vmatpush1.bf16.msra.mxu1 %v9718_v56  ;;  %6007 = vmatprep.subr.bf16.mxu0 %v8568_v43  ;;  %v2979_v56 = vld [vmem:[#allocation9 + $0x4c0] sm:$0xff] }
 0x21c   :  { %2786 = vmatprep.subr.bf16.mxu1 %v9723_v57  ;;  %v8536_v57 = vcombine.high %v2971_v55, %v2979_v56 }
 0x21e   :  { %6008 = vmatpush2.bf16.msra.mxu0 %v8567_v50  ;;  %v8872_v50 = vcombine.high %v3307_v45, %v3315_v46 }
 0x21f   :  { %2787 = vmatpush1.bf16.msra.mxu1 %v9721_v58  ;;  %6009 = vmatprep.subr.bf16.mxu0 %v8552_v52  ;;  %v8535_v58 = vcombine.low %v2971_v55, %v2979_v56  ;;  %v3291_v52 = vld [vmem:[#allocation9 + $0xe80] sm:$0xff] }
 0x220   :  { %2788 = vmatprep.subr.bf16.mxu1 %v9726_v59  ;;  %v2955_v59 = vld [vmem:[#allocation9 + $0x400] sm:$0xff] }
 0x221   :  { %v3275_v56 = vld [vmem:[#allocation9 + $0xe00] sm:$0xff] }
 0x222   :  { %6010 = vmatpush2.bf16.msra.mxu0 %v8551_v54 }
 0x223   :  { %2789 = vmatpush1.bf16.msra.mxu1 %v9724_v60  ;;  %6011 = vmatprep.subr.bf16.mxu0 %v8536_v57  ;;  %v2963_v60 = vld [vmem:[#allocation9 + $0x440] sm:$0xff] }
 0x224   :  { %2790 = vmatprep.subr.bf16.mxu1 %v9729_v61  ;;  %v8520_v61 = vcombine.high %v2955_v59, %v2963_v60  ;;  %v3283_v57 = vld [vmem:[#allocation9 + $0xe40] sm:$0xff] }
 0x226   :  { %6012 = vmatpush2.bf16.msra.mxu0 %v8535_v58  ;;  %v8839_v58 = vcombine.low %v3275_v56, %v3283_v57 }
 0x227   :  { %2791 = vmatpush1.bf16.msra.mxu1 %v9727_v15  ;;  %v8519_v15 = vcombine.low %v2955_v59, %v2963_v60  ;;  %6013 = vmatprep.subr.bf16.mxu0 %v8520_v61  ;;  %v8840_v59 = vcombine.high %v3275_v56, %v3283_v57  ;;  %v3259_v60 = vld [vmem:[#allocation9 + $0xd80] sm:$0xff] }
 0x228   :  { %2792 = vmatprep.subr.bf16.mxu1 %v9732_v62  ;;  %v3195_v62 = vld [vmem:[#allocation9 + $0xb80] sm:$0xff] }
 0x229   :  { %v3267_v61 = vld [vmem:[#allocation9 + $0xdc0] sm:$0xff] }
 0x22a   :  { %6014 = vmatpush2.bf16.msra.mxu0 %v8519_v15  ;;  %v8823_v15 = vcombine.low %v3259_v60, %v3267_v61 }
 0x22b   :  { %2793 = vmatpush1.bf16.msra.mxu1 %v9730_v47  ;;  %v3203_v47 = vld [vmem:[#allocation9 + $0xbc0] sm:$0xff] }
 0x22c   :  { %2794 = vmatprep.subr.bf16.mxu1 %v9735_v6  ;;  %v8759_v6 = vcombine.low %v3195_v62, %v3203_v47 }
 0x22f   :  { %2795 = vmatpush2.bf16.msra.mxu1 %v9733_v3  ;;  %v8760_v3 = vcombine.high %v3195_v62, %v3203_v47  ;;  %v8824_v62 = vcombine.high %v3259_v60, %v3267_v61  ;;  %v3243_v47 = vld [vmem:[#allocation9 + $0xd00] sm:$0xff]  ;;  %v2852_v60 = vld [vmem:[#allocation9 + $0xc8] sm:$0xff] }
 0x230   :  { %2796 = vmatprep.subr.bf16.mxu1 %v9738_v4  ;;  %v10242_v4 = vld [vmem:[#allocation9 + $0x388] sm:$0xff] }
 0x231   :  { %v8505_v5 = vcombine.low %v10242_v4, %v10244_v35 }
 0x233   :  { %2797 = vmatpush2.bf16.msra.mxu1 %v9736_v9  ;;  %v3187_v9 = vld [vmem:[#allocation9 + $0xb40] sm:$0xff] }
 0x234   :  { %2798 = vmatprep.subr.bf16.mxu1 %v9741_v13  ;;  %v8743_v11 = vcombine.low %v3179_v8, %v3187_v9  ;;  %v8744_v13 = vcombine.high %v3179_v8, %v3187_v9  ;;  %v3227_v8 = vld [vmem:[#allocation9 + $0xc80] sm:$0xff] }
 0x235   :  { %v3235_v9 = vld [vmem:[#allocation9 + $0xcc0] sm:$0xff] }
 0x237   :  { %2799 = vmatpush2.bf16.msra.mxu1 %v9739_v23  ;;  %v8728_v23 = vcombine.high %v3163_v14, %v3171_v17  ;;  %v3211_v14 = vld [vmem:[#allocation9 + $0xc00] sm:$0xff] }
 0x238   :  { %2800 = vmatprep.subr.bf16.mxu1 %v9744_v24  ;;  %v3147_v24 = vld [vmem:[#allocation9 + $0xa00] sm:$0xff] }
 0x239   :  { %v8711_v26 = vcombine.low %v3147_v24, %v3155_v25  ;;  %v8712_v27 = vcombine.high %v3147_v24, %v3155_v25  ;;  %v3219_v17 = vld [vmem:[#allocation9 + $0xc40] sm:$0xff]  ;;  %v10254_v24 = vld [vmem:[#allocation9 + $0xb88] sm:$0xff] }
 0x23a   :  { %v10256_v25 = vld [vmem:[#allocation9 + $0xbc8] sm:$0xff] }
 0x23b   :  { %2801 = vmatpush2.bf16.msra.mxu1 %v9742_v29  ;;  %v3123_v29 = vld [vmem:[#allocation9 + $0x940] sm:$0xff] }
 0x23c   :  { %2802 = vmatprep.subr.bf16.mxu1 %v9747_v32  ;;  %v8679_v30 = vcombine.low %v3115_v22, %v3123_v29  ;;  %v8680_v31 = vcombine.high %v3115_v22, %v3123_v29  ;;  %v3099_v32 = vld [vmem:[#allocation9 + $0x880] sm:$0xff]  ;;  %v10266_v22 = vld [vmem:[#allocation7] sm:$0xf] }
 0x23d   :  { %v8663_v7 = vcombine.low %v3099_v32, %v3107_v33  ;;  %v1998_v29 = vrot.slane %v10266_v22, %v10203_v0 }
 0x23f   :  { %2803 = vmatpush2.bf16.msra.mxu1 %v9745_v1  ;;  %v8664_v1 = vcombine.high %v3099_v32, %v3107_v33 }
 0x240   :  { %2804 = vmatprep.subr.bf16.mxu1 %v9750_v16  ;;  %v3083_v16 = vld [vmem:[#allocation9 + $0x800] sm:$0xff] }
 0x241   :  { %v8647_v34 = vcombine.low %v3083_v16, %v3091_v38 }
 0x243   :  { %2805 = vmatpush2.bf16.msra.mxu1 %v9748_v39  ;;  %v8648_v39 = vcombine.high %v3083_v16, %v3091_v38 }
 0x244   :  { %2806 = vmatprep.subr.bf16.mxu1 %v9753_v41  ;;  %v3323_v41 = vld [vmem:[#allocation9 + $0xf80] sm:$0xff] }
 0x245   :  { %v8887_v43 = vcombine.low %v3323_v41, %v3331_v42 }
 0x247   :  { %2807 = vmatpush2.bf16.msra.mxu1 %v9751_v44  ;;  %v8888_v44 = vcombine.high %v3323_v41, %v3331_v42 }
 0x248   :  { %2808 = vmatprep.subr.bf16.mxu1 %v9756_v48  ;;  %v8871_v48 = vcombine.low %v3307_v45, %v3315_v46  ;;  %v2916_v45 = vld [vmem:[#allocation9 + $0x2c8] sm:$0xff] }
 0x24b   :  { %2809 = vmatpush2.bf16.msra.mxu1 %v9754_v53  ;;  %v3299_v53 = vld [vmem:[#allocation9 + $0xec0] sm:$0xff] }
 0x24c   :  { %6024 = vmatprep.subr.bf16.mxu1 %v8760_v3  ;;  %v8855_v54 = vcombine.low %v3291_v52, %v3299_v53  ;;  %v8856_v55 = vcombine.high %v3291_v52, %v3299_v53 }
 0x24e   :  { %2811 = vmatmul.mubr.bf16.vlgmr.msra.gmra.mxu1 %v10238_v49  ;;  %v8506_v49 = vcombine.high %v10242_v4, %v10244_v35  ;;  %v2868_v4 = vld [vmem:[#allocation9 + $0x148] sm:$0xff] }
 0x24f   :  { %6025 = vmatpush1.bf16.msra.mxu1 %v8759_v6  ;;  %v3251_v6 = vld [vmem:[#allocation9 + $0xd40] sm:$0xff] }
 0x250   :  { %6065 = vmatprep.subr.bf16.mxu0 %v8506_v49  ;;  %6026 = vmatprep.subr.bf16.mxu1 %v8744_v13  ;;  %v8807_v3 = vcombine.low %v3243_v47, %v3251_v6  ;;  %v8808_v49 = vcombine.high %v3243_v47, %v3251_v6  ;;  %v8791_v13 = vcombine.low %v3227_v8, %v3235_v9  ;;  %v2836_v47 = vld [vmem:[#allocation9 + $0x48] sm:$0xff] }
 0x253   :  { %6027 = vmatpush1.bf16.msra.mxu1 %v8743_v11  ;;  %v8792_v11 = vcombine.high %v3227_v8, %v3235_v9  ;;  %v3076_v8 = vld [vmem:[#allocation9 + $0x7c8] sm:$0xff] }
 0x254   :  { %6028 = vmatprep.subr.bf16.mxu1 %v8728_v23  ;;  %v8775_v23 = vcombine.low %v3211_v14, %v3219_v17 }
 0x257   :  { %6029 = vmatpush1.bf16.msra.mxu1 %v8727_v18  ;;  %v8776_v18 = vcombine.high %v3211_v14, %v3219_v17  ;;  %v3060_v14 = vld [vmem:[#allocation9 + $0x748] sm:$0xff] }
 0x258   :  { %6030 = vmatprep.subr.bf16.mxu1 %v8712_v27  ;;  %v8761_v27 = vcombine.low %v10254_v24, %v10256_v25 }
 0x25b   :  { %6031 = vmatpush1.bf16.msra.mxu1 %v8711_v26  ;;  %v8762_v26 = vcombine.high %v10254_v24, %v10256_v25 }
 0x25c   :  { %6032 = vmatprep.subr.bf16.mxu1 %v8696_v21 }
 0x25f   :  { %6033 = vmatpush1.bf16.msra.mxu1 %v8695_v20 }
 0x260   :  { %6034 = vmatprep.subr.bf16.mxu1 %v8680_v31 }
 0x263   :  { %6035 = vmatpush1.bf16.msra.mxu1 %v8679_v30  ;;  %v2002_v30 = vrot.slane %v10266_v22, %v10208_v2 }
 0x264   :  { %6036 = vmatprep.subr.bf16.mxu1 %v8664_v1 }
 0x267   :  { %6037 = vmatpush1.bf16.msra.mxu1 %v8663_v7 }
 0x268   :  { %6038 = vmatprep.subr.bf16.mxu1 %v8648_v39 }
 0x26b   :  { %6039 = vmatpush1.bf16.msra.mxu1 %v8647_v34 }
 0x26c   :  { %6040 = vmatprep.subr.bf16.mxu1 %v8888_v44 }
 0x26d   :  { %v10250_v51 = vpop.f32.mrf.mxu0 }
 0x26e   :  { %v2690_v31 = vadd.f32 %v10250_v51, %v1998_v29  ;;  %v2908_v51 = vld [vmem:[#allocation9 + $0x288] sm:$0xff] }
 0x26f   :  { %v10252_v36 = vpop.f32.mrf.mxu0  ;;  %6041 = vmatpush2.bf16.msra.mxu1 %v8887_v43  ;;  %v8474_v46 = vcombine.high %v2908_v51, %v2916_v45  ;;  %v8473_v52 = vcombine.low %v2908_v51, %v2916_v45  ;;  %v3020_v29 = vld [vmem:[#allocation9 + $0x608] sm:$0xff] }
 0x270   :  { %6042 = vmatprep.subr.bf16.mxu1 %v8872_v50  ;;  %v2692_v33 = vadd.f32 %v10252_v36, %v2002_v30  ;;  %v2900_v50 = vld [vmem:[#allocation9 + $0x248] sm:$0xff] }
 0x271   :  { %v2693_v40 = vpop.f32.mrf.mxu0  ;;  %v3028_v30 = vld [vmem:[#allocation9 + $0x648] sm:$0xff] }
 0x272   :  { %v2924_v40 = vld [vmem:[#allocation9 + $0x308] sm:$0xff] }
 0x273   :  { %v2694_v37 = vpop.f32.mrf.mxu0  ;;  %6043 = vmatpush2.bf16.msra.mxu1 %v8871_v48  ;;  %v2892_v48 = vld [vmem:[#allocation9 + $0x208] sm:$0xff] }
 0x274   :  { %6044 = vmatprep.subr.bf16.mxu1 %v8856_v55  ;;  %v2932_v37 = vld [vmem:[#allocation9 + $0x348] sm:$0xff]  ;;  %v8458_v53 = vcombine.high %v2892_v48, %v2900_v50  ;;  %v8457_v56 = vcombine.low %v2892_v48, %v2900_v50 }
 0x275   :  { %v8490_v44 = vcombine.high %v2924_v40, %v2932_v37  ;;  %v8489_v36 = vcombine.low %v2924_v40, %v2932_v37  ;;  %v2884_v55 = vld [vmem:[#allocation9 + $0x1c8] sm:$0xff] }
 0x276   :  { %v2972_v37 = vld [vmem:[#allocation9 + $0x488] sm:$0xff] }
 0x277   :  { %6045 = vmatpush2.bf16.msra.mxu1 %v8855_v54  ;;  %v2876_v54 = vld [vmem:[#allocation9 + $0x188] sm:$0xff] }
 0x278   :  { %6046 = vmatprep.subr.bf16.mxu1 %v8840_v59  ;;  %v8442_v57 = vcombine.high %v2876_v54, %v2884_v55  ;;  %v8441_v35 = vcombine.low %v2876_v54, %v2884_v55  ;;  %v2844_v59 = vld [vmem:[#allocation9 + $0x88] sm:$0xff] }
 0x279   :  { %v8409_v6 = vcombine.low %v2844_v59, %v2852_v60  ;;  %v2964_v48 = vld [vmem:[#allocation9 + $0x448] sm:$0xff] }
 0x27b   :  { %6047 = vmatpush2.bf16.msra.mxu1 %v8839_v58  ;;  %v2860_v58 = vld [vmem:[#allocation9 + $0x108] sm:$0xff] }
 0x27c   :  { %6048 = vmatprep.subr.bf16.mxu1 %v8824_v62  ;;  %v8425_v61 = vcombine.low %v2860_v58, %v2868_v4  ;;  %v2828_v62 = vld [vmem:[#allocation9 + $0x8] sm:$0xff] }
 0x27d   :  { %v8393_v9 = vcombine.low %v2828_v62, %v2836_v47 }
 0x27f   :  { %6049 = vmatpush2.bf16.msra.mxu1 %v8823_v15  ;;  %v8410_v15 = vcombine.high %v2844_v59, %v2852_v60 }
 0x280   :  { %6050 = vmatprep.subr.bf16.mxu1 %v8808_v49  ;;  %v3068_v49 = vld [vmem:[#allocation9 + $0x788] sm:$0xff] }
 0x281   :  { %v8633_v17 = vcombine.low %v3068_v49, %v3076_v8 }
 0x283   :  { %6051 = vmatpush2.bf16.msra.mxu1 %v8807_v3  ;;  %v8394_v3 = vcombine.high %v2828_v62, %v2836_v47  ;;  %v3188_v62 = vld [vmem:[#allocation9 + $0xb48] sm:$0xff]  ;;  %v2925_v47 = vld [vmem:[#allocation9 + $0x310] sm:$0xff] }
 0x284   :  { %6052 = vmatprep.subr.bf16.mxu1 %v8792_v11  ;;  %v8634_v11 = vcombine.high %v3068_v49, %v3076_v8 }
 0x287   :  { %6053 = vmatpush2.bf16.msra.mxu1 %v8791_v13  ;;  %v3052_v13 = vld [vmem:[#allocation9 + $0x708] sm:$0xff] }
 0x288   :  { %6054 = vmatprep.subr.bf16.mxu1 %v8776_v18  ;;  %v8618_v18 = vcombine.high %v3052_v13, %v3060_v14 }
 0x28b   :  { %6055 = vmatpush2.bf16.msra.mxu1 %v8775_v23  ;;  %v3036_v23 = vld [vmem:[#allocation9 + $0x688] sm:$0xff] }
 0x28c   :  { %6106 = vmatprep.subr.bf16.mxu1 %v8762_v26  ;;  %v3044_v26 = vld [vmem:[#allocation9 + $0x6c8] sm:$0xff] }
 0x2ad   :  { %v10262_v28 = vpop.f32.mrf.mxu0 }
 0x2af   :  { %v10264_v19 = vpop.f32.mrf.mxu0 }
 0x2b1   :  { %v2775_v20 = vpop.f32.mrf.mxu0 }
 0x2b2   :  { %v8617_v20 = vcombine.low %v3052_v13, %v3060_v14  ;;  %v3172_v13 = vld [vmem:[#allocation9 + $0xac8] sm:$0xff]  ;;  %v2909_v14 = vld [vmem:[#allocation9 + $0x290] sm:$0xff] }
 0x2b3   :  { %v2776_v21 = vpop.f32.mrf.mxu0 }
 0x2b4   :  { %v8602_v21 = vcombine.high %v3036_v23, %v3044_v26 }
 0x2ce   :  { %v2730_v32 = vpop.f32.mrf.mxu1 }
 0x2cf   :  { %v2731_v7 = vadd.f32 %v2730_v32, %v2690_v31  ;;  %v8601_v31 = vcombine.low %v3036_v23, %v3044_v26  ;;  %v8586_v32 = vcombine.high %v3020_v29, %v3028_v30 }
 0x2d0   :  { %v2732_v1 = vpop.f32.mrf.mxu1 }
 0x2d1   :  { %v2733_v16 = vadd.f32 %v2732_v1, %v2692_v33  ;;  %v2819_v38 = vmax.f32 %v2731_v7, 0.0  ;;  %v3004_v33 = vld [vmem:[#allocation9 + $0x588] sm:$0xff]  ;;  %v8585_v1 = vcombine.low %v3020_v29, %v3028_v30  ;;  %v2893_v30 = vld [vmem:[#allocation9 + $0x210] sm:$0xff] }
 0x2d2   :  { %v2734_v34 = vpop.f32.mrf.mxu1  ;;  %v3012_v7 = vld [vmem:[#allocation9 + $0x5c8] sm:$0xff] }
 0x2d3   :  { %v2820_v39 = vmax.f32 %v2733_v16, 0.0  ;;  %v10276_v43 = vpack.c.bf16 %v2819_v38, %v2819_v38  ;;  %v8570_v16 = vcombine.high %v3004_v33, %v3012_v7  ;;  %v2988_v38 = vld [vmem:[#allocation9 + $0x508] sm:$0xff] }
 0x2d4   :  { %v2735_v41 = vpop.f32.mrf.mxu1  ;;  %v2996_v34 = vld [vmem:[#allocation9 + $0x548] sm:$0xff] }
 0x2d5   :  { %v10274_v42 = vpack.c.bf16 %v2820_v39, %v2820_v39  ;;  %v8569_v39 = vcombine.low %v3004_v33, %v3012_v7  ;;  %v8554_v40 = vcombine.high %v2988_v38, %v2996_v34  ;;  %v2980_v41 = vld [vmem:[#allocation9 + $0x4c8] sm:$0xff]  ;;  %v8553_v51 = vcombine.low %v2988_v38, %v2996_v34 }
 0x2d6   :  { %v8538_v45 = vcombine.high %v2972_v37, %v2980_v41  ;;  %v3156_v29 = vld [vmem:[#allocation9 + $0xa48] sm:$0xff] }
 0x2d7   :  { %6015 = vmatprep.mubr.bf16.mxu0 %v10274_v42  ;;  %v3132_v33 = vld [vmem:[#allocation9 + $0x988] sm:$0xff] }
 0x2d8   :  { %6016 = vmatmul.mubr.bf16.vlgmr.msra.gmra.mxu0 %v10276_v43  ;;  %v3140_v7 = vld [vmem:[#allocation9 + $0x9c8] sm:$0xff] }
 0x2d9   :  { %6066 = vmatpush1.bf16.msra.mxu0 %v8505_v5  ;;  %6097 = vmatprep.mubr.bf16.mxu0 %v10274_v42  ;;  %v8426_v5 = vcombine.high %v2860_v58, %v2868_v4  ;;  %v2949_v58 = vld [vmem:[#allocation9 + $0x3d0] sm:$0xff] }
 0x2da   :  { %6067 = vmatprep.subr.bf16.mxu0 %v8490_v44  ;;  %v2006_v44 = vrot.slane %v10266_v22, %v10227_v10 }
 0x2dc   :  { %v2772_v50 = vadd.f32 %v10262_v28, %v2006_v44  ;;  %v3180_v28 = vld [vmem:[#allocation9 + $0xb08] sm:$0xff]  ;;  %v2861_v44 = vld [vmem:[#allocation9 + $0x110] sm:$0xff] }
 0x2dd   :  { %6068 = vmatpush1.bf16.msra.mxu0 %v8489_v36  ;;  %v2010_v36 = vrot.slane %v10266_v22, %v10230_v12  ;;  %v8746_v8 = vcombine.high %v3180_v28, %v3188_v62 }
 0x2de   :  { %6069 = vmatprep.subr.bf16.mxu0 %v8474_v46  ;;  %v2956_v46 = vld [vmem:[#allocation9 + $0x408] sm:$0xff] }
 0x2df   :  { %v8522_v54 = vcombine.high %v2956_v46, %v2964_v48  ;;  %v2774_v55 = vadd.f32 %v10264_v19, %v2010_v36 }
 0x2e1   :  { %6070 = vmatpush1.bf16.msra.mxu0 %v8473_v52  ;;  %v8537_v52 = vcombine.low %v2972_v37, %v2980_v41  ;;  %v3116_v37 = vld [vmem:[#allocation9 + $0x908] sm:$0xff] }
 0x2e2   :  { %6071 = vmatprep.subr.bf16.mxu0 %v8458_v53  ;;  %v3124_v41 = vld [vmem:[#allocation9 + $0x948] sm:$0xff] }
 0x2e5   :  { %6072 = vmatpush1.bf16.msra.mxu0 %v8457_v56 }
 0x2e6   :  { %6073 = vmatprep.subr.bf16.mxu0 %v8442_v57  ;;  %v2941_v57 = vld [vmem:[#allocation9 + $0x390] sm:$0xff] }
 0x2e7   :  { %v8508_v60 = vcombine.high %v2941_v57, %v2949_v58  ;;  %v8507_v49 = vcombine.low %v2941_v57, %v2949_v58 }
 0x2e9   :  { %6074 = vmatpush1.bf16.msra.mxu0 %v8441_v35 }
 0x2ea   :  { %6075 = vmatprep.subr.bf16.mxu0 %v8426_v5  ;;  %v8521_v5 = vcombine.low %v2956_v46, %v2964_v48  ;;  %v8682_v46 = vcombine.high %v3116_v37, %v3124_v41 }
 0x2ed   :  { %6076 = vmatpush1.bf16.msra.mxu0 %v8425_v61 }
 0x2ee   :  { %6077 = vmatprep.subr.bf16.mxu0 %v8410_v15 }
 0x2f1   :  { %6078 = vmatpush1.bf16.msra.mxu0 %v8409_v6  ;;  %v2933_v6 = vld [vmem:[#allocation9 + $0x350] sm:$0xff] }
 0x2f2   :  { %6079 = vmatprep.subr.bf16.mxu0 %v8394_v3  ;;  %v8491_v23 = vcombine.low %v2925_v47, %v2933_v6 }
 0x2f5   :  { %6080 = vmatpush1.bf16.msra.mxu0 %v8393_v9  ;;  %v8492_v9 = vcombine.high %v2925_v47, %v2933_v6  ;;  %v3069_v47 = vld [vmem:[#allocation9 + $0x790] sm:$0xff] }
 0x2f6   :  { %6081 = vmatprep.subr.bf16.mxu0 %v8634_v11  ;;  %v3164_v11 = vld [vmem:[#allocation9 + $0xa88] sm:$0xff]  ;;  %v3077_v6 = vld [vmem:[#allocation9 + $0x7d0] sm:$0xff] }
 0x2f7   :  { %v8730_v26 = vcombine.high %v3164_v11, %v3172_v13 }
 0x2f9   :  { %6082 = vmatpush2.bf16.msra.mxu0 %v8633_v17  ;;  %v2917_v17 = vld [vmem:[#allocation9 + $0x2d0] sm:$0xff] }
 0x2fa   :  { %6083 = vmatprep.subr.bf16.mxu0 %v8618_v18  ;;  %v8745_v18 = vcombine.low %v3180_v28, %v3188_v62  ;;  %v8475_v24 = vcombine.low %v2909_v14, %v2917_v17  ;;  %v3332_v62 = vld [vmem:[#allocation9 + $0xfc8] sm:$0xff] }
 0x2fd   :  { %6084 = vmatpush2.bf16.msra.mxu0 %v8617_v20  ;;  %v8476_v20 = vcombine.high %v2909_v14, %v2917_v17  ;;  %v3316_v14 = vld [vmem:[#allocation9 + $0xf48] sm:$0xff]  ;;  %v3053_v17 = vld [vmem:[#allocation9 + $0x710] sm:$0xff] }
 0x2fe   :  { %6085 = vmatprep.subr.bf16.mxu0 %v8602_v21  ;;  %v3148_v21 = vld [vmem:[#allocation9 + $0xa08] sm:$0xff] }
 0x2ff   :  { %v8714_v25 = vcombine.high %v3148_v21, %v3156_v29  ;;  %v8713_v38 = vcombine.low %v3148_v21, %v3156_v29  ;;  %v3292_v29 = vld [vmem:[#allocation9 + $0xe88] sm:$0xff] }
 0x301   :  { %6086 = vmatpush2.bf16.msra.mxu0 %v8601_v31  ;;  %v2901_v31 = vld [vmem:[#allocation9 + $0x250] sm:$0xff] }
 0x302   :  { %6087 = vmatprep.subr.bf16.mxu0 %v8586_v32  ;;  %v8729_v32 = vcombine.low %v3164_v11, %v3172_v13  ;;  %v8459_v34 = vcombine.low %v2893_v30, %v2901_v31  ;;  %v8636_v11 = vcombine.high %v3069_v47, %v3077_v6  ;;  %v3308_v13 = vld [vmem:[#allocation9 + $0xf08] sm:$0xff] }
 0x305   :  { %6088 = vmatpush2.bf16.msra.mxu0 %v8585_v1  ;;  %v2877_v1 = vld [vmem:[#allocation9 + $0x190] sm:$0xff] }
 0x306   :  { %6089 = vmatprep.subr.bf16.mxu0 %v8570_v16  ;;  %v2885_v16 = vld [vmem:[#allocation9 + $0x1d0] sm:$0xff] }
 0x307   :  { %v8443_v36 = vcombine.low %v2877_v1, %v2885_v16 }
 0x309   :  { %6090 = vmatpush2.bf16.msra.mxu0 %v8569_v39  ;;  %v8698_v39 = vcombine.high %v3132_v33, %v3140_v7 }
 0x30a   :  { %6091 = vmatprep.subr.bf16.mxu0 %v8554_v40  ;;  %v8444_v40 = vcombine.high %v2877_v1, %v2885_v16  ;;  %v3284_v1 = vld [vmem:[#allocation9 + $0xe48] sm:$0xff]  ;;  %v3021_v16 = vld [vmem:[#allocation9 + $0x610] sm:$0xff] }
 0x30d   :  { %6092 = vmatpush2.bf16.msra.mxu0 %v8553_v51  ;;  %v2869_v51 = vld [vmem:[#allocation9 + $0x150] sm:$0xff] }
 0x30e   :  { %v2812_v53 = vpop.f32.mrf.mxu1  ;;  %6093 = vmatprep.subr.bf16.mxu0 %v8538_v45  ;;  %v8697_v45 = vcombine.low %v3132_v33, %v3140_v7  ;;  %v8428_v48 = vcombine.high %v2861_v44, %v2869_v51  ;;  %v3276_v7 = vld [vmem:[#allocation9 + $0xe08] sm:$0xff] }
 0x30f   :  { %v2813_v56 = vadd.f32 %v2812_v53, %v2772_v50  ;;  %v3100_v50 = vld [vmem:[#allocation9 + $0x888] sm:$0xff]  ;;  %v2845_v53 = vld [vmem:[#allocation9 + $0x90] sm:$0xff] }
 0x310   :  { %v2814_v4 = vpop.f32.mrf.mxu1 }
 0x311   :  { %v2815_v35 = vadd.f32 %v2814_v4, %v2774_v55  ;;  %6094 = vmatpush2.bf16.msra.mxu0 %v8537_v52  ;;  %v2821_v59 = vmax.f32 %v2813_v56, 0.0  ;;  %v3108_v52 = vld [vmem:[#allocation9 + $0x8c8] sm:$0xff]  ;;  %v8681_v55 = vcombine.low %v3116_v37, %v3124_v41  ;;  %v8427_v56 = vcombine.low %v2861_v44, %v2869_v51  ;;  %v3005_v51 = vld [vmem:[#allocation9 + $0x590] sm:$0xff] }
 0x312   :  { %v2816_v22 = vpop.f32.mrf.mxu1  ;;  %6095 = vmatprep.subr.bf16.mxu0 %v8522_v54  ;;  %v2853_v54 = vld [vmem:[#allocation9 + $0xd0] sm:$0xff]  ;;  %v8666_v57 = vcombine.high %v3100_v50, %v3108_v52  ;;  %v3084_v4 = vld [vmem:[#allocation9 + $0x808] sm:$0xff] }
 0x313   :  { %v2822_v61 = vmax.f32 %v2815_v35, 0.0  ;;  %v10292_v19 = vpack.c.bf16 %v2821_v59, %v2821_v59  ;;  %v8412_v58 = vcombine.high %v2845_v53, %v2853_v54  ;;  %v3092_v35 = vld [vmem:[#allocation9 + $0x848] sm:$0xff]  ;;  %v2837_v59 = vld [vmem:[#allocation9 + $0x50] sm:$0xff]  ;;  %v8665_v22 = vcombine.low %v3100_v50, %v3108_v52 }
 0x314   :  { %v2817_v15 = vpop.f32.mrf.mxu1  ;;  %v3260_v41 = vld [vmem:[#allocation9 + $0xd88] sm:$0xff] }
 0x315   :  { %v10290_v3 = vpack.c.bf16 %v2822_v61, %v2822_v61  ;;  %6096 = vmatpush2.bf16.msra.mxu0 %v8521_v5  ;;  %v2829_v5 = vld [vmem:[#allocation9 + $0x10] sm:$0xff]  ;;  %v8650_v61 = vcombine.high %v3084_v4, %v3092_v35  ;;  %v3324_v15 = vld [vmem:[#allocation9 + $0xf88] sm:$0xff] }
 0x316   :  { %6147 = vmatprep.subr.bf16.mxu0 %v8508_v60  ;;  %v8411_v60 = vcombine.low %v2845_v53, %v2853_v54  ;;  %v8396_v28 = vcombine.high %v2829_v5, %v2837_v59  ;;  %v3268_v44 = vld [vmem:[#allocation9 + $0xdc8] sm:$0xff]  ;;  %v2989_v54 = vld [vmem:[#allocation9 + $0x510] sm:$0xff] }
 0x317   :  { %6056 = vmatprep.mubr.bf16.mxu1 %v10290_v3  ;;  %v3244_v52 = vld [vmem:[#allocation9 + $0xd08] sm:$0xff] }
 0x318   :  { %6057 = vmatmul.mubr.bf16.vlgmr.msra.gmra.mxu1 %v10292_v19  ;;  %6098 = vmatmul.mubr.bf16.vlgmr.msra.gmra.mxu0 %v10276_v43  ;;  %v3252_v53 = vld [vmem:[#allocation9 + $0xd48] sm:$0xff] }
 0x319   :  { %6107 = vmatpush1.bf16.msra.mxu1 %v8761_v27  ;;  %6138 = vmatprep.mubr.bf16.mxu1 %v10290_v3  ;;  %v8460_v27 = vcombine.high %v2893_v30, %v2901_v31  ;;  %v3300_v30 = vld [vmem:[#allocation9 + $0xec8] sm:$0xff]  ;;  %v3037_v31 = vld [vmem:[#allocation9 + $0x690] sm:$0xff] }
 0x31a   :  { %6148 = vmatpush1.bf16.msra.mxu0 %v8507_v49  ;;  %6179 = vmatprep.mubr.bf16.mxu0 %v10274_v42  ;;  %v8649_v49 = vcombine.low %v3084_v4, %v3092_v35  ;;  %v3228_v35 = vld [vmem:[#allocation9 + $0xc88] sm:$0xff] }
 0x31b   :  { %6108 = vmatprep.subr.bf16.mxu1 %v8746_v8  ;;  %6149 = vmatprep.subr.bf16.mxu0 %v8492_v9  ;;  %v8395_v8 = vcombine.low %v2829_v5, %v2837_v59  ;;  %v8890_v9 = vcombine.high %v3324_v15, %v3332_v62  ;;  %v3236_v5 = vld [vmem:[#allocation9 + $0xcc8] sm:$0xff]  ;;  %v2973_v59 = vld [vmem:[#allocation9 + $0x490] sm:$0xff] }
 0x31d   :  { %6109 = vmatpush1.bf16.msra.mxu1 %v8745_v18  ;;  %v3061_v18 = vld [vmem:[#allocation9 + $0x750] sm:$0xff] }
 0x31e   :  { %6150 = vmatpush1.bf16.msra.mxu0 %v8491_v23  ;;  %6110 = vmatprep.subr.bf16.mxu1 %v8730_v26  ;;  %v8889_v23 = vcombine.low %v3324_v15, %v3332_v62  ;;  %v8635_v26 = vcombine.low %v3069_v47, %v3077_v6  ;;  %v8620_v21 = vcombine.high %v3053_v17, %v3061_v18  ;;  %v3212_v62 = vld [vmem:[#allocation9 + $0xc08] sm:$0xff]  ;;  %v2957_v6 = vld [vmem:[#allocation9 + $0x410] sm:$0xff] }
 0x31f   :  { %6151 = vmatprep.subr.bf16.mxu0 %v8476_v20  ;;  %v8874_v20 = vcombine.high %v3308_v13, %v3316_v14  ;;  %v3220_v47 = vld [vmem:[#allocation9 + $0xc48] sm:$0xff] }
 0x321   :  { %6111 = vmatpush1.bf16.msra.mxu1 %v8729_v32  ;;  %v3045_v32 = vld [vmem:[#allocation9 + $0x6d0] sm:$0xff] }
 0x322   :  { %6152 = vmatpush1.bf16.msra.mxu0 %v8475_v24  ;;  %6112 = vmatprep.subr.bf16.mxu1 %v8714_v25  ;;  %v8873_v24 = vcombine.low %v3308_v13, %v3316_v14  ;;  %v8619_v25 = vcombine.low %v3053_v17, %v3061_v18  ;;  %v8604_v33 = vcombine.high %v3037_v31, %v3045_v32  ;;  %v3197_v14 = vld [vmem:[#allocation9 + $0xb90] sm:$0xff]  ;;  %v2942_v18 = vld [vmem:[#allocation9 + $0x398] sm:$0xff] }
 0x323   :  { %6153 = vmatprep.subr.bf16.mxu0 %v8460_v27  ;;  %v8858_v27 = vcombine.high %v3292_v29, %v3300_v30  ;;  %v3205_v17 = vld [vmem:[#allocation9 + $0xbd0] sm:$0xff] }
 0x325   :  { %6113 = vmatpush1.bf16.msra.mxu1 %v8713_v38  ;;  %v3029_v38 = vld [vmem:[#allocation9 + $0x650] sm:$0xff] }
 0x326   :  { %6154 = vmatpush1.bf16.msra.mxu0 %v8459_v34  ;;  %6114 = vmatprep.subr.bf16.mxu1 %v8698_v39  ;;  %v8857_v34 = vcombine.low %v3292_v29, %v3300_v30  ;;  %v8603_v39 = vcombine.low %v3037_v31, %v3045_v32  ;;  %v8588_v37 = vcombine.high %v3021_v16, %v3029_v38  ;;  %v3181_v30 = vld [vmem:[#allocation9 + $0xb10] sm:$0xff] }
 0x327   :  { %6155 = vmatprep.subr.bf16.mxu0 %v8444_v40  ;;  %v8842_v40 = vcombine.high %v3276_v7, %v3284_v1  ;;  %v3189_v31 = vld [vmem:[#allocation9 + $0xb50] sm:$0xff]  ;;  %v8763_v32 = vcombine.low %v3197_v14, %v3205_v17 }
 0x329   :  { %6115 = vmatpush1.bf16.msra.mxu1 %v8697_v45  ;;  %v3013_v45 = vld [vmem:[#allocation9 + $0x5d0] sm:$0xff] }
 0x32a   :  { %6156 = vmatpush1.bf16.msra.mxu0 %v8443_v36  ;;  %6116 = vmatprep.subr.bf16.mxu1 %v8682_v46  ;;  %v8841_v36 = vcombine.low %v3276_v7, %v3284_v1  ;;  %v8587_v46 = vcombine.low %v3021_v16, %v3029_v38  ;;  %v8572_v50 = vcombine.high %v3005_v51, %v3013_v45  ;;  %v3165_v7 = vld [vmem:[#allocation9 + $0xa90] sm:$0xff]  ;;  %v2910_v38 = vld [vmem:[#allocation9 + $0x298] sm:$0xff] }
 0x32b   :  { %6157 = vmatprep.subr.bf16.mxu0 %v8428_v48  ;;  %v8826_v48 = vcombine.high %v3260_v41, %v3268_v44  ;;  %v3173_v1 = vld [vmem:[#allocation9 + $0xad0] sm:$0xff] }
 0x32d   :  { %6117 = vmatpush1.bf16.msra.mxu1 %v8681_v55  ;;  %v2997_v55 = vld [vmem:[#allocation9 + $0x550] sm:$0xff] }
 0x32e   :  { %6158 = vmatpush1.bf16.msra.mxu0 %v8427_v56  ;;  %6118 = vmatprep.subr.bf16.mxu1 %v8666_v57  ;;  %v8825_v56 = vcombine.low %v3260_v41, %v3268_v44  ;;  %v8571_v57 = vcombine.low %v3005_v51, %v3013_v45  ;;  %v8556_v4 = vcombine.high %v2989_v54, %v2997_v55  ;;  %v3149_v44 = vld [vmem:[#allocation9 + $0xa10] sm:$0xff]  ;;  %v2894_v45 = vld [vmem:[#allocation9 + $0x218] sm:$0xff] }
 0x32f   :  { %6159 = vmatprep.subr.bf16.mxu0 %v8412_v58  ;;  %v8810_v58 = vcombine.high %v3244_v52, %v3252_v53  ;;  %v3157_v51 = vld [vmem:[#allocation9 + $0xa50] sm:$0xff] }
 0x331   :  { %6119 = vmatpush1.bf16.msra.mxu1 %v8665_v22  ;;  %v2981_v22 = vld [vmem:[#allocation9 + $0x4d0] sm:$0xff] }
 0x332   :  { %6160 = vmatpush1.bf16.msra.mxu0 %v8411_v60  ;;  %6120 = vmatprep.subr.bf16.mxu1 %v8650_v61  ;;  %v8809_v60 = vcombine.low %v3244_v52, %v3252_v53  ;;  %v8555_v61 = vcombine.low %v2989_v54, %v2997_v55  ;;  %v8540_v15 = vcombine.high %v2973_v59, %v2981_v22  ;;  %v3133_v53 = vld [vmem:[#allocation9 + $0x990] sm:$0xff]  ;;  %v2878_v55 = vld [vmem:[#allocation9 + $0x198] sm:$0xff] }
 0x333   :  { %6161 = vmatprep.subr.bf16.mxu0 %v8396_v28  ;;  %v8794_v28 = vcombine.high %v3228_v35, %v3236_v5  ;;  %v3141_v54 = vld [vmem:[#allocation9 + $0x9d0] sm:$0xff] }
 0x335   :  { %6121 = vmatpush1.bf16.msra.mxu1 %v8649_v49  ;;  %v2965_v49 = vld [vmem:[#allocation9 + $0x450] sm:$0xff] }
 0x336   :  { %6162 = vmatpush1.bf16.msra.mxu0 %v8395_v8  ;;  %6122 = vmatprep.subr.bf16.mxu1 %v8890_v9  ;;  %v8793_v8 = vcombine.low %v3228_v35, %v3236_v5  ;;  %v8539_v9 = vcombine.low %v2973_v59, %v2981_v22  ;;  %v8524_v13 = vcombine.high %v2957_v6, %v2965_v49  ;;  %v3117_v5 = vld [vmem:[#allocation9 + $0x910] sm:$0xff]  ;;  %v2862_v22 = vld [vmem:[#allocation9 + $0x118] sm:$0xff] }
 0x337   :  { %6163 = vmatprep.subr.bf16.mxu0 %v8636_v11  ;;  %v8778_v11 = vcombine.high %v3212_v62, %v3220_v47  ;;  %v3125_v59 = vld [vmem:[#allocation9 + $0x950] sm:$0xff] }
 0x339   :  { %6123 = vmatpush2.bf16.msra.mxu1 %v8889_v23  ;;  %v2950_v23 = vld [vmem:[#allocation9 + $0x3d8] sm:$0xff] }
 0x33a   :  { %6164 = vmatpush2.bf16.msra.mxu0 %v8635_v26  ;;  %6124 = vmatprep.subr.bf16.mxu1 %v8874_v20  ;;  %v8777_v26 = vcombine.low %v3212_v62, %v3220_v47  ;;  %v8523_v20 = vcombine.low %v2957_v6, %v2965_v49  ;;  %v8510_v29 = vcombine.high %v2942_v18, %v2950_v23  ;;  %v3101_v47 = vld [vmem:[#allocation9 + $0x890] sm:$0xff]  ;;  %v2846_v49 = vld [vmem:[#allocation9 + $0x98] sm:$0xff] }
 0x33b   :  { %6165 = vmatprep.subr.bf16.mxu0 %v8620_v21  ;;  %v8764_v21 = vcombine.high %v3197_v14, %v3205_v17  ;;  %v3109_v6 = vld [vmem:[#allocation9 + $0x8d0] sm:$0xff] }
 0x33c   :  { %v3085_v17 = vld [vmem:[#allocation9 + $0x810] sm:$0xff] }
 0x33d   :  { %6125 = vmatpush2.bf16.msra.mxu1 %v8873_v24  ;;  %v2926_v24 = vld [vmem:[#allocation9 + $0x318] sm:$0xff] }
 0x33e   :  { %6166 = vmatpush2.bf16.msra.mxu0 %v8619_v25  ;;  %6126 = vmatprep.subr.bf16.mxu1 %v8858_v27  ;;  %v2934_v25 = vld [vmem:[#allocation9 + $0x358] sm:$0xff]  ;;  %v8509_v27 = vcombine.low %v2942_v18, %v2950_v23  ;;  %v3093_v18 = vld [vmem:[#allocation9 + $0x850] sm:$0xff] }
 0x33f   :  { %6167 = vmatprep.subr.bf16.mxu0 %v8604_v33  ;;  %v8748_v33 = vcombine.high %v3181_v30, %v3189_v31  ;;  %v8494_v16 = vcombine.high %v2926_v24, %v2934_v25  ;;  %v2830_v23 = vld [vmem:[#allocation9 + $0x18] sm:$0xff] }
 0x341   :  { %6127 = vmatpush2.bf16.msra.mxu1 %v8857_v34  ;;  %v2918_v34 = vld [vmem:[#allocation9 + $0x2d8] sm:$0xff] }
 0x342   :  { %6168 = vmatpush2.bf16.msra.mxu0 %v8603_v39  ;;  %6128 = vmatprep.subr.bf16.mxu1 %v8842_v40  ;;  %v8747_v39 = vcombine.low %v3181_v30, %v3189_v31  ;;  %v8493_v40 = vcombine.low %v2926_v24, %v2934_v25  ;;  %v8478_v41 = vcombine.high %v2910_v38, %v2918_v34  ;;  %v3325_v31 = vld [vmem:[#allocation9 + $0xf90] sm:$0xff]  ;;  %v3070_v24 = vld [vmem:[#allocation9 + $0x798] sm:$0xff] }
 0x343   :  { %6169 = vmatprep.subr.bf16.mxu0 %v8588_v37  ;;  %v8732_v37 = vcombine.high %v3165_v7, %v3173_v1  ;;  %v3078_v25 = vld [vmem:[#allocation9 + $0x7d8] sm:$0xff] }
 0x345   :  { %6129 = vmatpush2.bf16.msra.mxu1 %v8841_v36  ;;  %v2902_v36 = vld [vmem:[#allocation9 + $0x258] sm:$0xff] }
 0x346   :  { %6170 = vmatpush2.bf16.msra.mxu0 %v8587_v46  ;;  %6130 = vmatprep.subr.bf16.mxu1 %v8826_v48  ;;  %v8731_v46 = vcombine.low %v3165_v7, %v3173_v1  ;;  %v8477_v48 = vcombine.low %v2910_v38, %v2918_v34  ;;  %v8462_v52 = vcombine.high %v2894_v45, %v2902_v36  ;;  %v3317_v38 = vld [vmem:[#allocation9 + $0xf50] sm:$0xff]  ;;  %v3054_v34 = vld [vmem:[#allocation9 + $0x718] sm:$0xff] }
 0x347   :  { %6171 = vmatprep.subr.bf16.mxu0 %v8572_v50  ;;  %v8716_v50 = vcombine.high %v3149_v44, %v3157_v51  ;;  %v8638_v1 = vcombine.high %v3070_v24, %v3078_v25 }
 0x349   :  { %6131 = vmatpush2.bf16.msra.mxu1 %v8825_v56  ;;  %v2886_v56 = vld [vmem:[#allocation9 + $0x1d8] sm:$0xff] }
 0x34a   :  { %6172 = vmatpush2.bf16.msra.mxu0 %v8571_v57  ;;  %6132 = vmatprep.subr.bf16.mxu1 %v8810_v58  ;;  %v8715_v57 = vcombine.low %v3149_v44, %v3157_v51  ;;  %v8461_v58 = vcombine.low %v2894_v45, %v2902_v36  ;;  %v8446_v35 = vcombine.high %v2878_v55, %v2886_v56  ;;  %v3293_v51 = vld [vmem:[#allocation9 + $0xe90] sm:$0xff]  ;;  %v3038_v36 = vld [vmem:[#allocation9 + $0x698] sm:$0xff] }
 0x34b   :  { %6173 = vmatprep.subr.bf16.mxu0 %v8556_v4  ;;  %v8700_v4 = vcombine.high %v3133_v53, %v3141_v54  ;;  %v3301_v45 = vld [vmem:[#allocation9 + $0xed0] sm:$0xff] }
 0x34d   :  { %6133 = vmatpush2.bf16.msra.mxu1 %v8809_v60  ;;  %v2870_v60 = vld [vmem:[#allocation9 + $0x158] sm:$0xff] }
 0x34e   :  { %6174 = vmatpush2.bf16.msra.mxu0 %v8555_v61  ;;  %6134 = vmatprep.subr.bf16.mxu1 %v8794_v28  ;;  %v8699_v61 = vcombine.low %v3133_v53, %v3141_v54  ;;  %v8445_v28 = vcombine.low %v2878_v55, %v2886_v56  ;;  %v8430_v62 = vcombine.high %v2862_v22, %v2870_v60  ;;  %v3277_v54 = vld [vmem:[#allocation9 + $0xe10] sm:$0xff]  ;;  %v3022_v56 = vld [vmem:[#allocation9 + $0x618] sm:$0xff] }
 0x34f   :  { %6175 = vmatprep.subr.bf16.mxu0 %v8540_v15  ;;  %v8684_v15 = vcombine.high %v3117_v5, %v3125_v59  ;;  %v3285_v55 = vld [vmem:[#allocation9 + $0xe50] sm:$0xff] }
 0x351   :  { %6135 = vmatpush2.bf16.msra.mxu1 %v8793_v8  ;;  %v2854_v8 = vld [vmem:[#allocation9 + $0xd8] sm:$0xff] }
 0x352   :  { %6176 = vmatpush2.bf16.msra.mxu0 %v8539_v9  ;;  %6136 = vmatprep.subr.bf16.mxu1 %v8778_v11  ;;  %v8683_v9 = vcombine.low %v3117_v5, %v3125_v59  ;;  %v8429_v11 = vcombine.low %v2862_v22, %v2870_v60  ;;  %v8414_v14 = vcombine.high %v2846_v49, %v2854_v8  ;;  %v3261_v59 = vld [vmem:[#allocation9 + $0xd90] sm:$0xff]  ;;  %v3006_v60 = vld [vmem:[#allocation9 + $0x598] sm:$0xff] }
 0x353   :  { %6177 = vmatprep.subr.bf16.mxu0 %v8524_v13  ;;  %v8668_v13 = vcombine.high %v3101_v47, %v3109_v6  ;;  %v3269_v22 = vld [vmem:[#allocation9 + $0xdd0] sm:$0xff] }
 0x355   :  { %6137 = vmatpush2.bf16.msra.mxu1 %v8777_v26  ;;  %v2838_v26 = vld [vmem:[#allocation9 + $0x58] sm:$0xff] }
 0x356   :  { %6178 = vmatpush2.bf16.msra.mxu0 %v8523_v20  ;;  %6188 = vmatprep.subr.bf16.mxu1 %v8764_v21  ;;  %v8667_v20 = vcombine.low %v3101_v47, %v3109_v6  ;;  %v8413_v21 = vcombine.low %v2846_v49, %v2854_v8  ;;  %v8398_v30 = vcombine.high %v2830_v23, %v2838_v26  ;;  %v3245_v6 = vld [vmem:[#allocation9 + $0xd10] sm:$0xff]  ;;  %v2990_v8 = vld [vmem:[#allocation9 + $0x518] sm:$0xff] }
 0x357   :  { %6229 = vmatprep.subr.bf16.mxu0 %v8510_v29  ;;  %v8652_v29 = vcombine.high %v3085_v17, %v3093_v18  ;;  %v3253_v49 = vld [vmem:[#allocation9 + $0xd50] sm:$0xff] }
 0x358   :  { %6139 = vmatmul.mubr.bf16.vlgmr.msra.gmra.mxu1 %v10292_v19 }
 0x359   :  { %6180 = vmatmul.mubr.bf16.vlgmr.msra.gmra.mxu0 %v10276_v43  ;;  %6189 = vmatpush1.bf16.msra.mxu1 %v8763_v32  ;;  %v3333_v32 = vld [vmem:[#allocation9 + $0xfd0] sm:$0xff] }
 0x35a   :  { %6220 = vmatprep.mubr.bf16.mxu1 %v10290_v3  ;;  %6230 = vmatpush1.bf16.msra.mxu0 %v8509_v27  ;;  %v8651_v27 = vcombine.low %v3085_v17, %v3093_v18  ;;  %v8892_v7 = vcombine.high %v3325_v31, %v3333_v32  ;;  %v3229_v18 = vld [vmem:[#allocation9 + $0xc90] sm:$0xff] }
 0x35b   :  { %6261 = vmatprep.mubr.bf16.mxu0 %v10274_v42  ;;  %6190 = vmatprep.subr.bf16.mxu1 %v8748_v33  ;;  %v8397_v33 = vcombine.low %v2830_v23, %v2838_v26  ;;  %v3237_v23 = vld [vmem:[#allocation9 + $0xcd0] sm:$0xff]  ;;  %v2974_v26 = vld [vmem:[#allocation9 + $0x498] sm:$0xff] }
 0x35c   :  { %6231 = vmatprep.subr.bf16.mxu0 %v8494_v16  ;;  %v3309_v16 = vld [vmem:[#allocation9 + $0xf10] sm:$0xff] }
 0x35d   :  { %6191 = vmatpush1.bf16.msra.mxu1 %v8747_v39  ;;  %v3062_v39 = vld [vmem:[#allocation9 + $0x758] sm:$0xff] }
 0x35e   :  { %6232 = vmatpush1.bf16.msra.mxu0 %v8493_v40  ;;  %6192 = vmatprep.subr.bf16.mxu1 %v8732_v37  ;;  %v8891_v40 = vcombine.low %v3325_v31, %v3333_v32  ;;  %v8637_v37 = vcombine.low %v3070_v24, %v3078_v25  ;;  %v8622_v44 = vcombine.high %v3054_v34, %v3062_v39  ;;  %v3213_v32 = vld [vmem:[#allocation9 + $0xc10] sm:$0xff]  ;;  %v2958_v25 = vld [vmem:[#allocation9 + $0x418] sm:$0xff] }
 0x35f   :  { %6233 = vmatprep.subr.bf16.mxu0 %v8478_v41  ;;  %v8876_v41 = vcombine.high %v3309_v16, %v3317_v38  ;;  %v3221_v24 = vld [vmem:[#allocation9 + $0xc50] sm:$0xff] }
 0x361   :  { %6193 = vmatpush1.bf16.msra.mxu1 %v8731_v46  ;;  %v3046_v46 = vld [vmem:[#allocation9 + $0x6d8] sm:$0xff] }
 0x362   :  { %6234 = vmatpush1.bf16.msra.mxu0 %v8477_v48  ;;  %6194 = vmatprep.subr.bf16.mxu1 %v8716_v50  ;;  %v8875_v48 = vcombine.low %v3309_v16, %v3317_v38  ;;  %v8621_v50 = vcombine.low %v3054_v34, %v3062_v39  ;;  %v8606_v53 = vcombine.high %v3038_v36, %v3046_v46  ;;  %v3198_v38 = vld [vmem:[#allocation9 + $0xb98] sm:$0xff]  ;;  %v2943_v39 = vld [vmem:[#allocation9 + $0x3a0] sm:$0xff] }
 0x363   :  { %6235 = vmatprep.subr.bf16.mxu0 %v8462_v52  ;;  %v8860_v52 = vcombine.high %v3293_v51, %v3301_v45  ;;  %v3206_v34 = vld [vmem:[#allocation9 + $0xbd8] sm:$0xff] }
 0x365   :  { %6195 = vmatpush1.bf16.msra.mxu1 %v8715_v57  ;;  %v3030_v57 = vld [vmem:[#allocation9 + $0x658] sm:$0xff] }
 0x366   :  { %6236 = vmatpush1.bf16.msra.mxu0 %v8461_v58  ;;  %6196 = vmatprep.subr.bf16.mxu1 %v8700_v4  ;;  %v8859_v58 = vcombine.low %v3293_v51, %v3301_v45  ;;  %v8605_v4 = vcombine.low %v3038_v36, %v3046_v46  ;;  %v8590_v5 = vcombine.high %v3022_v56, %v3030_v57  ;;  %v3182_v45 = vld [vmem:[#allocation9 + $0xb18] sm:$0xff] }
 0x367   :  { %6237 = vmatprep.subr.bf16.mxu0 %v8446_v35  ;;  %v8844_v35 = vcombine.high %v3277_v54, %v3285_v55  ;;  %v3190_v36 = vld [vmem:[#allocation9 + $0xb58] sm:$0xff]  ;;  %v8765_v46 = vcombine.low %v3198_v38, %v3206_v34 }
 0x369   :  { %6197 = vmatpush1.bf16.msra.mxu1 %v8699_v61  ;;  %v3014_v61 = vld [vmem:[#allocation9 + $0x5d8] sm:$0xff] }
 0x36a   :  { %6238 = vmatpush1.bf16.msra.mxu0 %v8445_v28  ;;  %6198 = vmatprep.subr.bf16.mxu1 %v8684_v15  ;;  %v8843_v28 = vcombine.low %v3277_v54, %v3285_v55  ;;  %v8589_v15 = vcombine.low %v3022_v56, %v3030_v57  ;;  %v8574_v47 = vcombine.high %v3006_v60, %v3014_v61  ;;  %v3166_v54 = vld [vmem:[#allocation9 + $0xa98] sm:$0xff] }
 0x36b   :  { %6239 = vmatprep.subr.bf16.mxu0 %v8430_v62  ;;  %v8828_v62 = vcombine.high %v3261_v59, %v3269_v22  ;;  %v3174_v55 = vld [vmem:[#allocation9 + $0xad8] sm:$0xff] }
 0x36d   :  { %6199 = vmatpush1.bf16.msra.mxu1 %v8683_v9  ;;  %v2998_v9 = vld [vmem:[#allocation9 + $0x558] sm:$0xff] }
 0x36e   :  { %6240 = vmatpush1.bf16.msra.mxu0 %v8429_v11  ;;  %6200 = vmatprep.subr.bf16.mxu1 %v8668_v13  ;;  %v8827_v11 = vcombine.low %v3261_v59, %v3269_v22  ;;  %v8573_v13 = vcombine.low %v3006_v60, %v3014_v61  ;;  %v8558_v17 = vcombine.high %v2990_v8, %v2998_v9  ;;  %v3150_v61 = vld [vmem:[#allocation9 + $0xa18] sm:$0xff] }
 0x36f   :  { %6241 = vmatprep.subr.bf16.mxu0 %v8414_v14  ;;  %v8812_v14 = vcombine.high %v3245_v6, %v3253_v49  ;;  %v8734_v22 = vcombine.high %v3166_v54, %v3174_v55 }
 0x371   :  { %6201 = vmatpush1.bf16.msra.mxu1 %v8667_v20  ;;  %v2982_v20 = vld [vmem:[#allocation9 + $0x4d8] sm:$0xff] }
 0x372   :  { %6242 = vmatpush1.bf16.msra.mxu0 %v8413_v21  ;;  %6202 = vmatprep.subr.bf16.mxu1 %v8652_v29  ;;  %v8811_v21 = vcombine.low %v3245_v6, %v3253_v49  ;;  %v8557_v29 = vcombine.low %v2990_v8, %v2998_v9  ;;  %v8542_v31 = vcombine.high %v2974_v26, %v2982_v20 }
 0x373   :  { %6243 = vmatprep.subr.bf16.mxu0 %v8398_v30  ;;  %v8796_v30 = vcombine.high %v3229_v18, %v3237_v23  ;;  %v8733_v6 = vcombine.low %v3166_v54, %v3174_v55  ;;  %v3071_v54 = vld [vmem:[#allocation9 + $0x7a0] sm:$0xff] }
 0x374   :  { %v3079_v55 = vld [vmem:[#allocation9 + $0x7e0] sm:$0xff] }
 0x375   :  { %6203 = vmatpush1.bf16.msra.mxu1 %v8651_v27  ;;  %v2966_v27 = vld [vmem:[#allocation9 + $0x458] sm:$0xff] }
 0x376   :  { %6244 = vmatpush1.bf16.msra.mxu0 %v8397_v33  ;;  %6204 = vmatprep.subr.bf16.mxu1 %v8892_v7  ;;  %v8795_v33 = vcombine.low %v3229_v18, %v3237_v23  ;;  %v8541_v7 = vcombine.low %v2974_v26, %v2982_v20  ;;  %v8526_v16 = vcombine.high %v2958_v25, %v2966_v27  ;;  %v2887_v18 = vld [vmem:[#allocation9 + $0x1e0] sm:$0xff] }
 0x377   :  { %6245 = vmatprep.subr.bf16.mxu0 %v8638_v1  ;;  %v8780_v1 = vcombine.high %v3213_v32, %v3221_v24 }
 0x379   :  { %6205 = vmatpush2.bf16.msra.mxu1 %v8891_v40  ;;  %v2951_v40 = vld [vmem:[#allocation9 + $0x3e0] sm:$0xff] }
 0x37a   :  { %6246 = vmatpush2.bf16.msra.mxu0 %v8637_v37  ;;  %6206 = vmatprep.subr.bf16.mxu1 %v8876_v41  ;;  %v8779_v37 = vcombine.low %v3213_v32, %v3221_v24  ;;  %v8525_v41 = vcombine.low %v2958_v25, %v2966_v27  ;;  %v8512_v51 = vcombine.high %v2943_v39, %v2951_v40  ;;  %v2871_v32 = vld [vmem:[#allocation9 + $0x160] sm:$0xff] }
 0x37b   :  { %6247 = vmatprep.subr.bf16.mxu0 %v8622_v44  ;;  %v8766_v44 = vcombine.high %v3198_v38, %v3206_v34  ;;  %v2855_v38 = vld [vmem:[#allocation9 + $0xe0] sm:$0xff] }
 0x37d   :  { %6207 = vmatpush2.bf16.msra.mxu1 %v8875_v48  ;;  %v2927_v48 = vld [vmem:[#allocation9 + $0x320] sm:$0xff] }
 0x37e   :  { %6248 = vmatpush2.bf16.msra.mxu0 %v8621_v50  ;;  %6208 = vmatprep.subr.bf16.mxu1 %v8860_v52  ;;  %v2935_v50 = vld [vmem:[#allocation9 + $0x360] sm:$0xff]  ;;  %v8511_v52 = vcombine.low %v2943_v39, %v2951_v40 }
 0x37f   :  { %6249 = vmatprep.subr.bf16.mxu0 %v8606_v53  ;;  %v8750_v53 = vcombine.high %v3182_v45, %v3190_v36  ;;  %v8496_v57 = vcombine.high %v2927_v48, %v2935_v50  ;;  %v8495_v59 = vcombine.low %v2927_v48, %v2935_v50 }
 0x381   :  { %6209 = vmatpush2.bf16.msra.mxu1 %v8859_v58  ;;  %v2911_v58 = vld [vmem:[#allocation9 + $0x2a0] sm:$0xff] }
 0x382   :  { %6250 = vmatpush2.bf16.msra.mxu0 %v8605_v4  ;;  %6210 = vmatprep.subr.bf16.mxu1 %v8844_v35  ;;  %v2919_v4 = vld [vmem:[#allocation9 + $0x2e0] sm:$0xff]  ;;  %v8749_v35 = vcombine.low %v3182_v45, %v3190_v36 }
 0x383   :  { %6251 = vmatprep.subr.bf16.mxu0 %v8590_v5  ;;  %v8480_v60 = vcombine.high %v2911_v58, %v2919_v4  ;;  %v8479_v8 = vcombine.low %v2911_v58, %v2919_v4  ;;  %v2839_v45 = vld [vmem:[#allocation9 + $0x60] sm:$0xff] }
 0x385   :  { %6211 = vmatpush2.bf16.msra.mxu1 %v8843_v28  ;;  %v3158_v28 = vld [vmem:[#allocation9 + $0xa58] sm:$0xff] }
 0x386   :  { %6252 = vmatpush2.bf16.msra.mxu0 %v8589_v15  ;;  %6212 = vmatprep.subr.bf16.mxu1 %v8828_v62  ;;  %v2895_v62 = vld [vmem:[#allocation9 + $0x220] sm:$0xff]  ;;  %v8718_v9 = vcombine.high %v3150_v61, %v3158_v28  ;;  %v8717_v23 = vcombine.low %v3150_v61, %v3158_v28 }
 0x387   :  { %6253 = vmatprep.subr.bf16.mxu0 %v8574_v47  ;;  %v2903_v47 = vld [vmem:[#allocation9 + $0x260] sm:$0xff] }
 0x388   :  { %v8463_v26 = vcombine.low %v2895_v62, %v2903_v47  ;;  %v3063_v61 = vld [vmem:[#allocation9 + $0x760] sm:$0xff] }
 0x389   :  { %6213 = vmatpush2.bf16.msra.mxu1 %v8827_v11  ;;  %v8464_v11 = vcombine.high %v2895_v62, %v2903_v47 }
 0x38a   :  { %6254 = vmatpush2.bf16.msra.mxu0 %v8573_v13  ;;  %6214 = vmatprep.subr.bf16.mxu1 %v8812_v14  ;;  %v3134_v13 = vld [vmem:[#allocation9 + $0x998] sm:$0xff] }
 0x38b   :  { %6255 = vmatprep.subr.bf16.mxu0 %v8558_v17  ;;  %v3142_v14 = vld [vmem:[#allocation9 + $0x9d8] sm:$0xff]  ;;  %v2879_v17 = vld [vmem:[#allocation9 + $0x1a0] sm:$0xff] }
 0x38c   :  { %v8702_v20 = vcombine.high %v3134_v13, %v3142_v14  ;;  %v8701_v24 = vcombine.low %v3134_v13, %v3142_v14  ;;  %v8447_v25 = vcombine.low %v2879_v17, %v2887_v18 }
 0x38d   :  { %6215 = vmatpush2.bf16.msra.mxu1 %v8811_v21  ;;  %v8448_v21 = vcombine.high %v2879_v17, %v2887_v18  ;;  %v3278_v18 = vld [vmem:[#allocation9 + $0xe18] sm:$0xff] }
 0x38e   :  { %6256 = vmatpush2.bf16.msra.mxu0 %v8557_v29  ;;  %6216 = vmatprep.subr.bf16.mxu1 %v8796_v30  ;;  %v3118_v29 = vld [vmem:[#allocation9 + $0x918] sm:$0xff] }
 0x38f   :  { %6257 = vmatprep.subr.bf16.mxu0 %v8542_v31  ;;  %v3126_v30 = vld [vmem:[#allocation9 + $0x958] sm:$0xff]  ;;  %v2863_v31 = vld [vmem:[#allocation9 + $0x120] sm:$0xff] }
 0x390   :  { %v8686_v27 = vcombine.high %v3118_v29, %v3126_v30  ;;  %v8685_v34 = vcombine.low %v3118_v29, %v3126_v30  ;;  %v8431_v39 = vcombine.low %v2863_v31, %v2871_v32 }
 0x391   :  { %6217 = vmatpush2.bf16.msra.mxu1 %v8795_v33  ;;  %v8432_v33 = vcombine.high %v2863_v31, %v2871_v32  ;;  %v3262_v32 = vld [vmem:[#allocation9 + $0xd98] sm:$0xff] }
 0x392   :  { %6258 = vmatpush2.bf16.msra.mxu0 %v8541_v7  ;;  %6218 = vmatprep.subr.bf16.mxu1 %v8780_v1  ;;  %v3102_v7 = vld [vmem:[#allocation9 + $0x898] sm:$0xff] }
 0x393   :  { %6259 = vmatprep.subr.bf16.mxu0 %v8526_v16  ;;  %v3110_v1 = vld [vmem:[#allocation9 + $0x8d8] sm:$0xff]  ;;  %v2847_v16 = vld [vmem:[#allocation9 + $0xa0] sm:$0xff] }
 0x394   :  { %v8670_v40 = vcombine.high %v3102_v7, %v3110_v1  ;;  %v8669_v36 = vcombine.low %v3102_v7, %v3110_v1 }
 0x395   :  { %6219 = vmatpush2.bf16.msra.mxu1 %v8779_v37  ;;  %v8416_v37 = vcombine.high %v2847_v16, %v2855_v38 }
 0x396   :  { %6260 = vmatpush2.bf16.msra.mxu0 %v8525_v41  ;;  %6270 = vmatprep.subr.bf16.mxu1 %v8766_v44  ;;  %v3086_v41 = vld [vmem:[#allocation9 + $0x818] sm:$0xff] }
 0x397   :  { %6311 = vmatprep.subr.bf16.mxu0 %v8512_v51  ;;  %v3094_v44 = vld [vmem:[#allocation9 + $0x858] sm:$0xff]  ;;  %v2831_v51 = vld [vmem:[#allocation9 + $0x20] sm:$0xff] }
 0x398   :  { %6221 = vmatmul.mubr.bf16.vlgmr.msra.gmra.mxu1 %v10292_v19  ;;  %v10307_v56 = vpop.f32.mrf.mxu0  ;;  %v8654_v48 = vcombine.high %v3086_v41, %v3094_v44  ;;  %v8400_v50 = vcombine.high %v2831_v51, %v2839_v45  ;;  %v8399_v58 = vcombine.low %v2831_v51, %v2839_v45  ;;  %v3230_v45 = vld [vmem:[#allocation9 + $0xc98] sm:$0xff] }
 0x399   :  { %6262 = vmatmul.mubr.bf16.vlgmr.msra.gmra.mxu0 %v10276_v43  ;;  %6271 = vmatpush1.bf16.msra.mxu1 %v8765_v46  ;;  %v8415_v46 = vcombine.low %v2847_v16, %v2855_v38  ;;  %v3246_v38 = vld [vmem:[#allocation9 + $0xd18] sm:$0xff] }
 0x39a   :  { %6302 = vmatprep.mubr.bf16.mxu1 %v10290_v3  ;;  %6312 = vmatpush1.bf16.msra.mxu0 %v8511_v52  ;;  %v10311_v5 = vpop.f32.mrf.mxu0  ;;  %v3326_v52 = vld [vmem:[#allocation9 + $0xf98] sm:$0xff] }
 0x39b   :  { %6343 = vmatprep.mubr.bf16.mxu0 %v10274_v42  ;;  %6272 = vmatprep.subr.bf16.mxu1 %v8750_v53  ;;  %v3334_v53 = vld [vmem:[#allocation9 + $0xfd8] sm:$0xff] }
 0x39c   :  { %6313 = vmatprep.subr.bf16.mxu0 %v8496_v57  ;;  %v6021_v15 = vpop.f32.mrf.mxu0  ;;  %v8653_v57 = vcombine.low %v3086_v41, %v3094_v44  ;;  %v8894_v4 = vcombine.high %v3326_v52, %v3334_v53  ;;  %v8893_v28 = vcombine.low %v3326_v52, %v3334_v53 }
 0x39d   :  { %6273 = vmatpush1.bf16.msra.mxu1 %v8749_v35  ;;  %v8640_v35 = vcombine.high %v3071_v54, %v3079_v55  ;;  %v8639_v15 = vcombine.low %v3071_v54, %v3079_v55  ;;  %v3214_v55 = vld [vmem:[#allocation9 + $0xc18] sm:$0xff] }
 0x39e   :  { %6314 = vmatpush1.bf16.msra.mxu0 %v8495_v59  ;;  %v6022_v49 = vpop.f32.mrf.mxu0  ;;  %6274 = vmatprep.subr.bf16.mxu1 %v8734_v22  ;;  %v3310_v59 = vld [vmem:[#allocation9 + $0xf18] sm:$0xff] }
 0x39f   :  { %6315 = vmatprep.subr.bf16.mxu0 %v8480_v60  ;;  %v3318_v22 = vld [vmem:[#allocation9 + $0xf58] sm:$0xff]  ;;  %v3055_v60 = vld [vmem:[#allocation9 + $0x720] sm:$0xff] }
 0x3a0   :  { %v8878_v62 = vcombine.high %v3310_v59, %v3318_v22  ;;  %v8624_v47 = vcombine.high %v3055_v60, %v3063_v61  ;;  %v3302_v49 = vld [vmem:[#allocation9 + $0xed8] sm:$0xff]  ;;  %v8623_v13 = vcombine.low %v3055_v60, %v3063_v61  ;;  %v3199_v61 = vld [vmem:[#allocation9 + $0xba0] sm:$0xff] }
 0x3a1   :  { %6275 = vmatpush1.bf16.msra.mxu1 %v8733_v6  ;;  %v3294_v6 = vld [vmem:[#allocation9 + $0xe98] sm:$0xff] }
 0x3a2   :  { %6316 = vmatpush1.bf16.msra.mxu0 %v8479_v8  ;;  %6276 = vmatprep.subr.bf16.mxu1 %v8718_v9  ;;  %v3039_v8 = vld [vmem:[#allocation9 + $0x6a0] sm:$0xff]  ;;  %v8862_v14 = vcombine.high %v3294_v6, %v3302_v49 }
 0x3a3   :  { %6317 = vmatprep.subr.bf16.mxu0 %v8464_v11  ;;  %v3047_v9 = vld [vmem:[#allocation9 + $0x6e0] sm:$0xff]  ;;  %v8877_v11 = vcombine.low %v3310_v59, %v3318_v22 }
 0x3a4   :  { %v8608_v17 = vcombine.high %v3039_v8, %v3047_v9  ;;  %v8607_v29 = vcombine.low %v3039_v8, %v3047_v9 }
 0x3a5   :  { %6277 = vmatpush1.bf16.msra.mxu1 %v8717_v23  ;;  %v3286_v23 = vld [vmem:[#allocation9 + $0xe58] sm:$0xff] }
 0x3a6   :  { %6318 = vmatpush1.bf16.msra.mxu0 %v8463_v26  ;;  %6278 = vmatprep.subr.bf16.mxu1 %v8702_v20  ;;  %v3023_v26 = vld [vmem:[#allocation9 + $0x620] sm:$0xff]  ;;  %v8846_v30 = vcombine.high %v3278_v18, %v3286_v23 }
 0x3a7   :  { %6319 = vmatprep.subr.bf16.mxu0 %v8448_v21  ;;  %v3031_v20 = vld [vmem:[#allocation9 + $0x660] sm:$0xff]  ;;  %v8861_v21 = vcombine.low %v3294_v6, %v3302_v49 }
 0x3a8   :  { %v8592_v31 = vcombine.high %v3023_v26, %v3031_v20  ;;  %v8591_v7 = vcombine.low %v3023_v26, %v3031_v20  ;;  %v2936_v26 = vld [vmem:[#allocation9 + $0x368] sm:$0xff] }
 0x3a9   :  { %6279 = vmatpush1.bf16.msra.mxu1 %v8701_v24  ;;  %v3270_v24 = vld [vmem:[#allocation9 + $0xdd8] sm:$0xff] }
 0x3aa   :  { %6320 = vmatpush1.bf16.msra.mxu0 %v8447_v25  ;;  %6280 = vmatprep.subr.bf16.mxu1 %v8686_v27  ;;  %v3007_v25 = vld [vmem:[#allocation9 + $0x5a0] sm:$0xff]  ;;  %v8830_v1 = vcombine.high %v3262_v32, %v3270_v24 }
 0x3ab   :  { %6321 = vmatprep.subr.bf16.mxu0 %v8432_v33  ;;  %v3015_v27 = vld [vmem:[#allocation9 + $0x5e0] sm:$0xff]  ;;  %v8845_v33 = vcombine.low %v3278_v18, %v3286_v23  ;;  %v2928_v23 = vld [vmem:[#allocation9 + $0x328] sm:$0xff] }
 0x3ac   :  { %v8576_v16 = vcombine.high %v3007_v25, %v3015_v27  ;;  %v8575_v41 = vcombine.low %v3007_v25, %v3015_v27  ;;  %v8498_v25 = vcombine.high %v2928_v23, %v2936_v26  ;;  %v2912_v27 = vld [vmem:[#allocation9 + $0x2a8] sm:$0xff] }
 0x3ad   :  { %6281 = vmatpush1.bf16.msra.mxu1 %v8685_v34  ;;  %v3254_v34 = vld [vmem:[#allocation9 + $0xd58] sm:$0xff] }
 0x3ae   :  { %6322 = vmatpush1.bf16.msra.mxu0 %v8431_v39  ;;  %6282 = vmatprep.subr.bf16.mxu1 %v8670_v40  ;;  %v2991_v39 = vld [vmem:[#allocation9 + $0x520] sm:$0xff]  ;;  %v8814_v44 = vcombine.high %v3246_v38, %v3254_v34 }
 0x3af   :  { %6323 = vmatprep.subr.bf16.mxu0 %v8416_v37  ;;  %v2999_v40 = vld [vmem:[#allocation9 + $0x560] sm:$0xff]  ;;  %v8829_v37 = vcombine.low %v3262_v32, %v3270_v24 }
 0x3b0   :  { %v8560_v51 = vcombine.high %v2991_v39, %v2999_v40  ;;  %v8559_v52 = vcombine.low %v2991_v39, %v2999_v40 }
 0x3b1   :  { %6283 = vmatpush1.bf16.msra.mxu1 %v8669_v36  ;;  %v3238_v36 = vld [vmem:[#allocation9 + $0xcd8] sm:$0xff] }
 0x3b2   :  { %6324 = vmatpush1.bf16.msra.mxu0 %v8415_v46  ;;  %6284 = vmatprep.subr.bf16.mxu1 %v8654_v48  ;;  %v2975_v46 = vld [vmem:[#allocation9 + $0x4a0] sm:$0xff]  ;;  %v8798_v53 = vcombine.high %v3230_v45, %v3238_v36 }
 0x3b3   :  { %6325 = vmatprep.subr.bf16.mxu0 %v8400_v50  ;;  %v2983_v48 = vld [vmem:[#allocation9 + $0x4e0] sm:$0xff]  ;;  %v8813_v50 = vcombine.low %v3246_v38, %v3254_v34  ;;  %v8497_v34 = vcombine.low %v2928_v23, %v2936_v26 }
 0x3b4   :  { %v8544_v54 = vcombine.high %v2975_v46, %v2983_v48  ;;  %v8543_v59 = vcombine.low %v2975_v46, %v2983_v48 }
 0x3b5   :  { %6285 = vmatpush1.bf16.msra.mxu1 %v8653_v57  ;;  %v3222_v57 = vld [vmem:[#allocation9 + $0xc58] sm:$0xff] }
 0x3b6   :  { %6326 = vmatpush1.bf16.msra.mxu0 %v8399_v58  ;;  %6286 = vmatprep.subr.bf16.mxu1 %v8894_v4  ;;  %v2959_v58 = vld [vmem:[#allocation9 + $0x420] sm:$0xff]  ;;  %v8782_v22 = vcombine.high %v3214_v55, %v3222_v57  ;;  %v8781_v6 = vcombine.low %v3214_v55, %v3222_v57 }
 0x3b7   :  { %6327 = vmatprep.subr.bf16.mxu0 %v8640_v35  ;;  %v2967_v4 = vld [vmem:[#allocation9 + $0x460] sm:$0xff]  ;;  %v8797_v35 = vcombine.low %v3230_v45, %v3238_v36  ;;  %v2896_v45 = vld [vmem:[#allocation9 + $0x228] sm:$0xff] }
 0x3b8   :  { %v8528_v60 = vcombine.high %v2959_v58, %v2967_v4  ;;  %v8527_v49 = vcombine.low %v2959_v58, %v2967_v4  ;;  %v2904_v36 = vld [vmem:[#allocation9 + $0x268] sm:$0xff]  ;;  %v3135_v55 = vld [vmem:[#allocation9 + $0x9a0] sm:$0xff] }
 0x3b9   :  { %6287 = vmatpush2.bf16.msra.mxu1 %v8893_v28  ;;  %v3207_v28 = vld [vmem:[#allocation9 + $0xbe0] sm:$0xff]  ;;  %v2880_v58 = vld [vmem:[#allocation9 + $0x1a8] sm:$0xff] }
 0x3ba   :  { %6328 = vmatpush2.bf16.msra.mxu0 %v8639_v15  ;;  %6288 = vmatprep.subr.bf16.mxu1 %v8878_v62  ;;  %v10314_v15 = vld [vmem:[#allocation10] sm:$0xff]  ;;  %v2944_v62 = vld [vmem:[#allocation9 + $0x3a8] sm:$0xff]  ;;  %v8768_v8 = vcombine.high %v3199_v61, %v3207_v28  ;;  %v8767_v18 = vcombine.low %v3199_v61, %v3207_v28 }
 0x3bb   :  { %6329 = vmatprep.subr.bf16.mxu0 %v8624_v47  ;;  %v2952_v47 = vld [vmem:[#allocation9 + $0x3e8] sm:$0xff]  ;;  %v3346_v9 = vrot.slane %v10314_v15, %v10203_v0  ;;  %v3143_v57 = vld [vmem:[#allocation9 + $0x9e0] sm:$0xff] }
 0x3bc   :  { %v8513_v20 = vcombine.low %v2944_v62, %v2952_v47  ;;  %v2888_v4 = vld [vmem:[#allocation9 + $0x1e8] sm:$0xff]  ;;  %v3119_v61 = vld [vmem:[#allocation9 + $0x920] sm:$0xff] }
 0x3bd   :  { %6289 = vmatpush2.bf16.msra.mxu1 %v8877_v11  ;;  %v8514_v11 = vcombine.high %v2944_v62, %v2952_v47  ;;  %v3127_v28 = vld [vmem:[#allocation9 + $0x960] sm:$0xff]  ;;  %v2864_v62 = vld [vmem:[#allocation9 + $0x128] sm:$0xff] }
 0x3be   :  { %6330 = vmatpush2.bf16.msra.mxu0 %v8623_v13  ;;  %6290 = vmatprep.subr.bf16.mxu1 %v8862_v14  ;;  %v3183_v13 = vld [vmem:[#allocation9 + $0xb20] sm:$0xff]  ;;  %v2872_v47 = vld [vmem:[#allocation9 + $0x168] sm:$0xff] }
 0x3bf   :  { %6331 = vmatprep.subr.bf16.mxu0 %v8608_v17  ;;  %v3191_v14 = vld [vmem:[#allocation9 + $0xb60] sm:$0xff]  ;;  %v3350_v17 = vrot.slane %v10314_v15, %v10208_v2  ;;  %v8433_v23 = vcombine.low %v2864_v62, %v2872_v47 }
 0x3c1   :  { %6291 = vmatpush2.bf16.msra.mxu1 %v8861_v21  ;;  %v6018_v21 = vadd.f32 %v10307_v56, %v3346_v9  ;;  %v8751_v56 = vcombine.low %v3183_v13, %v3191_v14  ;;  %v8434_v9 = vcombine.high %v2864_v62, %v2872_v47 }
 0x3c2   :  { %6332 = vmatpush2.bf16.msra.mxu0 %v8607_v29  ;;  %6292 = vmatprep.subr.bf16.mxu1 %v8846_v30  ;;  %v8752_v29 = vcombine.high %v3183_v13, %v3191_v14  ;;  %v3167_v30 = vld [vmem:[#allocation9 + $0xaa0] sm:$0xff]  ;;  %v2848_v14 = vld [vmem:[#allocation9 + $0xa8] sm:$0xff] }
 0x3c3   :  { %6333 = vmatprep.subr.bf16.mxu0 %v8592_v31  ;;  %v3175_v31 = vld [vmem:[#allocation9 + $0xae0] sm:$0xff] }
 0x3c4   :  { %v8736_v39 = vcombine.high %v3167_v30, %v3175_v31  ;;  %v8735_v46 = vcombine.low %v3167_v30, %v3175_v31  ;;  %v3111_v13 = vld [vmem:[#allocation9 + $0x8e0] sm:$0xff]  ;;  %v2832_v30 = vld [vmem:[#allocation9 + $0x28] sm:$0xff] }
 0x3c5   :  { %6293 = vmatpush2.bf16.msra.mxu1 %v8845_v33  ;;  %v2920_v33 = vld [vmem:[#allocation9 + $0x2e8] sm:$0xff] }
 0x3c6   :  { %6334 = vmatpush2.bf16.msra.mxu0 %v8591_v7  ;;  %6294 = vmatprep.subr.bf16.mxu1 %v8830_v1  ;;  %v6020_v7 = vadd.f32 %v10311_v5, %v3350_v17  ;;  %v8482_v5 = vcombine.high %v2912_v27, %v2920_v33  ;;  %v2856_v17 = vld [vmem:[#allocation9 + $0xe8] sm:$0xff] }
 0x3c7   :  { %6335 = vmatprep.subr.bf16.mxu0 %v8576_v16  ;;  %v2840_v31 = vld [vmem:[#allocation9 + $0x68] sm:$0xff] }
 0x3c9   :  { %6295 = vmatpush2.bf16.msra.mxu1 %v8829_v37  ;;  %v3151_v37 = vld [vmem:[#allocation9 + $0xa20] sm:$0xff] }
 0x3ca   :  { %6336 = vmatpush2.bf16.msra.mxu0 %v8575_v41  ;;  %6296 = vmatprep.subr.bf16.mxu1 %v8814_v44  ;;  %v3159_v41 = vld [vmem:[#allocation9 + $0xa60] sm:$0xff] }
 0x3cb   :  { %6337 = vmatprep.subr.bf16.mxu0 %v8560_v51 }
 0x3cd   :  { %6297 = vmatpush2.bf16.msra.mxu1 %v8813_v50 }
 0x3ce   :  { %6338 = vmatpush2.bf16.msra.mxu0 %v8559_v52  ;;  %6298 = vmatprep.subr.bf16.mxu1 %v8798_v53  ;;  %v8481_v52 = vcombine.low %v2912_v27, %v2920_v33  ;;  %v8720_v53 = vcombine.high %v3151_v37, %v3159_v41  ;;  %v8402_v33 = vcombine.high %v2832_v30, %v2840_v31 }
 0x3cf   :  { %6339 = vmatprep.subr.bf16.mxu0 %v8544_v54  ;;  %v8466_v54 = vcombine.high %v2896_v45, %v2904_v36 }
 0x3d1   :  { %6299 = vmatpush2.bf16.msra.mxu1 %v8797_v35  ;;  %v8719_v35 = vcombine.low %v3151_v37, %v3159_v41 }
 0x3d2   :  { %6340 = vmatpush2.bf16.msra.mxu0 %v8543_v59  ;;  %6300 = vmatprep.subr.bf16.mxu1 %v8782_v22  ;;  %v8465_v59 = vcombine.low %v2896_v45, %v2904_v36  ;;  %v8704_v22 = vcombine.high %v3135_v55, %v3143_v57  ;;  %v3056_v45 = vld [vmem:[#allocation9 + $0x728] sm:$0xff] }
 0x3d3   :  { %6341 = vmatprep.subr.bf16.mxu0 %v8528_v60  ;;  %v8450_v60 = vcombine.high %v2880_v58, %v2888_v4  ;;  %v3064_v36 = vld [vmem:[#allocation9 + $0x768] sm:$0xff] }
 0x3d5   :  { %6301 = vmatpush2.bf16.msra.mxu1 %v8781_v6  ;;  %v8703_v6 = vcombine.low %v3135_v55, %v3143_v57  ;;  %v3040_v55 = vld [vmem:[#allocation9 + $0x6a8] sm:$0xff] }
 0x3d6   :  { %6342 = vmatpush2.bf16.msra.mxu0 %v8527_v49  ;;  %6352 = vmatprep.subr.bf16.mxu1 %v8768_v8  ;;  %v8449_v49 = vcombine.low %v2880_v58, %v2888_v4  ;;  %v8688_v8 = vcombine.high %v3119_v61, %v3127_v28  ;;  %v3048_v57 = vld [vmem:[#allocation9 + $0x6e8] sm:$0xff]  ;;  %v8625_v4 = vcombine.low %v3056_v45, %v3064_v36 }
 0x3d7   :  { %6393 = vmatprep.subr.bf16.mxu0 %v8514_v11  ;;  %v3103_v11 = vld [vmem:[#allocation9 + $0x8a0] sm:$0xff]  ;;  %v8609_v47 = vcombine.low %v3040_v55, %v3048_v57 }
 0x3d8   :  { %6303 = vmatmul.mubr.bf16.vlgmr.msra.gmra.mxu1 %v10292_v19  ;;  %v6058_v32 = vpop.f32.mrf.mxu1  ;;  %v10322_v24 = vpop.f32.mrf.mxu0  ;;  %v8672_v26 = vcombine.high %v3103_v11, %v3111_v13 }
 0x3d9   :  { %v10325_v1 = vadd.f32 %v6058_v32, %v6018_v21  ;;  %6344 = vmatmul.mubr.bf16.vlgmr.msra.gmra.mxu0 %v10276_v43  ;;  %6353 = vmatpush1.bf16.msra.mxu1 %v8767_v18  ;;  %v8687_v18 = vcombine.low %v3119_v61, %v3127_v28  ;;  %v3087_v21 = vld [vmem:[#allocation9 + $0x820] sm:$0xff]  ;;  %v8671_v32 = vcombine.low %v3103_v11, %v3111_v13  ;;  %v3024_v61 = vld [vmem:[#allocation9 + $0x628] sm:$0xff] }
 0x3da   :  { %6384 = vmatprep.mubr.bf16.mxu1 %v10290_v3  ;;  %6394 = vmatpush1.bf16.msra.mxu0 %v8513_v20  ;;  %v6060_v16 = vpop.f32.mrf.mxu1  ;;  %v10329_v38 = vpop.f32.mrf.mxu0  ;;  %v8418_v20 = vcombine.high %v2848_v14, %v2856_v17  ;;  %v3032_v28 = vld [vmem:[#allocation9 + $0x668] sm:$0xff] }
 0x3db   :  { %6425 = vmatprep.mubr.bf16.mxu0 %v10274_v42  ;;  %v10332_v40 = vadd.f32 %v6060_v16, %v6020_v7  ;;  %6354 = vmatprep.subr.bf16.mxu1 %v8752_v29  ;;  %v3095_v29 = vld [vmem:[#allocation9 + $0x860] sm:$0xff]  ;;  %v3072_v16 = vld [vmem:[#allocation9 + $0x7a8] sm:$0xff] }
 0x3dc   :  { %v6062_v44 = vpop.f32.mrf.mxu1  ;;  %v6103_v51 = vpop.f32.mrf.mxu0  ;;  %6395 = vmatprep.subr.bf16.mxu0 %v8498_v25  ;;  %v8417_v25 = vcombine.low %v2848_v14, %v2856_v17  ;;  %v8656_v27 = vcombine.high %v3087_v21, %v3095_v29  ;;  %v3327_v7 = vld [vmem:[#allocation9 + $0xfa0] sm:$0xff]  ;;  %v3008_v11 = vld [vmem:[#allocation9 + $0x5a8] sm:$0xff]  ;;  %v8593_v17 = vcombine.low %v3024_v61, %v3032_v28 }
 0x3dd   :  { %6355 = vmatpush1.bf16.msra.mxu1 %v8751_v56  ;;  %v3335_v56 = vld [vmem:[#allocation9 + $0xfe0] sm:$0xff]  ;;  %v3016_v13 = vld [vmem:[#allocation9 + $0x5e8] sm:$0xff] }
 0x3de   :  { %6396 = vmatpush1.bf16.msra.mxu0 %v8497_v34  ;;  %v6063_v48 = vpop.f32.mrf.mxu1  ;;  %v6104_v50 = vpop.f32.mrf.mxu0  ;;  %6356 = vmatprep.subr.bf16.mxu1 %v8736_v39  ;;  %v3080_v34 = vld [vmem:[#allocation9 + $0x7e8] sm:$0xff]  ;;  %v8655_v39 = vcombine.low %v3087_v21, %v3095_v29  ;;  %v8896_v37 = vcombine.high %v3327_v7, %v3335_v56  ;;  %v3311_v44 = vld [vmem:[#allocation9 + $0xf20] sm:$0xff] }
 0x3df   :  { %6397 = vmatprep.subr.bf16.mxu0 %v8482_v5  ;;  %v8401_v5 = vcombine.low %v2832_v30, %v2840_v31  ;;  %v8642_v41 = vcombine.high %v3072_v16, %v3080_v34  ;;  %v3319_v51 = vld [vmem:[#allocation9 + $0xf60] sm:$0xff]  ;;  %v8641_v48 = vcombine.low %v3072_v16, %v3080_v34  ;;  %v2992_v21 = vld [vmem:[#allocation9 + $0x528] sm:$0xff]  ;;  %v8577_v31 = vcombine.low %v3008_v11, %v3016_v13 }
 0x3e0   :  { %v8880_v50 = vcombine.high %v3311_v44, %v3319_v51  ;;  %v8879_v58 = vcombine.low %v3311_v44, %v3319_v51  ;;  %v3000_v29 = vld [vmem:[#allocation9 + $0x568] sm:$0xff] }
 0x3e1   :  { %6357 = vmatpush1.bf16.msra.mxu1 %v8735_v46  ;;  %v8895_v46 = vcombine.low %v3327_v7, %v3335_v56  ;;  %v2976_v7 = vld [vmem:[#allocation9 + $0x4a8] sm:$0xff]  ;;  %v8561_v34 = vcombine.low %v2992_v21, %v3000_v29 }
 0x3e2   :  { %6398 = vmatpush1.bf16.msra.mxu0 %v8481_v52  ;;  %6358 = vmatprep.subr.bf16.mxu1 %v8720_v53  ;;  %v8626_v52 = vcombine.high %v3056_v45, %v3064_v36  ;;  %v3295_v53 = vld [vmem:[#allocation9 + $0xea0] sm:$0xff]  ;;  %v2984_v56 = vld [vmem:[#allocation9 + $0x4e8] sm:$0xff] }
 0x3e3   :  { %6399 = vmatprep.subr.bf16.mxu0 %v8466_v54  ;;  %v3303_v54 = vld [vmem:[#allocation9 + $0xee0] sm:$0xff]  ;;  %v2960_v44 = vld [vmem:[#allocation9 + $0x428] sm:$0xff]  ;;  %v8545_v36 = vcombine.low %v2976_v7, %v2984_v56 }
 0x3e4   :  { %v8863_v62 = vcombine.low %v3295_v53, %v3303_v54  ;;  %v2968_v51 = vld [vmem:[#allocation9 + $0x468] sm:$0xff] }
 0x3e5   :  { %6359 = vmatpush1.bf16.msra.mxu1 %v8719_v35  ;;  %v8864_v35 = vcombine.high %v3295_v53, %v3303_v54  ;;  %v2945_v53 = vld [vmem:[#allocation9 + $0x3b0] sm:$0xff] }
 0x3e6   :  { %6400 = vmatpush1.bf16.msra.mxu0 %v8465_v59  ;;  %6360 = vmatprep.subr.bf16.mxu1 %v8704_v22  ;;  %v8610_v59 = vcombine.high %v3040_v55, %v3048_v57  ;;  %v3279_v22 = vld [vmem:[#allocation9 + $0xe20] sm:$0xff]  ;;  %v2953_v54 = vld [vmem:[#allocation9 + $0x3f0] sm:$0xff]  ;;  %v8529_v57 = vcombine.low %v2960_v44, %v2968_v51 }
 0x3e7   :  { %6401 = vmatprep.subr.bf16.mxu0 %v8450_v60  ;;  %v3287_v60 = vld [vmem:[#allocation9 + $0xe60] sm:$0xff] }
 0x3e8   :  { %v8847_v14 = vcombine.low %v3279_v22, %v3287_v60 }
 0x3e9   :  { %6361 = vmatpush1.bf16.msra.mxu1 %v8703_v6  ;;  %v8848_v6 = vcombine.high %v3279_v22, %v3287_v60  ;;  %v3192_v22 = vld [vmem:[#allocation9 + $0xb68] sm:$0xff]  ;;  %v3358_v60 = vrot.slane %v10314_v15, %v10230_v12 }
 0x3ea   :  { %6402 = vmatpush1.bf16.msra.mxu0 %v8449_v49  ;;  %6362 = vmatprep.subr.bf16.mxu1 %v8688_v8  ;;  %v8594_v49 = vcombine.high %v3024_v61, %v3032_v28  ;;  %v3263_v8 = vld [vmem:[#allocation9 + $0xda0] sm:$0xff]  ;;  %v2929_v28 = vld [vmem:[#allocation9 + $0x330] sm:$0xff] }
 0x3eb   :  { %6403 = vmatprep.subr.bf16.mxu0 %v8434_v9  ;;  %v3271_v9 = vld [vmem:[#allocation9 + $0xde0] sm:$0xff] }
 0x3ec   :  { %v8831_v30 = vcombine.low %v3263_v8, %v3271_v9 }
 0x3ed   :  { %6363 = vmatpush1.bf16.msra.mxu1 %v8687_v18  ;;  %v8832_v18 = vcombine.high %v3263_v8, %v3271_v9  ;;  %v3168_v8 = vld [vmem:[#allocation9 + $0xaa8] sm:$0xff] }
 0x3ee   :  { %6404 = vmatpush1.bf16.msra.mxu0 %v8433_v23  ;;  %6364 = vmatprep.subr.bf16.mxu1 %v8672_v26  ;;  %v8578_v23 = vcombine.high %v3008_v11, %v3016_v13  ;;  %v3247_v26 = vld [vmem:[#allocation9 + $0xd20] sm:$0xff]  ;;  %v3176_v9 = vld [vmem:[#allocation9 + $0xae8] sm:$0xff] }
 0x3ef   :  { %6405 = vmatprep.subr.bf16.mxu0 %v8418_v20  ;;  %v3255_v20 = vld [vmem:[#allocation9 + $0xd60] sm:$0xff] }
 0x3f0   :  { %v8815_v16 = vcombine.low %v3247_v26, %v3255_v20 }
 0x3f1   :  { %6365 = vmatpush1.bf16.msra.mxu1 %v8671_v32  ;;  %v8816_v32 = vcombine.high %v3247_v26, %v3255_v20 }
 0x3f2   :  { %6406 = vmatpush1.bf16.msra.mxu0 %v8417_v25  ;;  %6366 = vmatprep.subr.bf16.mxu1 %v8656_v27  ;;  %v8562_v25 = vcombine.high %v2992_v21, %v3000_v29  ;;  %v3231_v27 = vld [vmem:[#allocation9 + $0xca0] sm:$0xff]  ;;  %v8738_v29 = vcombine.high %v3168_v8, %v3176_v9 }
 0x3f3   :  { %6407 = vmatprep.subr.bf16.mxu0 %v8402_v33  ;;  %v3239_v33 = vld [vmem:[#allocation9 + $0xce0] sm:$0xff] }
 0x3f4   :  { %v8799_v45 = vcombine.low %v3231_v27, %v3239_v33 }
 0x3f5   :  { %6367 = vmatpush1.bf16.msra.mxu1 %v8655_v39  ;;  %v8800_v39 = vcombine.high %v3231_v27, %v3239_v33  ;;  %v2897_v33 = vld [vmem:[#allocation9 + $0x230] sm:$0xff] }
 0x3f6   :  { %6408 = vmatpush1.bf16.msra.mxu0 %v8401_v5  ;;  %6368 = vmatprep.subr.bf16.mxu1 %v8896_v37  ;;  %v8546_v5 = vcombine.high %v2976_v7, %v2984_v56  ;;  %v3215_v37 = vld [vmem:[#allocation9 + $0xc20] sm:$0xff]  ;;  %v2905_v7 = vld [vmem:[#allocation9 + $0x270] sm:$0xff] }
 0x3f7   :  { %6409 = vmatprep.subr.bf16.mxu0 %v8642_v41  ;;  %v3223_v41 = vld [vmem:[#allocation9 + $0xc60] sm:$0xff] }
 0x3f8   :  { %v8783_v55 = vcombine.low %v3215_v37, %v3223_v41 }
 0x3f9   :  { %6369 = vmatpush2.bf16.msra.mxu1 %v8895_v46  ;;  %v8784_v46 = vcombine.high %v3215_v37, %v3223_v41  ;;  %v8468_v41 = vcombine.high %v2897_v33, %v2905_v7 }
 0x3fa   :  { %6410 = vmatpush2.bf16.msra.mxu0 %v8641_v48  ;;  %6370 = vmatprep.subr.bf16.mxu1 %v8880_v50  ;;  %v8530_v48 = vcombine.high %v2960_v44, %v2968_v51  ;;  %v3200_v50 = vld [vmem:[#allocation9 + $0xba8] sm:$0xff] }
 0x3fb   :  { %6411 = vmatprep.subr.bf16.mxu0 %v8626_v52  ;;  %v3208_v52 = vld [vmem:[#allocation9 + $0xbe8] sm:$0xff] }
 0x3fc   :  { %v8769_v61 = vcombine.low %v3200_v50, %v3208_v52  ;;  %v3136_v44 = vld [vmem:[#allocation9 + $0x9a8] sm:$0xff] }
 0x3fd   :  { %6371 = vmatpush2.bf16.msra.mxu1 %v8879_v58  ;;  %v8770_v58 = vcombine.high %v3200_v50, %v3208_v52  ;;  %v3144_v51 = vld [vmem:[#allocation9 + $0x9e8] sm:$0xff] }
 0x3fe   :  { %6412 = vmatpush2.bf16.msra.mxu0 %v8625_v4  ;;  %6372 = vmatprep.subr.bf16.mxu1 %v8864_v35  ;;  %v3354_v4 = vrot.slane %v10314_v15, %v10227_v10  ;;  %v8516_v35 = vcombine.high %v2945_v53, %v2953_v54  ;;  %v8706_v50 = vcombine.high %v3136_v44, %v3144_v51 }
 0x3ff   :  { %6413 = vmatprep.subr.bf16.mxu0 %v8610_v59  ;;  %v3184_v59 = vld [vmem:[#allocation9 + $0xb28] sm:$0xff] }
 0x401   :  { %6373 = vmatpush2.bf16.msra.mxu1 %v8863_v62  ;;  %v2937_v62 = vld [vmem:[#allocation9 + $0x370] sm:$0xff] }
 0x402   :  { %6414 = vmatpush2.bf16.msra.mxu0 %v8609_v47  ;;  %6374 = vmatprep.subr.bf16.mxu1 %v8848_v6  ;;  %v8515_v47 = vcombine.low %v2945_v53, %v2953_v54  ;;  %v6100_v6 = vadd.f32 %v10322_v24, %v3354_v4  ;;  %v8500_v13 = vcombine.high %v2929_v28, %v2937_v62  ;;  %v3120_v53 = vld [vmem:[#allocation9 + $0x928] sm:$0xff] }
 0x403   :  { %6415 = vmatprep.subr.bf16.mxu0 %v8594_v49  ;;  %v8754_v49 = vcombine.high %v3184_v59, %v3192_v22  ;;  %v8753_v24 = vcombine.low %v3184_v59, %v3192_v22  ;;  %v8499_v21 = vcombine.low %v2929_v28, %v2937_v62  ;;  %v3128_v54 = vld [vmem:[#allocation9 + $0x968] sm:$0xff]  ;;  %v2857_v28 = vld [vmem:[#allocation9 + $0xf0] sm:$0xff] }
 0x404   :  { %v3104_v22 = vld [vmem:[#allocation9 + $0x8a8] sm:$0xff]  ;;  %v8689_v62 = vcombine.low %v3120_v53, %v3128_v54 }
 0x405   :  { %6375 = vmatpush2.bf16.msra.mxu1 %v8847_v14  ;;  %v2913_v14 = vld [vmem:[#allocation9 + $0x2b0] sm:$0xff] }
 0x406   :  { %6416 = vmatpush2.bf16.msra.mxu0 %v8593_v17  ;;  %6376 = vmatprep.subr.bf16.mxu1 %v8832_v18  ;;  %v2921_v17 = vld [vmem:[#allocation9 + $0x2f0] sm:$0xff]  ;;  %v6102_v18 = vadd.f32 %v10329_v38, %v3358_v60  ;;  %v3112_v60 = vld [vmem:[#allocation9 + $0x8e8] sm:$0xff] }
 0x407   :  { %6417 = vmatprep.subr.bf16.mxu0 %v8578_v23  ;;  %v8484_v38 = vcombine.high %v2913_v14, %v2921_v17 }
 0x409   :  { %6377 = vmatpush2.bf16.msra.mxu1 %v8831_v30 }
 0x40a   :  { %6418 = vmatpush2.bf16.msra.mxu0 %v8577_v31  ;;  %6378 = vmatprep.subr.bf16.mxu1 %v8816_v32  ;;  %v3152_v32 = vld [vmem:[#allocation9 + $0xa28] sm:$0xff] }
 0x40b   :  { %6419 = vmatprep.subr.bf16.mxu0 %v8562_v25  ;;  %v3160_v25 = vld [vmem:[#allocation9 + $0xa68] sm:$0xff] }
 0x40d   :  { %6379 = vmatpush2.bf16.msra.mxu1 %v8815_v16  ;;  %v8737_v16 = vcombine.low %v3168_v8, %v3176_v9  ;;  %v3088_v8 = vld [vmem:[#allocation9 + $0x828] sm:$0xff] }
 0x40e   :  { %6420 = vmatpush2.bf16.msra.mxu0 %v8561_v34  ;;  %6380 = vmatprep.subr.bf16.mxu1 %v8800_v39  ;;  %v8483_v39 = vcombine.low %v2913_v14, %v2921_v17  ;;  %v3096_v9 = vld [vmem:[#allocation9 + $0x868] sm:$0xff]  ;;  %v8673_v14 = vcombine.low %v3104_v22, %v3112_v60 }
 0x40f   :  { %6421 = vmatprep.subr.bf16.mxu0 %v8546_v5  ;;  %v8722_v5 = vcombine.high %v3152_v32, %v3160_v25 }
 0x411   :  { %6381 = vmatpush2.bf16.msra.mxu1 %v8799_v45  ;;  %v2881_v45 = vld [vmem:[#allocation9 + $0x1b0] sm:$0xff] }
 0x412   :  { %6422 = vmatpush2.bf16.msra.mxu0 %v8545_v36  ;;  %6382 = vmatprep.subr.bf16.mxu1 %v8784_v46  ;;  %v2889_v36 = vld [vmem:[#allocation9 + $0x1f0] sm:$0xff]  ;;  %v8721_v46 = vcombine.low %v3152_v32, %v3160_v25  ;;  %v8657_v32 = vcombine.low %v3088_v8, %v3096_v9 }
 0x413   :  { %6423 = vmatprep.subr.bf16.mxu0 %v8530_v48  ;;  %v8467_v48 = vcombine.low %v2897_v33, %v2905_v7  ;;  %v8452_v52 = vcombine.high %v2881_v45, %v2889_v36  ;;  %v8451_v4 = vcombine.low %v2881_v45, %v2889_v36  ;;  %v3312_v7 = vld [vmem:[#allocation9 + $0xf28] sm:$0xff]  ;;  %v3041_v45 = vld [vmem:[#allocation9 + $0x6b0] sm:$0xff] }
 0x414   :  { %v3049_v36 = vld [vmem:[#allocation9 + $0x6f0] sm:$0xff] }
 0x415   :  { %6383 = vmatpush2.bf16.msra.mxu1 %v8783_v55  ;;  %v2865_v55 = vld [vmem:[#allocation9 + $0x130] sm:$0xff] }
 0x416   :  { %6424 = vmatpush2.bf16.msra.mxu0 %v8529_v57  ;;  %6434 = vmatprep.subr.bf16.mxu1 %v8770_v58  ;;  %v2873_v57 = vld [vmem:[#allocation9 + $0x170] sm:$0xff]  ;;  %v8705_v58 = vcombine.low %v3136_v44, %v3144_v51  ;;  %v3296_v44 = vld [vmem:[#allocation9 + $0xea8] sm:$0xff] }
 0x417   :  { %6475 = vmatprep.subr.bf16.mxu0 %v8516_v35  ;;  %v8690_v35 = vcombine.high %v3120_v53, %v3128_v54  ;;  %v8436_v59 = vcombine.high %v2865_v55, %v2873_v57  ;;  %v3304_v51 = vld [vmem:[#allocation9 + $0xee8] sm:$0xff] }
 0x418   :  { %v6140_v11 = vpop.f32.mrf.mxu1  ;;  %6385 = vmatmul.mubr.bf16.vlgmr.msra.gmra.mxu1 %v10292_v19  ;;  %v3280_v53 = vld [vmem:[#allocation9 + $0xe28] sm:$0xff] }
 0x419   :  { %v10341_v23 = vadd.f32 %v6140_v11, %v6100_v6  ;;  %v10343_v26 = vpop.f32.mrf.mxu0  ;;  %6426 = vmatmul.mubr.bf16.vlgmr.msra.gmra.mxu0 %v10276_v43  ;;  %6435 = vmatpush1.bf16.msra.mxu1 %v8769_v61  ;;  %v2849_v61 = vld [vmem:[#allocation9 + $0xb0] sm:$0xff]  ;;  %v8674_v6 = vcombine.high %v3104_v22, %v3112_v60  ;;  %v3288_v54 = vld [vmem:[#allocation9 + $0xe68] sm:$0xff] }
 0x41a   :  { %6466 = vmatprep.mubr.bf16.mxu1 %v10290_v3  ;;  %v6142_v20 = vpop.f32.mrf.mxu1  ;;  %6476 = vmatpush1.bf16.msra.mxu0 %v8515_v47  ;;  %v8435_v47 = vcombine.low %v2865_v55, %v2873_v57  ;;  %v2833_v11 = vld [vmem:[#allocation9 + $0x30] sm:$0xff]  ;;  %v8419_v17 = vcombine.low %v2849_v61, %v2857_v28  ;;  %v3264_v22 = vld [vmem:[#allocation9 + $0xda8] sm:$0xff] }
 0x41b   :  { %v10347_v30 = vadd.f32 %v6142_v20, %v6102_v18  ;;  %6507 = vmatprep.mubr.bf16.mxu0 %v10274_v42  ;;  %v10350_v31 = vpop.f32.mrf.mxu0  ;;  %6436 = vmatprep.subr.bf16.mxu1 %v8754_v49  ;;  %v8420_v49 = vcombine.high %v2849_v61, %v2857_v28  ;;  %v8658_v18 = vcombine.high %v3088_v8, %v3096_v9  ;;  %v3328_v20 = vld [vmem:[#allocation9 + $0xfa8] sm:$0xff]  ;;  %v3025_v55 = vld [vmem:[#allocation9 + $0x630] sm:$0xff] }
 0x41c   :  { %v6144_v27 = vpop.f32.mrf.mxu1  ;;  %6477 = vmatprep.subr.bf16.mxu0 %v8500_v13  ;;  %v2841_v13 = vld [vmem:[#allocation9 + $0x70] sm:$0xff]  ;;  %v3272_v60 = vld [vmem:[#allocation9 + $0xde8] sm:$0xff] }
 0x41d   :  { %v6185_v56 = vpop.f32.mrf.mxu0  ;;  %6437 = vmatpush1.bf16.msra.mxu1 %v8753_v24  ;;  %v8404_v24 = vcombine.high %v2833_v11, %v2841_v13  ;;  %v8403_v25 = vcombine.low %v2833_v11, %v2841_v13  ;;  %v3033_v57 = vld [vmem:[#allocation9 + $0x670] sm:$0xff]  ;;  %v3248_v8 = vld [vmem:[#allocation9 + $0xd28] sm:$0xff] }
 0x41e   :  { %v6145_v34 = vpop.f32.mrf.mxu1  ;;  %6478 = vmatpush1.bf16.msra.mxu0 %v8499_v21  ;;  %6438 = vmatprep.subr.bf16.mxu1 %v8738_v29  ;;  %v3336_v21 = vld [vmem:[#allocation9 + $0xfe8] sm:$0xff]  ;;  %v3073_v29 = vld [vmem:[#allocation9 + $0x7b0] sm:$0xff] }
 0x41f   :  { %v6186_v37 = vpop.f32.mrf.mxu0  ;;  %6479 = vmatprep.subr.bf16.mxu0 %v8484_v38  ;;  %v3081_v38 = vld [vmem:[#allocation9 + $0x7f0] sm:$0xff]  ;;  %v8898_v27 = vcombine.high %v3328_v20, %v3336_v21  ;;  %v3320_v56 = vld [vmem:[#allocation9 + $0xf68] sm:$0xff] }
 0x420   :  { %v8644_v33 = vcombine.high %v3073_v29, %v3081_v38  ;;  %v3065_v34 = vld [vmem:[#allocation9 + $0x770] sm:$0xff]  ;;  %v8882_v37 = vcombine.high %v3312_v7, %v3320_v56  ;;  %v3256_v9 = vld [vmem:[#allocation9 + $0xd68] sm:$0xff] }
 0x421   :  { %6439 = vmatpush1.bf16.msra.mxu1 %v8737_v16  ;;  %v3057_v16 = vld [vmem:[#allocation9 + $0x730] sm:$0xff] }
 0x422   :  { %6480 = vmatpush1.bf16.msra.mxu0 %v8483_v39  ;;  %6440 = vmatprep.subr.bf16.mxu1 %v8722_v5  ;;  %v8897_v39 = vcombine.low %v3328_v20, %v3336_v21  ;;  %v8643_v5 = vcombine.low %v3073_v29, %v3081_v38  ;;  %v3009_v61 = vld [vmem:[#allocation9 + $0x5b0] sm:$0xff]  ;;  %v3232_v20 = vld [vmem:[#allocation9 + $0xca8] sm:$0xff] }
 0x423   :  { %6481 = vmatprep.subr.bf16.mxu0 %v8468_v41  ;;  %v8628_v41 = vcombine.high %v3057_v16, %v3065_v34  ;;  %v3017_v28 = vld [vmem:[#allocation9 + $0x5f0] sm:$0xff]  ;;  %v3240_v21 = vld [vmem:[#allocation9 + $0xce8] sm:$0xff] }
 0x424   :  { %v2993_v11 = vld [vmem:[#allocation9 + $0x530] sm:$0xff] }
 0x425   :  { %6441 = vmatpush1.bf16.msra.mxu1 %v8721_v46  ;;  %v8881_v46 = vcombine.low %v3312_v7, %v3320_v56  ;;  %v3001_v13 = vld [vmem:[#allocation9 + $0x570] sm:$0xff]  ;;  %v3216_v7 = vld [vmem:[#allocation9 + $0xc28] sm:$0xff] }
 0x426   :  { %6482 = vmatpush1.bf16.msra.mxu0 %v8467_v48  ;;  %6442 = vmatprep.subr.bf16.mxu1 %v8706_v50  ;;  %v8627_v48 = vcombine.low %v3057_v16, %v3065_v34  ;;  %v8866_v50 = vcombine.high %v3296_v44, %v3304_v51  ;;  %v2977_v29 = vld [vmem:[#allocation9 + $0x4b0] sm:$0xff]  ;;  %v3224_v56 = vld [vmem:[#allocation9 + $0xc68] sm:$0xff] }
 0x427   :  { %6483 = vmatprep.subr.bf16.mxu0 %v8452_v52  ;;  %v8612_v52 = vcombine.high %v3041_v45, %v3049_v36  ;;  %v2985_v38 = vld [vmem:[#allocation9 + $0x4f0] sm:$0xff] }
 0x428   :  { %v2961_v16 = vld [vmem:[#allocation9 + $0x430] sm:$0xff] }
 0x429   :  { %6443 = vmatpush1.bf16.msra.mxu1 %v8705_v58  ;;  %v8865_v58 = vcombine.low %v3296_v44, %v3304_v51  ;;  %v2969_v34 = vld [vmem:[#allocation9 + $0x470] sm:$0xff] }
 0x42a   :  { %6484 = vmatpush1.bf16.msra.mxu0 %v8451_v4  ;;  %6444 = vmatprep.subr.bf16.mxu1 %v8690_v35  ;;  %v8611_v4 = vcombine.low %v3041_v45, %v3049_v36  ;;  %v8850_v35 = vcombine.high %v3280_v53, %v3288_v54  ;;  %v8532_v44 = vcombine.high %v2961_v16, %v2969_v34  ;;  %v3201_v51 = vld [vmem:[#allocation9 + $0xbb0] sm:$0xff]  ;;  %v2946_v36 = vld [vmem:[#allocation9 + $0x3b8] sm:$0xff] }
 0x42b   :  { %6485 = vmatprep.subr.bf16.mxu0 %v8436_v59  ;;  %v8596_v59 = vcombine.high %v3025_v55, %v3033_v57  ;;  %v3209_v45 = vld [vmem:[#allocation9 + $0xbf0] sm:$0xff] }
 0x42d   :  { %6445 = vmatpush1.bf16.msra.mxu1 %v8689_v62  ;;  %v8849_v62 = vcombine.low %v3280_v53, %v3288_v54  ;;  %v8772_v53 = vcombine.high %v3201_v51, %v3209_v45 }
 0x42e   :  { %6486 = vmatpush1.bf16.msra.mxu0 %v8435_v47  ;;  %6446 = vmatprep.subr.bf16.mxu1 %v8674_v6  ;;  %v8595_v47 = vcombine.low %v3025_v55, %v3033_v57  ;;  %v8834_v6 = vcombine.high %v3264_v22, %v3272_v60  ;;  %v3185_v57 = vld [vmem:[#allocation9 + $0xb30] sm:$0xff] }
 0x42f   :  { %6487 = vmatprep.subr.bf16.mxu0 %v8420_v49  ;;  %v8580_v49 = vcombine.high %v3009_v61, %v3017_v28 }
 0x431   :  { %6447 = vmatpush1.bf16.msra.mxu1 %v8673_v14  ;;  %v8833_v14 = vcombine.low %v3264_v22, %v3272_v60  ;;  %v2938_v22 = vld [vmem:[#allocation9 + $0x378] sm:$0xff] }
 0x432   :  { %6488 = vmatpush1.bf16.msra.mxu0 %v8419_v17  ;;  %6448 = vmatprep.subr.bf16.mxu1 %v8658_v18  ;;  %v8579_v17 = vcombine.low %v3009_v61, %v3017_v28  ;;  %v8818_v18 = vcombine.high %v3248_v8, %v3256_v9 }
 0x433   :  { %6489 = vmatprep.subr.bf16.mxu0 %v8404_v24  ;;  %v8564_v24 = vcombine.high %v2993_v11, %v3001_v13 }
 0x435   :  { %6449 = vmatpush1.bf16.msra.mxu1 %v8657_v32  ;;  %v8817_v32 = vcombine.low %v3248_v8, %v3256_v9  ;;  %v2914_v8 = vld [vmem:[#allocation9 + $0x2b8] sm:$0xff] }
 0x436   :  { %6490 = vmatpush1.bf16.msra.mxu0 %v8403_v25  ;;  %6450 = vmatprep.subr.bf16.mxu1 %v8898_v27  ;;  %v8563_v25 = vcombine.low %v2993_v11, %v3001_v13  ;;  %v8802_v27 = vcombine.high %v3232_v20, %v3240_v21  ;;  %v2922_v9 = vld [vmem:[#allocation9 + $0x2f8] sm:$0xff] }
 0x437   :  { %6491 = vmatprep.subr.bf16.mxu0 %v8644_v33  ;;  %v8548_v33 = vcombine.high %v2977_v29, %v2985_v38 }
 0x439   :  { %6451 = vmatpush2.bf16.msra.mxu1 %v8897_v39  ;;  %v8801_v39 = vcombine.low %v3232_v20, %v3240_v21  ;;  %v3153_v21 = vld [vmem:[#allocation9 + $0xa30] sm:$0xff] }
 0x43a   :  { %6492 = vmatpush2.bf16.msra.mxu0 %v8643_v5  ;;  %6452 = vmatprep.subr.bf16.mxu1 %v8882_v37  ;;  %v8547_v5 = vcombine.low %v2977_v29, %v2985_v38  ;;  %v8786_v37 = vcombine.high %v3216_v7, %v3224_v56  ;;  %v3161_v29 = vld [vmem:[#allocation9 + $0xa70] sm:$0xff] }
 0x43b   :  { %6493 = vmatprep.subr.bf16.mxu0 %v8628_v41  ;;  %v3361_v41 = vsub.s32 4, %v10200_v63 }
 0x43d   :  { %6453 = vmatpush2.bf16.msra.mxu1 %v8881_v46  ;;  %v2954_v46 = vld [vmem:[#allocation9 + $0x3f8] sm:$0xff]  ;;  %v3362_v54 = vrot.slane %v10314_v15, %v3361_v41 }
 0x43e   :  { %6494 = vmatpush2.bf16.msra.mxu0 %v8627_v48  ;;  %6454 = vmatprep.subr.bf16.mxu1 %v8866_v50  ;;  %v3365_v48 = vsub.s32 5, %v10200_v63  ;;  %v8785_v50 = vcombine.low %v3216_v7, %v3224_v56  ;;  %v8518_v55 = vcombine.high %v2946_v36, %v2954_v46  ;;  %v8517_v60 = vcombine.low %v2946_v36, %v2954_v46 }
 0x43f   :  { %6495 = vmatprep.subr.bf16.mxu0 %v8612_v52  ;;  %v8531_v52 = vcombine.low %v2961_v16, %v2969_v34  ;;  %v6182_v61 = vadd.f32 %v10343_v26, %v3362_v54  ;;  %v8485_v56 = vcombine.low %v2914_v8, %v2922_v9  ;;  %v8724_v16 = vcombine.high %v3153_v21, %v3161_v29  ;;  %v2874_v54 = vld [vmem:[#allocation9 + $0x178] sm:$0xff] }
 0x441   :  { %6455 = vmatpush2.bf16.msra.mxu1 %v8865_v58  ;;  %v3193_v58 = vld [vmem:[#allocation9 + $0xb70] sm:$0xff] }
 0x442   :  { %6496 = vmatpush2.bf16.msra.mxu0 %v8611_v4  ;;  %6456 = vmatprep.subr.bf16.mxu1 %v8850_v35  ;;  %v3366_v4 = vrot.slane %v10314_v15, %v3365_v48  ;;  %v8771_v35 = vcombine.low %v3201_v51, %v3209_v45  ;;  %v8756_v28 = vcombine.high %v3185_v57, %v3193_v58 }
 0x443   :  { %6497 = vmatprep.subr.bf16.mxu0 %v8596_v59  ;;  %v2930_v59 = vld [vmem:[#allocation9 + $0x338] sm:$0xff]  ;;  %v8755_v26 = vcombine.low %v3185_v57, %v3193_v58  ;;  %v8723_v51 = vcombine.low %v3153_v21, %v3161_v29 }
 0x444   :  { %v6184_v15 = vadd.f32 %v10350_v31, %v3366_v4  ;;  %v8486_v31 = vcombine.high %v2914_v8, %v2922_v9  ;;  %v2834_v8 = vld [vmem:[#allocation9 + $0x38] sm:$0xff] }
 0x445   :  { %6457 = vmatpush2.bf16.msra.mxu1 %v8849_v62  ;;  %v3169_v62 = vld [vmem:[#allocation9 + $0xab0] sm:$0xff]  ;;  %v2842_v9 = vld [vmem:[#allocation9 + $0x78] sm:$0xff] }
 0x446   :  { %6498 = vmatpush2.bf16.msra.mxu0 %v8595_v47  ;;  %6458 = vmatprep.subr.bf16.mxu1 %v8834_v6  ;;  %v3177_v47 = vld [vmem:[#allocation9 + $0xaf0] sm:$0xff]  ;;  %v3074_v21 = vld [vmem:[#allocation9 + $0x7b8] sm:$0xff] }
 0x447   :  { %6499 = vmatprep.subr.bf16.mxu0 %v8580_v49  ;;  %v8502_v49 = vcombine.high %v2930_v59, %v2938_v22  ;;  %v3082_v29 = vld [vmem:[#allocation9 + $0x7f8] sm:$0xff] }
 0x449   :  { %6459 = vmatpush2.bf16.msra.mxu1 %v8833_v14 }
 0x44a   :  { %6500 = vmatpush2.bf16.msra.mxu0 %v8579_v17  ;;  %6460 = vmatprep.subr.bf16.mxu1 %v8818_v18  ;;  %v8501_v17 = vcombine.low %v2930_v59, %v2938_v22  ;;  %v8740_v18 = vcombine.high %v3169_v62, %v3177_v47  ;;  %v3113_v59 = vld [vmem:[#allocation9 + $0x8f0] sm:$0xff]  ;;  %v2850_v22 = vld [vmem:[#allocation9 + $0xb8] sm:$0xff] }
 0x44b   :  { %6501 = vmatprep.subr.bf16.mxu0 %v8564_v24 }
 0x44d   :  { %6461 = vmatpush2.bf16.msra.mxu1 %v8817_v32  ;;  %v2898_v32 = vld [vmem:[#allocation9 + $0x238] sm:$0xff] }
 0x44e   :  { %6502 = vmatpush2.bf16.msra.mxu0 %v8563_v25  ;;  %6462 = vmatprep.subr.bf16.mxu1 %v8802_v27  ;;  %v2906_v25 = vld [vmem:[#allocation9 + $0x278] sm:$0xff] }
 0x44f   :  { %6503 = vmatprep.subr.bf16.mxu0 %v8548_v33  ;;  %v8739_v33 = vcombine.low %v3169_v62, %v3177_v47  ;;  %v8469_v45 = vcombine.low %v2898_v32, %v2906_v25 }
 0x451   :  { %6463 = vmatpush2.bf16.msra.mxu1 %v8801_v39  ;;  %v3137_v39 = vld [vmem:[#allocation9 + $0x9b0] sm:$0xff] }
 0x452   :  { %6504 = vmatpush2.bf16.msra.mxu0 %v8547_v5  ;;  %6464 = vmatprep.subr.bf16.mxu1 %v8786_v37  ;;  %v3145_v5 = vld [vmem:[#allocation9 + $0x9f0] sm:$0xff]  ;;  %v2882_v37 = vld [vmem:[#allocation9 + $0x1b8] sm:$0xff] }
 0x453   :  { %6505 = vmatprep.subr.bf16.mxu0 %v8532_v44  ;;  %v2890_v44 = vld [vmem:[#allocation9 + $0x1f8] sm:$0xff]  ;;  %v8708_v36 = vcombine.high %v3137_v39, %v3145_v5 }
 0x454   :  { %v8454_v46 = vcombine.high %v2882_v37, %v2890_v44  ;;  %v8453_v57 = vcombine.low %v2882_v37, %v2890_v44  ;;  %v3297_v37 = vld [vmem:[#allocation9 + $0xeb0] sm:$0xff] }
 0x455   :  { %6465 = vmatpush2.bf16.msra.mxu1 %v8785_v50  ;;  %v3121_v50 = vld [vmem:[#allocation9 + $0x930] sm:$0xff] }
 0x456   :  { %6506 = vmatpush2.bf16.msra.mxu0 %v8531_v52  ;;  %6516 = vmatprep.subr.bf16.mxu1 %v8772_v53  ;;  %v3129_v52 = vld [vmem:[#allocation9 + $0x970] sm:$0xff]  ;;  %v2866_v53 = vld [vmem:[#allocation9 + $0x138] sm:$0xff] }
 0x457   :  { %6557 = vmatprep.subr.bf16.mxu0 %v8518_v55  ;;  %v8707_v55 = vcombine.low %v3137_v39, %v3145_v5  ;;  %v8692_v58 = vcombine.high %v3121_v50, %v3129_v52  ;;  %v8438_v4 = vcombine.high %v2866_v53, %v2874_v54  ;;  %v3305_v44 = vld [vmem:[#allocation9 + $0xef0] sm:$0xff] }
 0x458   :  { %v6222_v6 = vpop.f32.mrf.mxu1  ;;  %6467 = vmatmul.mubr.bf16.vlgmr.msra.gmra.mxu1 %v10292_v19 }
 0x459   :  { %v10363_v11 = vadd.f32 %v6222_v6, %v6182_v61  ;;  %v10365_v13 = vpop.f32.mrf.mxu0  ;;  %6508 = vmatmul.mubr.bf16.vlgmr.msra.gmra.mxu0 %v10276_v43  ;;  %6517 = vmatpush1.bf16.msra.mxu1 %v8771_v35  ;;  %v3105_v35 = vld [vmem:[#allocation9 + $0x8b0] sm:$0xff]  ;;  %v8691_v61 = vcombine.low %v3121_v50, %v3129_v52  ;;  %v8868_v50 = vcombine.high %v3297_v37, %v3305_v44 }
 0x45a   :  { %6548 = vmatprep.mubr.bf16.mxu1 %v10290_v3  ;;  %v6224_v14 = vpop.f32.mrf.mxu1  ;;  %6558 = vmatpush1.bf16.msra.mxu0 %v8517_v60  ;;  %v2858_v60 = vld [vmem:[#allocation9 + $0xf8] sm:$0xff]  ;;  %v8676_v62 = vcombine.high %v3105_v35, %v3113_v59  ;;  %v3089_v6 = vld [vmem:[#allocation9 + $0x830] sm:$0xff] }
 0x45b   :  { %v10369_v24 = vadd.f32 %v6224_v14, %v6184_v15  ;;  %6589 = vmatprep.mubr.bf16.mxu0 %v10274_v42  ;;  %v10372_v20 = vpop.f32.mrf.mxu0  ;;  %6518 = vmatprep.subr.bf16.mxu1 %v8756_v28  ;;  %v8470_v42 = vcombine.high %v2898_v32, %v2906_v25  ;;  %v8437_v28 = vcombine.low %v2866_v53, %v2874_v54  ;;  %v3281_v53 = vld [vmem:[#allocation9 + $0xe30] sm:$0xff] }
 0x45c   :  { %v6226_v38 = vpop.f32.mrf.mxu1  ;;  %6559 = vmatprep.subr.bf16.mxu0 %v8502_v49  ;;  %v8422_v47 = vcombine.high %v2850_v22, %v2858_v60  ;;  %v3097_v49 = vld [vmem:[#allocation9 + $0x870] sm:$0xff]  ;;  %v8675_v15 = vcombine.low %v3105_v35, %v3113_v59  ;;  %v8405_v32 = vcombine.low %v2834_v8, %v2842_v9 }
 0x45d   :  { %v6267_v27 = vpop.f32.mrf.mxu0  ;;  %6519 = vmatpush1.bf16.msra.mxu1 %v8755_v26  ;;  %v8421_v26 = vcombine.low %v2850_v22, %v2858_v60  ;;  %v8660_v14 = vcombine.high %v3089_v6, %v3097_v49  ;;  %v8659_v38 = vcombine.low %v3089_v6, %v3097_v49  ;;  %v3289_v54 = vld [vmem:[#allocation9 + $0xe70] sm:$0xff] }
 0x45e   :  { %v6227_v7 = vpop.f32.mrf.mxu1  ;;  %6560 = vmatpush1.bf16.msra.mxu0 %v8501_v17  ;;  %6520 = vmatprep.subr.bf16.mxu1 %v8740_v18  ;;  %v8406_v17 = vcombine.high %v2834_v8, %v2842_v9  ;;  %v3329_v18 = vld [vmem:[#allocation9 + $0xfb0] sm:$0xff]  ;;  %v8646_v27 = vcombine.high %v3074_v21, %v3082_v29  ;;  %v8852_v35 = vcombine.high %v3281_v53, %v3289_v54 }
 0x45f   :  { %v6268_v34 = vpop.f32.mrf.mxu0  ;;  %6561 = vmatprep.subr.bf16.mxu0 %v8486_v31  ;;  %v3337_v31 = vld [vmem:[#allocation9 + $0xff0] sm:$0xff] }
 0x460   :  { %v8900_v25 = vcombine.high %v3329_v18, %v3337_v31  ;;  %v3321_v7 = vld [vmem:[#allocation9 + $0xf70] sm:$0xff]  ;;  %v8899_v34 = vcombine.low %v3329_v18, %v3337_v31 }
 0x461   :  { %6521 = vmatpush1.bf16.msra.mxu1 %v8739_v33  ;;  %v3313_v33 = vld [vmem:[#allocation9 + $0xf30] sm:$0xff] }
 0x462   :  { %6562 = vmatpush1.bf16.msra.mxu0 %v8485_v56  ;;  %6522 = vmatprep.subr.bf16.mxu1 %v8724_v16  ;;  %v3058_v56 = vld [vmem:[#allocation9 + $0x738] sm:$0xff]  ;;  %v8884_v39 = vcombine.high %v3313_v33, %v3321_v7  ;;  %v3265_v22 = vld [vmem:[#allocation9 + $0xdb0] sm:$0xff] }
 0x463   :  { %6563 = vmatprep.subr.bf16.mxu0 %v8470_v42  ;;  %v3066_v16 = vld [vmem:[#allocation9 + $0x778] sm:$0xff]  ;;  %v8645_v42 = vcombine.low %v3074_v21, %v3082_v29  ;;  %v3273_v60 = vld [vmem:[#allocation9 + $0xdf0] sm:$0xff] }
 0x464   :  { %v8630_v5 = vcombine.high %v3058_v56, %v3066_v16  ;;  %v8836_v6 = vcombine.high %v3265_v22, %v3273_v60  ;;  %v3249_v8 = vld [vmem:[#allocation9 + $0xd30] sm:$0xff] }
 0x465   :  { %6523 = vmatpush1.bf16.msra.mxu1 %v8723_v51  ;;  %v3042_v51 = vld [vmem:[#allocation9 + $0x6b8] sm:$0xff]  ;;  %v3257_v9 = vld [vmem:[#allocation9 + $0xd70] sm:$0xff] }
 0x466   :  { %6564 = vmatpush1.bf16.msra.mxu0 %v8469_v45  ;;  %6524 = vmatprep.subr.bf16.mxu1 %v8708_v36  ;;  %v3050_v45 = vld [vmem:[#allocation9 + $0x6f8] sm:$0xff]  ;;  %v8883_v36 = vcombine.low %v3313_v33, %v3321_v7  ;;  %v8820_v18 = vcombine.high %v3249_v8, %v3257_v9  ;;  %v3233_v21 = vld [vmem:[#allocation9 + $0xcb0] sm:$0xff] }
 0x467   :  { %6565 = vmatprep.subr.bf16.mxu0 %v8454_v46  ;;  %v8629_v46 = vcombine.low %v3058_v56, %v3066_v16  ;;  %v8614_v52 = vcombine.high %v3042_v51, %v3050_v45  ;;  %v3241_v29 = vld [vmem:[#allocation9 + $0xcf0] sm:$0xff] }
 0x468   :  { %v8804_v33 = vcombine.high %v3233_v21, %v3241_v29  ;;  %v3217_v56 = vld [vmem:[#allocation9 + $0xc30] sm:$0xff] }
 0x469   :  { %6525 = vmatpush1.bf16.msra.mxu1 %v8707_v55  ;;  %v3026_v55 = vld [vmem:[#allocation9 + $0x638] sm:$0xff]  ;;  %v3225_v16 = vld [vmem:[#allocation9 + $0xc70] sm:$0xff] }
 0x46a   :  { %6566 = vmatpush1.bf16.msra.mxu0 %v8453_v57  ;;  %6526 = vmatprep.subr.bf16.mxu1 %v8692_v58  ;;  %v3034_v57 = vld [vmem:[#allocation9 + $0x678] sm:$0xff]  ;;  %v8867_v58 = vcombine.low %v3297_v37, %v3305_v44  ;;  %v8788_v37 = vcombine.high %v3217_v56, %v3225_v16  ;;  %v3369_v44 = vsub.s32 6, %v10200_v63 }
 0x46b   :  { %6567 = vmatprep.subr.bf16.mxu0 %v8438_v4  ;;  %v8613_v4 = vcombine.low %v3042_v51, %v3050_v45  ;;  %v8598_v59 = vcombine.high %v3026_v55, %v3034_v57  ;;  %v3202_v45 = vld [vmem:[#allocation9 + $0xbb8] sm:$0xff] }
 0x46d   :  { %6527 = vmatpush1.bf16.msra.mxu1 %v8691_v61  ;;  %v3010_v61 = vld [vmem:[#allocation9 + $0x5b8] sm:$0xff] }
 0x46e   :  { %6568 = vmatpush1.bf16.msra.mxu0 %v8437_v28  ;;  %6528 = vmatprep.subr.bf16.mxu1 %v8676_v62  ;;  %v3018_v28 = vld [vmem:[#allocation9 + $0x5f8] sm:$0xff]  ;;  %v8851_v62 = vcombine.low %v3281_v53, %v3289_v54  ;;  %v9886_v54 = vld [vmem:[#allocation10] sm:$0xff] }
 0x46f   :  { %6569 = vmatprep.subr.bf16.mxu0 %v8422_v47  ;;  %v8597_v47 = vcombine.low %v3026_v55, %v3034_v57  ;;  %v8582_v49 = vcombine.high %v3010_v61, %v3018_v28  ;;  %v3370_v55 = vrot.slane %v9886_v54, %v3369_v44  ;;  %v9757_v57 = vld [vmem:[#allocation12 + $0x78] sm:$0xff]  }
 0x471   :  { %6529 = vmatpush1.bf16.msra.mxu1 %v8675_v15  ;;  %v2994_v15 = vld [vmem:[#allocation9 + $0x538] sm:$0xff] }
 0x472   :  { %6570 = vmatpush1.bf16.msra.mxu0 %v8421_v26  ;;  %6530 = vmatprep.subr.bf16.mxu1 %v8660_v14  ;;  %v3002_v26 = vld [vmem:[#allocation9 + $0x578] sm:$0xff]  ;;  %v8835_v14 = vcombine.low %v3265_v22, %v3273_v60  ;;  %v9758_v60 = vld [vmem:[#allocation12 + $0x38] sm:$0xff]  }
 0x473   :  { %6571 = vmatprep.subr.bf16.mxu0 %v8406_v17  ;;  %v8581_v17 = vcombine.low %v3010_v61, %v3018_v28  ;;  %v8566_v31 = vcombine.high %v2994_v15, %v3002_v26  ;;  %v6264_v61 = vadd.f32 %v10365_v13, %v3370_v55 }
 0x475   :  { %6531 = vmatpush1.bf16.msra.mxu1 %v8659_v38  ;;  %v2978_v38 = vld [vmem:[#allocation9 + $0x4b8] sm:$0xff] }
 0x476   :  { %6572 = vmatpush1.bf16.msra.mxu0 %v8405_v32  ;;  %6532 = vmatprep.subr.bf16.mxu1 %v8900_v25  ;;  %v2986_v32 = vld [vmem:[#allocation9 + $0x4f8] sm:$0xff]  ;;  %v8819_v25 = vcombine.low %v3249_v8, %v3257_v9 }
 0x477   :  { %6573 = vmatprep.subr.bf16.mxu0 %v8646_v27  ;;  %v8565_v27 = vcombine.low %v2994_v15, %v3002_v26  ;;  %v8550_v7 = vcombine.high %v2978_v38, %v2986_v32 }
 0x479   :  { %6533 = vmatpush2.bf16.msra.mxu1 %v8899_v34  ;;  %v2962_v34 = vld [vmem:[#allocation9 + $0x438] sm:$0xff] }
 0x47a   :  { %6574 = vmatpush2.bf16.msra.mxu0 %v8645_v42  ;;  %6534 = vmatprep.subr.bf16.mxu1 %v8884_v39  ;;  %v2970_v42 = vld [vmem:[#allocation9 + $0x478] sm:$0xff]  ;;  %v8803_v39 = vcombine.low %v3233_v21, %v3241_v29 }
 0x47b   :  { %6575 = vmatprep.subr.bf16.mxu0 %v8630_v5  ;;  %v8549_v5 = vcombine.low %v2978_v38, %v2986_v32  ;;  %v8534_v51 = vcombine.high %v2962_v34, %v2970_v42  ;;  %v3154_v21 = vld [vmem:[#allocation9 + $0xa38] sm:$0xff] }
 0x47c   :  { %v3162_v29 = vld [vmem:[#allocation9 + $0xa78] sm:$0xff] }
 0x47d   :  { %6535 = vmatpush2.bf16.msra.mxu1 %v8883_v36  ;;  %v3210_v36 = vld [vmem:[#allocation9 + $0xbf8] sm:$0xff] }
 0x47e   :  { %6576 = vmatpush2.bf16.msra.mxu0 %v8629_v46  ;;  %6536 = vmatprep.subr.bf16.mxu1 %v8868_v50  ;;  %v3373_v46 = vsub.s32 7, %v10200_v63  ;;  %v8787_v50 = vcombine.low %v3217_v56, %v3225_v16  ;;  %v8774_v53 = vcombine.high %v3202_v45, %v3210_v36  ;;  %v8773_v22 = vcombine.low %v3202_v45, %v3210_v36  ;;  %v3138_v56 = vld [vmem:[#allocation9 + $0x9b8] sm:$0xff]  ;;  %v9766_v36 = vld [vmem:[#allocation12 + $0x18] sm:$0xff]   ;;  %v8903_v63 = vld [vmem:[#allocation13] ss:$0 sm:$0xff] }
 0x47f   :  { %6577 = vmatprep.subr.bf16.mxu0 %v8614_v52  ;;  %v8533_v52 = vcombine.low %v2962_v34, %v2970_v42  ;;  %v3146_v16 = vld [vmem:[#allocation9 + $0x9f8] sm:$0xff]  ;;  %v8725_v34 = vcombine.low %v3154_v21, %v3162_v29  ;;  %v9764_v42 = vld [vmem:[#allocation12 + $0x20] sm:$0xff]  }
 0x480   :  { %v8709_v45 = vcombine.low %v3138_v56, %v3146_v16 }
 0x481   :  { %6537 = vmatpush2.bf16.msra.mxu1 %v8867_v58  ;;  %v6640_v58 = vmax.f32 %v10332_v40, 0.0  ;;  %v9759_v40 = vld [vmem:[#allocation12 + $0x70] sm:$0xff]  }
 0x482   :  { %6578 = vmatpush2.bf16.msra.mxu0 %v8613_v4  ;;  %6538 = vmatprep.subr.bf16.mxu1 %v8852_v35  ;;  %v3186_v4 = vld [vmem:[#allocation9 + $0xb38] sm:$0xff] }
 0x483   :  { %6579 = vmatprep.subr.bf16.mxu0 %v8598_v59  ;;  %v3194_v35 = vld [vmem:[#allocation9 + $0xb78] sm:$0xff]  ;;  %v3374_v59 = vrot.slane %v9886_v54, %v3373_v46 }
 0x484   :  { %v8758_v28 = vcombine.high %v3186_v4, %v3194_v35  ;;  %v8757_v26 = vcombine.low %v3186_v4, %v3194_v35  ;;  %v3114_v54 = vld [vmem:[#allocation9 + $0x8f8] sm:$0xff] }
 0x485   :  { %6539 = vmatpush2.bf16.msra.mxu1 %v8851_v62  ;;  %v3170_v62 = vld [vmem:[#allocation9 + $0xab8] sm:$0xff]  ;;  %v6266_v8 = vadd.f32 %v10372_v20, %v3374_v59 }
 0x486   :  { %6580 = vmatpush2.bf16.msra.mxu0 %v8597_v47  ;;  %6540 = vmatprep.subr.bf16.mxu1 %v8836_v6  ;;  %v3178_v47 = vld [vmem:[#allocation9 + $0xaf8] sm:$0xff]  ;;  %v6656_v6 = vpack.c.bf16 %v6640_v58, %v6640_v58 }
 0x487   :  { %6581 = vmatprep.subr.bf16.mxu0 %v8582_v49  ;;  %v9761_v20 = vld [vmem:[#allocation12 + $0x68] sm:$0xff]   ;;  %v8741_v32 = vcombine.low %v3170_v62, %v3178_v47 }
 0x488   :  { %v9769_v4 = vld [vmem:[#allocation12 + $0x48] sm:$0xff]  }
 0x489   :  { %6541 = vmatpush2.bf16.msra.mxu1 %v8835_v14  ;;  %v9760_v14 = vld [vmem:[#allocation12 + $0x30] sm:$0xff]   ;;  %v3090_v35 = vld [vmem:[#allocation9 + $0x838] sm:$0xff] }
 0x48a   :  { %6582 = vmatpush2.bf16.msra.mxu0 %v8581_v17  ;;  %6542 = vmatprep.subr.bf16.mxu1 %v8820_v18  ;;  %v8742_v17 = vcombine.high %v3170_v62, %v3178_v47  ;;  %v3098_v59 = vld [vmem:[#allocation9 + $0x878] sm:$0xff] }
 0x48b   :  { %6583 = vmatprep.subr.bf16.mxu0 %v8566_v31  ;;  %v3330_v62 = vld [vmem:[#allocation9 + $0xfb8] sm:$0xff] }
 0x48c   :  { %v3338_v47 = vld [vmem:[#allocation9 + $0xff8] sm:$0xff] }
 0x48d   :  { %6543 = vmatpush2.bf16.msra.mxu1 %v8819_v25 }
 0x48e   :  { %6584 = vmatpush2.bf16.msra.mxu0 %v8565_v27  ;;  %6544 = vmatprep.subr.bf16.mxu1 %v8804_v33  ;;  %v8726_v27 = vcombine.high %v3154_v21, %v3162_v29  ;;  %v9774_v21 = vld [vmem:[#allocation12 + $0x138] sm:$0xff]  }
 0x48f   :  { %6585 = vmatprep.subr.bf16.mxu0 %v8550_v7  ;;  %v9763_v7 = vld [vmem:[#allocation12 + $0x60] sm:$0xff]  }
 0x491   :  { %6545 = vmatpush2.bf16.msra.mxu1 %v8803_v39  ;;  %v8710_v39 = vcombine.high %v3138_v56, %v3146_v16  ;;  %v3290_v56 = vld [vmem:[#allocation9 + $0xe78] sm:$0xff] }
 0x492   :  { %6586 = vmatpush2.bf16.msra.mxu0 %v8549_v5  ;;  %6546 = vmatprep.subr.bf16.mxu1 %v8788_v37  ;;  %v9765_v5 = vld [vmem:[#allocation12 + $0x58] sm:$0xff]   ;;  %v3122_v37 = vld [vmem:[#allocation9 + $0x938] sm:$0xff] }
 0x493   :  { %6587 = vmatprep.subr.bf16.mxu0 %v8534_v51  ;;  %v3130_v51 = vld [vmem:[#allocation9 + $0x978] sm:$0xff] }
 0x494   :  { %v8693_v55 = vcombine.low %v3122_v37, %v3130_v51 }
 0x495   :  { %6547 = vmatpush2.bf16.msra.mxu1 %v8787_v50  ;;  %v8694_v50 = vcombine.high %v3122_v37, %v3130_v51  ;;  %v3274_v37 = vld [vmem:[#allocation9 + $0xdf8] sm:$0xff] }
 0x496   :  { %6588 = vmatpush2.bf16.msra.mxu0 %v8533_v52  ;;  %6598 = vmatprep.subr.bf16.mxu1 %v8774_v53  ;;  %v9767_v52 = vld [vmem:[#allocation12 + $0x50] sm:$0xff]   ;;  %v3106_v53 = vld [vmem:[#allocation9 + $0x8b8] sm:$0xff] }
 0x497   :  { %9032 = vmatprep.subr.bf16.mxu0 %v9757_v57  ;;  %v9768_v57 = vld [vmem:[#allocation12 + $0x10] sm:$0xff]   ;;  %v8678_v58 = vcombine.high %v3106_v53, %v3114_v54 }
 0x498   :  { %v6304_v49 = vpop.f32.mrf.mxu1  ;;  %6549 = vmatmul.mubr.bf16.vlgmr.msra.gmra.mxu1 %v10292_v19 }
 0x499   :  { %v10384_v9 = vadd.f32 %v6304_v49, %v6264_v61  ;;  %v10386_v15 = vpop.f32.mrf.mxu0  ;;  %6590 = vmatmul.mubr.bf16.vlgmr.msra.gmra.mxu0 %v10276_v43  ;;  %6599 = vmatpush1.bf16.msra.mxu1 %v8773_v22  ;;  %v8677_v22 = vcombine.low %v3106_v53, %v3114_v54  ;;  %v8662_v61 = vcombine.high %v3090_v35, %v3098_v59  ;;  %v9772_v49 = vld [vmem:[#allocation12] sm:$0xff]   ;;  %v3258_v53 = vld [vmem:[#allocation9 + $0xd78] sm:$0xff] }
 0x49a   :  { %6630 = vmatprep.mubr.bf16.mxu1 %v10290_v3  ;;  %v6306_v13 = vpop.f32.mrf.mxu1  ;;  %9033 = vmatpush3.bf16.msra.mxu0 %v9758_v60  ;;  %v9762_v3 = vld [vmem:[#allocation12 + $0x28] sm:$0xff]  }
 0x49b   :  { %v10390_v18 = vadd.f32 %v6306_v13, %v6266_v8  ;;  %7734 = vmatprep.mubr.bf16.mxu0 %v6656_v6  ;;  %v10392_v31 = vpop.f32.mrf.mxu0  ;;  %6600 = vmatprep.subr.bf16.mxu1 %v8758_v28  ;;  %v9770_v60 = vld [vmem:[#allocation12 + $0x8] sm:$0xff]   ;;  %v9771_v28 = vld [vmem:[#allocation12 + $0x40] sm:$0xff]   ;;  %v8661_v6 = vcombine.low %v3090_v35, %v3098_v59  ;;  %v6639_v8 = vmax.f32 %v10325_v1, 0.0  ;;  %v6644_v13 = vmax.f32 %v10369_v24, 0.0  ;;  %v9776_v24 = vld [vmem:[#allocation12 + $0x130] sm:$0xff]  }
 0x49c   :  { %v6308_v38 = vpop.f32.mrf.mxu1  ;;  %9034 = vmatprep.subr.bf16.mxu0 %v9759_v40  ;;  %v8902_v40 = vcombine.high %v3330_v62, %v3338_v47  ;;  %v3242_v35 = vld [vmem:[#allocation9 + $0xcf8] sm:$0xff] }
 0x49d   :  { %v6349_v43 = vpop.f32.mrf.mxu0  ;;  %6601 = vmatpush1.bf16.msra.mxu1 %v8757_v26  ;;  %v9773_v26 = vld [vmem:[#allocation12 + $0x178] sm:$0xff]   ;;  %v6655_v29 = vpack.c.bf16 %v6639_v8, %v6639_v8 }
 0x49e   :  { %v6309_v25 = vpop.f32.mrf.mxu1  ;;  %9035 = vmatpush3.bf16.msra.mxu0 %v9760_v14  ;;  %6602 = vmatprep.subr.bf16.mxu1 %v8742_v17  ;;  %v3314_v14 = vld [vmem:[#allocation9 + $0xf38] sm:$0xff]  ;;  %v9775_v43 = vld [vmem:[#allocation12 + $0x170] sm:$0xff]  }
 0x49f   :  { %v6350_v33 = vpop.f32.mrf.mxu0  ;;  %9036 = vmatprep.subr.bf16.mxu0 %v9761_v20  ;;  %v3322_v17 = vld [vmem:[#allocation9 + $0xf78] sm:$0xff]  ;;  %v8901_v20 = vcombine.low %v3330_v62, %v3338_v47 }
 0x4a0   :  { %v8886_v38 = vcombine.high %v3314_v14, %v3322_v17  ;;  %v3306_v25 = vld [vmem:[#allocation9 + $0xef8] sm:$0xff]  ;;  %v8885_v1 = vcombine.low %v3314_v14, %v3322_v17  ;;  %v6642_v14 = vmax.f32 %v10347_v30, 0.0  ;;  %v9791_v17 = vld [vmem:[#allocation12 + $0x278] sm:$0xff]   ;;  %v9795_v30 = vld [vmem:[#allocation12 + $0x270] sm:$0xff]  }
 0x4a1   :  { %6603 = vmatpush1.bf16.msra.mxu1 %v8741_v32  ;;  %v3298_v32 = vld [vmem:[#allocation9 + $0xeb8] sm:$0xff] }
 0x4a2   :  { %9037 = vmatpush3.bf16.msra.mxu0 %v9762_v3  ;;  %6604 = vmatprep.subr.bf16.mxu1 %v8726_v27  ;;  %v6660_v3 = vpack.c.bf16 %v6644_v13, %v6644_v13  ;;  %v8870_v27 = vcombine.high %v3298_v32, %v3306_v25  ;;  %v9777_v33 = vld [vmem:[#allocation12 + $0x168] sm:$0xff]   ;;  %v8869_v16 = vcombine.low %v3298_v32, %v3306_v25  ;;  %v9789_v13 = vld [vmem:[#allocation12 + $0xf8] sm:$0xff]  }
 0x4a3   :  { %9038 = vmatprep.subr.bf16.mxu0 %v9763_v7  ;;  %v3282_v7 = vld [vmem:[#allocation9 + $0xe38] sm:$0xff]  ;;  %v6658_v32 = vpack.c.bf16 %v6642_v14, %v6642_v14  ;;  %v9792_v25 = vld [vmem:[#allocation12 + $0x238] sm:$0xff]   ;;  %v6646_v14 = vmax.f32 %v10390_v18, 0.0  ;;  %v9824_v18 = vld [vmem:[#allocation12 + $0x1b0] sm:$0xff]  }
 0x4a4   :  { %v8853_v51 = vcombine.low %v3282_v7, %v3290_v56  ;;  %v3226_v62 = vld [vmem:[#allocation9 + $0xc78] sm:$0xff] }
 0x4a5   :  { %6605 = vmatpush1.bf16.msra.mxu1 %v8725_v34  ;;  %v9778_v34 = vld [vmem:[#allocation12 + $0x128] sm:$0xff]  }
 0x4a6   :  { %9039 = vmatpush3.bf16.msra.mxu0 %v9764_v42  ;;  %6606 = vmatprep.subr.bf16.mxu1 %v8710_v39  ;;  %v8854_v42 = vcombine.high %v3282_v7, %v3290_v56  ;;  %v9779_v39 = vld [vmem:[#allocation12 + $0x160] sm:$0xff]  }
 0x4a7   :  { %9040 = vmatprep.subr.bf16.mxu0 %v9765_v5  ;;  %v3266_v5 = vld [vmem:[#allocation9 + $0xdb8] sm:$0xff] }
 0x4a8   :  { %v8837_v54 = vcombine.low %v3266_v5, %v3274_v37 }
 0x4a9   :  { %6607 = vmatpush1.bf16.msra.mxu1 %v8709_v45  ;;  %v9780_v45 = vld [vmem:[#allocation12 + $0x120] sm:$0xff]  }
 0x4aa   :  { %9041 = vmatpush3.bf16.msra.mxu0 %v9766_v36  ;;  %6608 = vmatprep.subr.bf16.mxu1 %v8694_v50  ;;  %v8838_v36 = vcombine.high %v3266_v5, %v3274_v37  ;;  %v9781_v50 = vld [vmem:[#allocation12 + $0x158] sm:$0xff]   ;;  %v9801_v37 = vld [vmem:[#allocation12 + $0xe0] sm:$0xff]  }
 0x4ab   :  { %9042 = vmatprep.subr.bf16.mxu0 %v9767_v52  ;;  %v3250_v52 = vld [vmem:[#allocation9 + $0xd38] sm:$0xff] }
 0x4ac   :  { %v8821_v59 = vcombine.low %v3250_v52, %v3258_v53 }
 0x4ad   :  { %6609 = vmatpush1.bf16.msra.mxu1 %v8693_v55  ;;  %v9782_v55 = vld [vmem:[#allocation12 + $0x118] sm:$0xff]  }
 0x4ae   :  { %9043 = vmatpush3.bf16.msra.mxu0 %v9768_v57  ;;  %6610 = vmatprep.subr.bf16.mxu1 %v8678_v58  ;;  %v8822_v57 = vcombine.high %v3250_v52, %v3258_v53  ;;  %v9783_v58 = vld [vmem:[#allocation12 + $0x150] sm:$0xff]   ;;  %v9802_v52 = vld [vmem:[#allocation12 + $0xa0] sm:$0xff]   ;;  %v9805_v53 = vld [vmem:[#allocation12 + $0xd8] sm:$0xff]  }
 0x4af   :  { %9044 = vmatprep.subr.bf16.mxu0 %v9769_v4  ;;  %v3234_v4 = vld [vmem:[#allocation9 + $0xcb8] sm:$0xff] }
 0x4b0   :  { %v8805_v47 = vcombine.low %v3234_v4, %v3242_v35 }
 0x4b1   :  { %6611 = vmatpush1.bf16.msra.mxu1 %v8677_v22  ;;  %v9784_v22 = vld [vmem:[#allocation12 + $0x110] sm:$0xff]  }
 0x4b2   :  { %9045 = vmatpush3.bf16.msra.mxu0 %v9770_v60  ;;  %6612 = vmatprep.subr.bf16.mxu1 %v8662_v61  ;;  %v8806_v60 = vcombine.high %v3234_v4, %v3242_v35  ;;  %v9785_v61 = vld [vmem:[#allocation12 + $0x148] sm:$0xff]   ;;  %v9808_v4 = vld [vmem:[#allocation12 + $0x218] sm:$0xff]   ;;  %v9811_v35 = vld [vmem:[#allocation12 + $0x250] sm:$0xff]  }
 0x4b3   :  { %9046 = vmatprep.subr.bf16.mxu0 %v9771_v28  ;;  %v3218_v28 = vld [vmem:[#allocation9 + $0xc38] sm:$0xff] }
 0x4b4   :  { %v8789_v8 = vcombine.low %v3218_v28, %v3226_v62 }
 0x4b5   :  { %6613 = vmatpush1.bf16.msra.mxu1 %v8661_v6  ;;  %v9786_v6 = vld [vmem:[#allocation12 + $0x108] sm:$0xff]  }
 0x4b6   :  { %9047 = vmatpush3.bf16.msra.mxu0 %v9772_v49  ;;  %6614 = vmatprep.subr.bf16.mxu1 %v8902_v40  ;;  %v8790_v49 = vcombine.high %v3218_v28, %v3226_v62  ;;  %v9787_v40 = vld [vmem:[#allocation12 + $0x140] sm:$0xff]   ;;  %v9815_v28 = vld [vmem:[#allocation12 + $0x248] sm:$0xff]  }
 0x4b7   :  { %9076 = vmatprep.subr.bf16.mxu0 %v9773_v26  ;;  %v9788_v26 = vld [vmem:[#allocation12 + $0x100] sm:$0xff]   ;;  %v9814_v62 = vld [vmem:[#allocation12 + $0x88] sm:$0xff]  }
 0x4b9   :  { %6615 = vmatpush2.bf16.msra.mxu1 %v8901_v20  ;;  %7735 = vmatmul.mubr.bf16.vlgmr.msra.gmra.mxu0 %v6655_v29  ;;  %v6643_v20 = vmax.f32 %v10363_v11, 0.0 }
 0x4ba   :  { %9077 = vmatpush3.bf16.msra.mxu0 %v9774_v21  ;;  %7814 = vmatprep.mubr.bf16.mxu0 %v6660_v3  ;;  %v10398_v21 = vld [vmem:[#allocation10 + $0x8] sm:$0xff] }
 0x4bb   :  { %6616 = vmatprep.subr.bf16.mxu1 %v8886_v38  ;;  %9078 = vmatprep.subr.bf16.mxu0 %v9775_v43  ;;  %v3382_v29 = vrot.slane %v10398_v21, %v10208_v2  ;;  %v9790_v38 = vld [vmem:[#allocation12 + $0xb8] sm:$0xff]   ;;  %v9793_v43 = vld [vmem:[#allocation12 + $0xf0] sm:$0xff]   ;;  %v6659_v3 = vpack.c.bf16 %v6643_v20, %v6643_v20 }
 0x4bc   :  { %v9794_v2 = vld [vmem:[#allocation12 + $0xb0] sm:$0xff]  }
 0x4bd   :  { %6617 = vmatpush2.bf16.msra.mxu1 %v8885_v1  ;;  %v6348_v11 = vadd.f32 %v10392_v31, %v3382_v29  ;;  %v9798_v31 = vld [vmem:[#allocation12 + $0xa8] sm:$0xff]   ;;  %v9822_v29 = vld [vmem:[#allocation12 + $0x1b8] sm:$0xff]  }
 0x4be   :  { %9079 = vmatpush3.bf16.msra.mxu0 %v9776_v24  ;;  %6618 = vmatprep.subr.bf16.mxu1 %v8870_v27 }
 0x4bf   :  { %9080 = vmatprep.subr.bf16.mxu0 %v9777_v33  ;;  %v9797_v33 = vld [vmem:[#allocation12 + $0xe8] sm:$0xff]  }
 0x4c1   :  { %6619 = vmatpush2.bf16.msra.mxu1 %v8869_v16  ;;  %v9796_v16 = vld [vmem:[#allocation12 + $0x230] sm:$0xff]  }
 0x4c2   :  { %9081 = vmatpush3.bf16.msra.mxu0 %v9778_v34  ;;  %6620 = vmatprep.subr.bf16.mxu1 %v8854_v42 }
 0x4c3   :  { %9082 = vmatprep.subr.bf16.mxu0 %v9779_v39 }
 0x4c5   :  { %6621 = vmatpush2.bf16.msra.mxu1 %v8853_v51 }
 0x4c6   :  { %9083 = vmatpush3.bf16.msra.mxu0 %v9780_v45  ;;  %6622 = vmatprep.subr.bf16.mxu1 %v8838_v36  ;;  %v9800_v36 = vld [vmem:[#allocation12 + $0x228] sm:$0xff]  }
 0x4c7   :  { %9084 = vmatprep.subr.bf16.mxu0 %v9781_v50  ;;  %v9803_v50 = vld [vmem:[#allocation12 + $0x260] sm:$0xff]  }
 0x4c9   :  { %6623 = vmatpush2.bf16.msra.mxu1 %v8837_v54  ;;  %v9804_v54 = vld [vmem:[#allocation12 + $0x220] sm:$0xff]  }
 0x4ca   :  { %9085 = vmatpush3.bf16.msra.mxu0 %v9782_v55  ;;  %6624 = vmatprep.subr.bf16.mxu1 %v8822_v57  ;;  %v9807_v55 = vld [vmem:[#allocation12 + $0x258] sm:$0xff]  }
 0x4cb   :  { %9086 = vmatprep.subr.bf16.mxu0 %v9783_v58  ;;  %v9806_v57 = vld [vmem:[#allocation12 + $0x98] sm:$0xff]   ;;  %v9809_v58 = vld [vmem:[#allocation12 + $0xd0] sm:$0xff]  }
 0x4cd   :  { %6625 = vmatpush2.bf16.msra.mxu1 %v8821_v59  ;;  %v9810_v59 = vld [vmem:[#allocation12 + $0x90] sm:$0xff]  }
 0x4ce   :  { %9087 = vmatpush3.bf16.msra.mxu0 %v9784_v22  ;;  %6626 = vmatprep.subr.bf16.mxu1 %v8806_v60  ;;  %v3378_v22 = vrot.slane %v10398_v21, %v10203_v0  ;;  %v9813_v60 = vld [vmem:[#allocation12 + $0xc8] sm:$0xff]   ;;  %v9818_v0 = vld [vmem:[#allocation12 + $0x80] sm:$0xff]  }
 0x4cf   :  { %9088 = vmatprep.subr.bf16.mxu0 %v9785_v61  ;;  %v9812_v61 = vld [vmem:[#allocation12 + $0x210] sm:$0xff]  }
 0x4d1   :  { %6627 = vmatpush2.bf16.msra.mxu1 %v8805_v47  ;;  %v6346_v47 = vadd.f32 %v10386_v15, %v3378_v22  ;;  %v9853_v15 = vld [vmem:[#allocation12 + $0x378] sm:$0xff]  }
 0x4d2   :  { %9089 = vmatpush3.bf16.msra.mxu0 %v9786_v6  ;;  %6628 = vmatprep.subr.bf16.mxu1 %v8790_v49  ;;  %v9817_v6 = vld [vmem:[#allocation12 + $0xc0] sm:$0xff]   ;;  %v9816_v49 = vld [vmem:[#allocation12 + $0x208] sm:$0xff]   ;;  %v9838_v22 = vld [vmem:[#allocation12 + $0x2b8] sm:$0xff]  }
 0x4d3   :  { %9090 = vmatprep.subr.bf16.mxu0 %v9787_v40 }
 0x4d5   :  { %6629 = vmatpush2.bf16.msra.mxu1 %v8789_v8  ;;  %v9819_v8 = vld [vmem:[#allocation12 + $0x240] sm:$0xff]  }
 0x4d6   :  { %9091 = vmatpush3.bf16.msra.mxu0 %v9788_v26  ;;  %9054 = vmatprep.subr.bf16.mxu1 %v9789_v13  ;;  %v6641_v26 = vmax.f32 %v10341_v23, 0.0  ;;  %v9821_v13 = vld [vmem:[#allocation12 + $0x1f8] sm:$0xff]   ;;  %v9855_v23 = vld [vmem:[#allocation12 + $0x370] sm:$0xff]  }
 0x4d7   :  { %9120 = vmatprep.subr.bf16.mxu0 %v9791_v17  ;;  %v9820_v17 = vld [vmem:[#allocation12 + $0x200] sm:$0xff]  }
 0x4d8   :  { %v10402_v1 = vpop.f32.mrf.mxu1  ;;  %6631 = vmatmul.mubr.bf16.vlgmr.msra.gmra.mxu1 %v10292_v19  ;;  %v9799_v19 = vld [vmem:[#allocation12 + $0x268] sm:$0xff]  }
 0x4d9   :  { %v10406_v24 = vpop.f32.mrf.mxu0  ;;  %9055 = vmatpush3.bf16.msra.mxu1 %v9790_v38  ;;  %7774 = vmatprep.mubr.bf16.mxu1 %v6658_v32  ;;  %v6387_v40 = vadd.f32 %v10402_v1, %v6346_v47  ;;  %v6657_v38 = vpack.c.bf16 %v6641_v26, %v6641_v26  ;;  %v6662_v32 = vpack.c.bf16 %v6646_v14, %v6646_v14  ;;  %v9825_v1 = vld [vmem:[#allocation12 + $0x1e8] sm:$0xff]  }
 0x4da   :  { %7815 = vmatmul.mubr.bf16.vlgmr.msra.gmra.mxu0 %v6659_v3  ;;  %v6388_v27 = vpop.f32.mrf.mxu1  ;;  %9056 = vmatprep.subr.bf16.mxu1 %v9793_v43  ;;  %v9823_v43 = vld [vmem:[#allocation12 + $0x1f0] sm:$0xff]  }
 0x4db   :  { %v6389_v7 = vadd.f32 %v6388_v27, %v6348_v11  ;;  %9121 = vmatpush3.bf16.msra.mxu0 %v9792_v25  ;;  %v10408_v56 = vpop.f32.mrf.mxu0  ;;  %v6647_v20 = vmax.f32 %v6387_v40, 0.0  ;;  %v9854_v25 = vld [vmem:[#allocation12 + $0x338] sm:$0xff]   ;;  %v9857_v11 = vld [vmem:[#allocation12 + $0x368] sm:$0xff]   ;;  %v9827_v27 = vld [vmem:[#allocation12 + $0x1e0] sm:$0xff]  }
 0x4dc   :  { %v6390_v34 = vpop.f32.mrf.mxu1  ;;  %9122 = vmatprep.subr.bf16.mxu0 %v9795_v30  ;;  %v9856_v30 = vld [vmem:[#allocation12 + $0x330] sm:$0xff]  }
 0x4dd   :  { %v6648_v42 = vmax.f32 %v6389_v7, 0.0  ;;  %v6431_v39 = vpop.f32.mrf.mxu0  ;;  %9057 = vmatpush3.bf16.msra.mxu1 %v9794_v2  ;;  %v6663_v3 = vpack.c.bf16 %v6647_v20, %v6647_v20  ;;  %v9826_v2 = vld [vmem:[#allocation12 + $0x1a8] sm:$0xff]   ;;  %v9859_v7 = vld [vmem:[#allocation12 + $0x360] sm:$0xff]   ;;  %v9829_v34 = vld [vmem:[#allocation12 + $0x1d8] sm:$0xff]  }
 0x4de   :  { %v6391_v5 = vpop.f32.mrf.mxu1  ;;  %9058 = vmatprep.subr.bf16.mxu1 %v9797_v33  ;;  %v9858_v33 = vld [vmem:[#allocation12 + $0x328] sm:$0xff]   ;;  %v9830_v39 = vld [vmem:[#allocation12 + $0x198] sm:$0xff]  }
 0x4df   :  { %v6664_v51 = vpack.c.bf16 %v6648_v42, %v6648_v42  ;;  %9123 = vmatpush3.bf16.msra.mxu0 %v9796_v16  ;;  %v6432_v45 = vpop.f32.mrf.mxu0  ;;  %v9828_v16 = vld [vmem:[#allocation12 + $0x1a0] sm:$0xff]   ;;  %v9861_v42 = vld [vmem:[#allocation12 + $0x358] sm:$0xff]  }
 0x4e0   :  { %9124 = vmatprep.subr.bf16.mxu0 %v9799_v19  ;;  %v9860_v19 = vld [vmem:[#allocation12 + $0x320] sm:$0xff]   ;;  %v9862_v5 = vld [vmem:[#allocation12 + $0x318] sm:$0xff]   ;;  %v9833_v45 = vld [vmem:[#allocation12 + $0x1c8] sm:$0xff]  }
 0x4e1   :  { %9059 = vmatpush3.bf16.msra.mxu1 %v9798_v31  ;;  %7894 = vmatprep.mubr.bf16.mxu0 %v6664_v51  ;;  %v9831_v31 = vld [vmem:[#allocation12 + $0x1d0] sm:$0xff]  }
 0x4e2   :  { %9060 = vmatprep.subr.bf16.mxu1 %v9801_v37  ;;  %v9863_v37 = vld [vmem:[#allocation12 + $0x350] sm:$0xff]  }
 0x4e3   :  { %9125 = vmatpush3.bf16.msra.mxu0 %v9800_v36  ;;  %v9832_v51 = vld [vmem:[#allocation12 + $0x190] sm:$0xff]  }
 0x4e4   :  { %9126 = vmatprep.subr.bf16.mxu0 %v9803_v50  ;;  %v9864_v36 = vld [vmem:[#allocation12 + $0x310] sm:$0xff]   ;;  %v9865_v50 = vld [vmem:[#allocation12 + $0x348] sm:$0xff]  }
 0x4e5   :  { %9061 = vmatpush3.bf16.msra.mxu1 %v9802_v52  ;;  %v9834_v52 = vld [vmem:[#allocation12 + $0x188] sm:$0xff]  }
 0x4e6   :  { %9062 = vmatprep.subr.bf16.mxu1 %v9805_v53  ;;  %v9835_v53 = vld [vmem:[#allocation12 + $0x1c0] sm:$0xff]  }
 0x4e7   :  { %9127 = vmatpush3.bf16.msra.mxu0 %v9804_v54  ;;  %v9866_v54 = vld [vmem:[#allocation12 + $0x308] sm:$0xff]  }
 0x4e8   :  { %9128 = vmatprep.subr.bf16.mxu0 %v9807_v55  ;;  %v9867_v55 = vld [vmem:[#allocation12 + $0x340] sm:$0xff]  }
 0x4e9   :  { %9063 = vmatpush3.bf16.msra.mxu1 %v9806_v57  ;;  %v9836_v57 = vld [vmem:[#allocation12 + $0x180] sm:$0xff]  }
 0x4ea   :  { %9064 = vmatprep.subr.bf16.mxu1 %v9809_v58  ;;  %v6645_v58 = vmax.f32 %v10384_v9, 0.0  ;;  %v9840_v9 = vld [vmem:[#allocation12 + $0x2b0] sm:$0xff]  }
 0x4eb   :  { %9129 = vmatpush3.bf16.msra.mxu0 %v9808_v4  ;;  %v9837_v4 = vld [vmem:[#allocation12 + $0x2f8] sm:$0xff]  }
 0x4ec   :  { %9130 = vmatprep.subr.bf16.mxu0 %v9811_v35  ;;  %v9868_v35 = vld [vmem:[#allocation12 + $0x300] sm:$0xff]  }
 0x4ed   :  { %9065 = vmatpush3.bf16.msra.mxu1 %v9810_v59  ;;  %v3390_v59 = vrot.slane %v10398_v21, %v10230_v12 }
 0x4ee   :  { %9066 = vmatprep.subr.bf16.mxu1 %v9813_v60  ;;  %v6661_v60 = vpack.c.bf16 %v6645_v58, %v6645_v58 }
 0x4ef   :  { %9131 = vmatpush3.bf16.msra.mxu0 %v9812_v61  ;;  %v9839_v61 = vld [vmem:[#allocation12 + $0x2f0] sm:$0xff]  }
 0x4f0   :  { %9132 = vmatprep.subr.bf16.mxu0 %v9815_v28 }
 0x4f1   :  { %9067 = vmatpush3.bf16.msra.mxu1 %v9814_v62  ;;  %v6430_v62 = vadd.f32 %v10408_v56, %v3390_v59 }
 0x4f2   :  { %9068 = vmatprep.subr.bf16.mxu1 %v9817_v6 }
 0x4f3   :  { %9133 = vmatpush3.bf16.msra.mxu0 %v9816_v49  ;;  %v9841_v49 = vld [vmem:[#allocation12 + $0x2e8] sm:$0xff]  }
 0x4f4   :  { %9134 = vmatprep.subr.bf16.mxu0 %v9819_v8 }
 0x4f5   :  { %9069 = vmatpush3.bf16.msra.mxu1 %v9818_v0 }
 0x4f6   :  { %9098 = vmatprep.subr.bf16.mxu1 %v9821_v13  ;;  %v9842_v13 = vld [vmem:[#allocation12 + $0x2a8] sm:$0xff]  }
 0x4f7   :  { %9135 = vmatpush3.bf16.msra.mxu0 %v9820_v17  ;;  %v9843_v17 = vld [vmem:[#allocation12 + $0x2e0] sm:$0xff]  }
 0x4f8   :  { %7775 = vmatmul.mubr.bf16.vlgmr.msra.gmra.mxu1 %v6657_v38  ;;  %9164 = vmatprep.subr.bf16.mxu0 %v9853_v15  ;;  %v9844_v15 = vld [vmem:[#allocation12 + $0x2a0] sm:$0xff]   ;;  %v9846_v38 = vld [vmem:[#allocation12 + $0x298] sm:$0xff]  }
 0x4f9   :  { %9099 = vmatpush3.bf16.msra.mxu1 %v9822_v29  ;;  %7854 = vmatprep.mubr.bf16.mxu1 %v6662_v32  ;;  %v9845_v29 = vld [vmem:[#allocation12 + $0x2d8] sm:$0xff]   ;;  %v3386_v32 = vrot.slane %v10398_v21, %v10227_v10  ;;  %v9871_v10 = vld [vmem:[#allocation12 + $0x3f0] sm:$0xff]  }
 0x4fa   :  { %7895 = vmatmul.mubr.bf16.vlgmr.msra.gmra.mxu0 %v6663_v3  ;;  %9100 = vmatprep.subr.bf16.mxu1 %v9823_v43  ;;  %v9847_v43 = vld [vmem:[#allocation12 + $0x2d0] sm:$0xff]   ;;  %v9849_v3 = vld [vmem:[#allocation12 + $0x2c8] sm:$0xff]  }
 0x4fb   :  { %9165 = vmatpush3.bf16.msra.mxu0 %v9854_v25  ;;  %v9848_v25 = vld [vmem:[#allocation12 + $0x290] sm:$0xff]  }
 0x4fc   :  { %9166 = vmatprep.subr.bf16.mxu0 %v9855_v23  ;;  %v6428_v23 = vadd.f32 %v10406_v24, %v3386_v32  ;;  %v9873_v24 = vld [vmem:[#allocation12 + $0x3e8] sm:$0xff]  }
 0x4fd   :  { %9101 = vmatpush3.bf16.msra.mxu1 %v9824_v18  ;;  %v9850_v18 = vld [vmem:[#allocation12 + $0x288] sm:$0xff]  }
 0x4fe   :  { %9102 = vmatprep.subr.bf16.mxu1 %v9825_v1 }
 0x4ff   :  { %9167 = vmatpush3.bf16.msra.mxu0 %v9856_v30  ;;  %v9851_v30 = vld [vmem:[#allocation12 + $0x2c0] sm:$0xff]  }
 0x500   :  { %9168 = vmatprep.subr.bf16.mxu0 %v9857_v11  ;;  %v9852_v11 = vld [vmem:[#allocation12 + $0x280] sm:$0xff]  }
 0x501   :  { %9103 = vmatpush3.bf16.msra.mxu1 %v9826_v2 }
 0x502   :  { %9104 = vmatprep.subr.bf16.mxu1 %v9827_v27  ;;  %v9869_v27 = vld [vmem:[#allocation12 + $0x3f8] sm:$0xff]  }
 0x503   :  { %9169 = vmatpush3.bf16.msra.mxu0 %v9858_v33  ;;  %v9870_v33 = vld [vmem:[#allocation12 + $0x3b8] sm:$0xff]  }
 0x504   :  { %9170 = vmatprep.subr.bf16.mxu0 %v9859_v7 }
 0x505   :  { %9105 = vmatpush3.bf16.msra.mxu1 %v9828_v16  ;;  %v9872_v16 = vld [vmem:[#allocation12 + $0x3b0] sm:$0xff]  }
 0x506   :  { %9106 = vmatprep.subr.bf16.mxu1 %v9829_v34  ;;  %v9874_v34 = vld [vmem:[#allocation12 + $0x3a8] sm:$0xff]  }
 0x507   :  { %9171 = vmatpush3.bf16.msra.mxu0 %v9860_v19  ;;  %v9875_v19 = vld [vmem:[#allocation12 + $0x3e0] sm:$0xff]  }
 0x508   :  { %9172 = vmatprep.subr.bf16.mxu0 %v9861_v42  ;;  %v9876_v42 = vld [vmem:[#allocation12 + $0x3a0] sm:$0xff]  }
 0x509   :  { %9107 = vmatpush3.bf16.msra.mxu1 %v9830_v39  ;;  %v9877_v39 = vld [vmem:[#allocation12 + $0x3d8] sm:$0xff]  }
 0x50a   :  { %9108 = vmatprep.subr.bf16.mxu1 %v9831_v31  ;;  %v9878_v31 = vld [vmem:[#allocation12 + $0x398] sm:$0xff]  }
 0x50b   :  { %9173 = vmatpush3.bf16.msra.mxu0 %v9862_v5  ;;  %v9879_v5 = vld [vmem:[#allocation12 + $0x3d0] sm:$0xff]  }
 0x50c   :  { %9174 = vmatprep.subr.bf16.mxu0 %v9863_v37  ;;  %v9880_v37 = vld [vmem:[#allocation12 + $0x390] sm:$0xff]  }
 0x50d   :  { %9109 = vmatpush3.bf16.msra.mxu1 %v9832_v51  ;;  %v9881_v51 = vld [vmem:[#allocation12 + $0x3c8] sm:$0xff]  }
 0x50e   :  { %9110 = vmatprep.subr.bf16.mxu1 %v9833_v45  ;;  %v9882_v45 = vld [vmem:[#allocation12 + $0x388] sm:$0xff]  }
 0x50f   :  { %9175 = vmatpush3.bf16.msra.mxu0 %v9864_v36  ;;  %v9883_v36 = vld [vmem:[#allocation12 + $0x3c0] sm:$0xff]  }
 0x510   :  { %9176 = vmatprep.subr.bf16.mxu0 %v9865_v50  ;;  %v9884_v50 = vld [vmem:[#allocation12 + $0x380] sm:$0xff]  }
 0x511   :  { %9111 = vmatpush3.bf16.msra.mxu1 %v9834_v52  ;;  %v3394_v52 = vrot.slane %v10398_v21, %v3361_v41 }
 0x512   :  { %9112 = vmatprep.subr.bf16.mxu1 %v9835_v53  ;;  %v3398_v53 = vrot.slane %v10398_v21, %v3365_v48 }
 0x513   :  { %9177 = vmatpush3.bf16.msra.mxu0 %v9866_v54 }
 0x514   :  { %9178 = vmatprep.subr.bf16.mxu0 %v9867_v55 }
 0x515   :  { %9113 = vmatpush3.bf16.msra.mxu1 %v9836_v57 }
 0x516   :  { %9142 = vmatprep.subr.bf16.mxu1 %v9837_v4 }
 0x517   :  { %9179 = vmatpush3.bf16.msra.mxu0 %v9868_v35 }
 0x518   :  { %v6468_v28 = vpop.f32.mrf.mxu1  ;;  %7855 = vmatmul.mubr.bf16.vlgmr.msra.gmra.mxu1 %v6661_v60 }
 0x519   :  { %v10420_v47 = vpop.f32.mrf.mxu0  ;;  %9143 = vmatpush3.bf16.msra.mxu1 %v9838_v22  ;;  %v6469_v1 = vadd.f32 %v6468_v28, %v6428_v23 }
 0x51a   :  { %v6470_v6 = vpop.f32.mrf.mxu1  ;;  %9144 = vmatprep.subr.bf16.mxu1 %v9839_v61  ;;  %v6510_v54 = vadd.f32 %v10420_v47, %v3394_v52 }
 0x51b   :  { %v6471_v40 = vadd.f32 %v6470_v6, %v6430_v62  ;;  %v10422_v8 = vpop.f32.mrf.mxu0  ;;  %v6649_v2 = vmax.f32 %v6469_v1, 0.0 }
 0x51c   :  { %v6472_v12 = vpop.f32.mrf.mxu1  ;;  %v6512_v57 = vadd.f32 %v10422_v8, %v3398_v53 }
 0x51d   :  { %v6650_v0 = vmax.f32 %v6471_v40, 0.0  ;;  %v6513_v26 = vpop.f32.mrf.mxu0  ;;  %9145 = vmatpush3.bf16.msra.mxu1 %v9840_v9  ;;  %v6665_v7 = vpack.c.bf16 %v6649_v2, %v6649_v2 }
 0x51e   :  { %v6473_v14 = vpop.f32.mrf.mxu1  ;;  %9146 = vmatprep.subr.bf16.mxu1 %v9841_v49  ;;  %v3406_v26 = vrot.slane %v10398_v21, %v3373_v46 }
 0x51f   :  { %v6666_v20 = vpack.c.bf16 %v6650_v0, %v6650_v0  ;;  %v6514_v56 = vpop.f32.mrf.mxu0  ;;  %v3402_v0 = vrot.slane %v10398_v21, %v3369_v44 }
 0x521   :  { %9147 = vmatpush3.bf16.msra.mxu1 %v9842_v13  ;;  %7934 = vmatprep.mubr.bf16.mxu1 %v6666_v20 }
 0x522   :  { %9148 = vmatprep.subr.bf16.mxu1 %v9843_v17 }
 0x525   :  { %9149 = vmatpush3.bf16.msra.mxu1 %v9844_v15 }
 0x526   :  { %9150 = vmatprep.subr.bf16.mxu1 %v9845_v29 }
 0x529   :  { %9151 = vmatpush3.bf16.msra.mxu1 %v9846_v38 }
 0x52a   :  { %9152 = vmatprep.subr.bf16.mxu1 %v9847_v43 }
 0x52d   :  { %9153 = vmatpush3.bf16.msra.mxu1 %v9848_v25 }
 0x52e   :  { %9154 = vmatprep.subr.bf16.mxu1 %v9849_v3 }
 0x531   :  { %9155 = vmatpush3.bf16.msra.mxu1 %v9850_v18 }
 0x532   :  { %9156 = vmatprep.subr.bf16.mxu1 %v9851_v30 }
 0x535   :  { %9157 = vmatpush3.bf16.msra.mxu1 %v9852_v11 }
 0x536   :  { %9186 = vmatprep.subr.bf16.mxu1 %v9869_v27 }
 0x538   :  { %7935 = vmatmul.mubr.bf16.vlgmr.msra.gmra.mxu1 %v6665_v7 }
 0x539   :  { %9187 = vmatpush3.bf16.msra.mxu1 %v9870_v33 }
 0x53a   :  { %9188 = vmatprep.subr.bf16.mxu1 %v9871_v10 }
 0x53d   :  { %9189 = vmatpush3.bf16.msra.mxu1 %v9872_v16 }
 0x53e   :  { %9190 = vmatprep.subr.bf16.mxu1 %v9873_v24 }
 0x541   :  { %9191 = vmatpush3.bf16.msra.mxu1 %v9874_v34 }
 0x542   :  { %9192 = vmatprep.subr.bf16.mxu1 %v9875_v19 }
 0x545   :  { %9193 = vmatpush3.bf16.msra.mxu1 %v9876_v42 }
 0x546   :  { %9194 = vmatprep.subr.bf16.mxu1 %v9877_v39 }
 0x549   :  { %9195 = vmatpush3.bf16.msra.mxu1 %v9878_v31 }
 0x54a   :  { %9196 = vmatprep.subr.bf16.mxu1 %v9879_v5 }
 0x54d   :  { %9197 = vmatpush3.bf16.msra.mxu1 %v9880_v37 }
 0x54e   :  { %9198 = vmatprep.subr.bf16.mxu1 %v9881_v51 }
 0x551   :  { %9199 = vmatpush3.bf16.msra.mxu1 %v9882_v45 }
 0x552   :  { %9200 = vmatprep.subr.bf16.mxu1 %v9883_v36 }
 0x555   :  { %9201 = vmatpush3.bf16.msra.mxu1 %v9884_v50 }
 0x558   :  { %v6550_v55 = vpop.f32.mrf.mxu1 }
 0x559   :  { %v6551_v58 = vadd.f32 %v6550_v55, %v6510_v54  ;;  %v6591_v4 = vpop.f32.mrf.mxu0 }
 0x55a   :  { %v6552_v35 = vpop.f32.mrf.mxu1  ;;  %v6592_v13 = vadd.f32 %v6591_v4, %v3402_v0 }
 0x55b   :  { %v6553_v59 = vadd.f32 %v6552_v35, %v6512_v57  ;;  %v6593_v22 = vpop.f32.mrf.mxu0  ;;  %v6651_v60 = vmax.f32 %v6551_v58, 0.0 }
 0x55c   :  { %v6554_v61 = vpop.f32.mrf.mxu1  ;;  %v6594_v17 = vadd.f32 %v6593_v22, %v3406_v26 }
 0x55d   :  { %v6652_v28 = vmax.f32 %v6553_v59, 0.0  ;;  %v6595_v62 = vpop.f32.mrf.mxu0  ;;  %v6667_v49 = vpack.c.bf16 %v6651_v60, %v6651_v60 }
 0x55e   :  { %v6555_v41 = vpop.f32.mrf.mxu1 }
 0x55f   :  { %v6668_v9 = vpack.c.bf16 %v6652_v28, %v6652_v28  ;;  %v6596_v6 = vpop.f32.mrf.mxu0 }
 0x561   :  { %7974 = vmatprep.mubr.bf16.mxu0 %v6668_v9 }
 0x562   :  { %7975 = vmatmul.mubr.bf16.vlgmr.msra.gmra.mxu0 %v6667_v49 }
 0x579   :  { %v9048_v48 = vpop.f32.mrf.mxu0 }
 0x57b   :  { %v9049_v47 = vpop.f32.mrf.mxu0 }
 0x57c   :  { %v9050_v40 = vadd.f32 %v9049_v47, %v9048_v48 }
 0x57d   :  { %v9051_v12 = vpop.f32.mrf.mxu0 }
 0x57e   :  { %v7737_v2 = vadd.f32 %v9050_v40, %v8903_v63 }
 0x57f   :  { %v9052_v8 = vpop.f32.mrf.mxu0 }
 0x598   :  { %v6632_v14 = vpop.f32.mrf.mxu1 }
 0x599   :  { %v6633_v20 = vadd.f32 %v6632_v14, %v6592_v13 }
 0x59a   :  { %v9092_v56 = vpop.f32.mrf.mxu0  ;;  %v6634_v15 = vpop.f32.mrf.mxu1 }
 0x59b   :  { %v6635_v29 = vadd.f32 %v6634_v15, %v6594_v17  ;;  %v6653_v38 = vmax.f32 %v6633_v20, 0.0 }
 0x59c   :  { %v9093_v43 = vpop.f32.mrf.mxu0  ;;  %v6636_v32 = vpop.f32.mrf.mxu1 }
 0x59d   :  { %v6654_v25 = vmax.f32 %v6635_v29, 0.0  ;;  %v9094_v3 = vadd.f32 %v9093_v43, %v9092_v56  ;;  %v6669_v44 = vpack.c.bf16 %v6653_v38, %v6653_v38 }
 0x59e   :  { %v9095_v23 = vpop.f32.mrf.mxu0  ;;  %v6637_v18 = vpop.f32.mrf.mxu1 }
 0x59f   :  { %v6670_v1 = vpack.c.bf16 %v6654_v25, %v6654_v25 }
 0x5a0   :  { %v9096_v30 = vpop.f32.mrf.mxu0 }
 0x5a1   :  { %8014 = vmatprep.mubr.bf16.mxu1 %v6670_v1 }
 0x5a2   :  { %8015 = vmatmul.mubr.bf16.vlgmr.msra.gmra.mxu1 %v6669_v44 }
 0x5b8   :  { %v9070_v46 = vpop.f32.mrf.mxu1 }
 0x5ba   :  { %v9136_v21 = vpop.f32.mrf.mxu0  ;;  %v9071_v11 = vpop.f32.mrf.mxu1 }
 0x5bb   :  { %v9072_v27 = vadd.f32 %v9071_v11, %v9070_v46 }
 0x5bc   :  { %v9137_v33 = vpop.f32.mrf.mxu0  ;;  %v9073_v7 = vpop.f32.mrf.mxu1 }
 0x5bd   :  { %v7777_v10 = vadd.f32 %v9072_v27, %v7737_v2  ;;  %v9138_v16 = vadd.f32 %v9137_v33, %v9136_v21 }
 0x5be   :  { %v9139_v24 = vpop.f32.mrf.mxu0  ;;  %v9074_v34 = vpop.f32.mrf.mxu1 }
 0x5bf   :  { %v7817_v19 = vadd.f32 %v9094_v3, %v7777_v10 }
 0x5c0   :  { %v9140_v42 = vpop.f32.mrf.mxu0 }
 0x5d8   :  { %v9114_v39 = vpop.f32.mrf.mxu1 }
 0x5da   :  { %v9115_v31 = vpop.f32.mrf.mxu1 }
 0x5db   :  { %v9116_v5 = vadd.f32 %v9115_v31, %v9114_v39 }
 0x5dc   :  { %v9117_v37 = vpop.f32.mrf.mxu1 }
 0x5dd   :  { %v7857_v51 = vadd.f32 %v9116_v5, %v7817_v19 }
 0x5de   :  { %v9118_v45 = vpop.f32.mrf.mxu1 }
 0x5df   :  { %v7897_v36 = vadd.f32 %v9138_v16, %v7857_v51 }
 0x5f8   :  { %v9158_v50 = vpop.f32.mrf.mxu1 }
 0x5fa   :  { %v9159_v52 = vpop.f32.mrf.mxu1 }
 0x5fb   :  { %v9160_v53 = vadd.f32 %v9159_v52, %v9158_v50 }
 0x5fc   :  { %v9161_v54 = vpop.f32.mrf.mxu1 }
 0x5fd   :  { %v7937_v55 = vadd.f32 %v9160_v53, %v7897_v36 }
 0x5fe   :  { %v9162_v57 = vpop.f32.mrf.mxu1 }
 0x622   :  { %v9180_v58 = vpop.f32.mrf.mxu0 }
 0x624   :  { %v9181_v4 = vpop.f32.mrf.mxu0 }
 0x625   :  { %v9182_v35 = vadd.f32 %v9181_v4, %v9180_v58 }
 0x626   :  { %v9183_v59 = vpop.f32.mrf.mxu0 }
 0x627   :  { %v7977_v22 = vadd.f32 %v9182_v35, %v7937_v55 }
 0x628   :  { %v9184_v60 = vpop.f32.mrf.mxu0 }
 0x662   :  { %v9202_v61 = vpop.f32.mrf.mxu1 }
 0x664   :  { %v9203_v28 = vpop.f32.mrf.mxu1 }
 0x665   :  { %v9204_v62 = vadd.f32 %v9203_v28, %v9202_v61 }
 0x666   :  { %v9205_v41 = vpop.f32.mrf.mxu1 }
 0x667   :  { %v8017_v9 = vadd.f32 %v9204_v62, %v7977_v22 }
 0x668   :  { %v9206_v6 = vpop.f32.mrf.mxu1 }
 0x669   :  { %8022 = vst [vmem:[%s10453_s9] sm:$0xff] %v8017_v9 }
 0x66a   :  { %8027 = vsyncpa [#allocation3], 1 }
 0x66b   :  { %8028 = vsyncpa [#allocation5], 1 }
 0x66c   :  { %8029 = vsyncpa [#allocation8], 1 }
 0x66d   :  { %8030 = vsyncpa [#allocation11], 1 }
 0x66e   :  { %8031 = vsyncpa [#allocation14], 1 }

</bundles_post_ra>
